<compile_context>
chip_gen: v5e
topology: v5e:2x2
jax: 0.10.0
libtpu: 0.0.40
codegen_flags: <defaults>
</compile_context>

<pallas_src>
import functools

import jax
import jax.numpy as jnp
from jax import lax
from jax.experimental import pallas as pl
from jax.experimental.pallas import tpu as pltpu


def _vq_kernel(z_ref, emb_ref, hesq_ref, zq_ref, idx_ref, colsum_ref, sse_ref,
               *, n_total, needs_mask):
    z = z_ref[...].astype(jnp.float32)        # (TN, D)
    emb = emb_ref[...].astype(jnp.float32)    # (Kpad, D), padded rows are 0
    half_e_sq = hesq_ref[...]                 # (1, Kpad), padded entries huge
    k_pad = emb.shape[0]
    tn = z.shape[0]

    # cross = z @ emb^T, expressed directly as a contraction (no transpose).
    cross = lax.dot_general(z, emb,
                            dimension_numbers=(((1,), (1,)), ((), ())),
                            preferred_element_type=jnp.float32)   # (TN, Kpad)

    # argmin distance: 0.5*||e||^2 - z.e   (||z||^2 row constant dropped)
    dist = half_e_sq - cross                                       # (TN, Kpad)

    # argmin along K with "first minimum wins" (matches torch.argmin ties).
    col_ids = lax.broadcasted_iota(jnp.int32, dist.shape, 1)       # (TN, Kpad)
    row_min = jnp.min(dist, axis=1, keepdims=True)                 # (TN, 1)
    idx = jnp.min(jnp.where(dist == row_min, col_ids, k_pad),
                  axis=1, keepdims=True)                           # (TN, 1) int32

    enc = (col_ids == idx).astype(jnp.float32)                     # (TN, Kpad) one-hot
    # Kpad >= 128 -> full MXU contraction for the codebook lookup.
    zq = jnp.dot(enc, emb, preferred_element_type=jnp.float32)     # (TN, D)

    idx_ref[...] = idx
    zq_ref[...] = zq.astype(zq_ref.dtype)

    diff = zq - z
    if needs_mask:
        row0 = pl.program_id(0) * tn
        rows = row0 + lax.broadcasted_iota(jnp.int32, (tn, 1), 0)
        valid = (rows < n_total).astype(jnp.float32)               # (TN, 1)
        diff = diff * valid
        enc = enc * valid

    sse = jnp.sum(diff * diff)                                     # scalar
    colsum = jnp.sum(enc, axis=0, keepdims=True)                   # (1, Kpad)

    colsum_ref[...] = colsum[None]                                 # (1, 1, Kpad)
    sse_ref[...] = jnp.full((1, 1, 128), sse, dtype=jnp.float32)   # (1, 1, 128)


def vector_quantize_ema_forward(z_e_nchw, embedding, commitment_cost, tile_n=1024):
    """Forward pass of VectorQuantizeEMA (eval-mode semantics).

    Returns (loss, z_q_nchw, perplexity, encodings) matching the PyTorch module.
    """
    B, C, H, W = z_e_nchw.shape
    K, D = embedding.shape
    assert D == C, "embedding_dim must equal channel dim"

    z_nhwc = jnp.transpose(z_e_nchw, (0, 2, 3, 1))
    flat = z_nhwc.reshape(-1, D)
    N = flat.shape[0]

    # ---- lane-dense codebook: pad K up to a multiple of 128 -----------------
    K_pad = max(128, ((K + 127) // 128) * 128)
    emb_pad = jnp.zeros((K_pad, D), embedding.dtype).at[:K].set(embedding)
    half_e_sq = 0.5 * jnp.sum(embedding.astype(jnp.float32) ** 2, axis=1)
    half_e_sq_pad = jnp.full((1, K_pad), 1e30, dtype=jnp.float32).at[0, :K].set(half_e_sq)

    # ---- tile selection & row padding ---------------------------------------
    tile_n = int(((max(int(tile_n), 128) + 127) // 128) * 128)
    # keep the per-tile VMEM footprint modest (z + zq + idx, double buffered)
    bytes_per_row = 4 * max(D, 128)
    max_tile = max(128, (4 * 1024 * 1024 // bytes_per_row) // 128 * 128)
    tile_n = min(tile_n, max_tile)
    if N <= tile_n:
        tile_n = ((N + 127) // 128) * 128
    n_prog = -(-N // tile_n)
    N_pad = n_prog * tile_n
    needs_mask = (N_pad != N)
    flat_pad = flat if not needs_mask else jnp.zeros(
        (N_pad, D), flat.dtype).at[:N].set(flat)

    kernel = functools.partial(_vq_kernel, n_total=N, needs_mask=needs_mask)

    zq_pad, idx_pad, colsum_part, sse_part = pl.pallas_call(
        kernel,
        out_shape=(
            jax.ShapeDtypeStruct((N_pad, D), flat.dtype),           # z_q rows
            jax.ShapeDtypeStruct((N_pad, 1), jnp.int32),            # code indices
            jax.ShapeDtypeStruct((n_prog, 1, K_pad), jnp.float32),  # partial colsum
            jax.ShapeDtypeStruct((n_prog, 1, 128), jnp.float32),    # partial SSE
        ),
        grid_spec=pltpu.PrefetchScalarGridSpec(
            num_scalar_prefetch=0,
            grid=(n_prog,),
            in_specs=[
                pl.BlockSpec((tile_n, D), lambda i: (i, 0)),
                pl.BlockSpec((K_pad, D), lambda i: (0, 0)),
                pl.BlockSpec((1, K_pad), lambda i: (0, 0)),
            ],
            out_specs=[
                pl.BlockSpec((tile_n, D), lambda i: (i, 0)),
                pl.BlockSpec((tile_n, 1), lambda i: (i, 0)),
                pl.BlockSpec((1, 1, K_pad), lambda i: (i, 0, 0)),
                pl.BlockSpec((1, 1, 128), lambda i: (i, 0, 0)),
            ],
        ),
        compiler_params=pltpu.CompilerParams(
            dimension_semantics=("parallel",),       # megacore-shardable on v7x
            vmem_limit_bytes=64 * 1024 * 1024,
        ),
    )(flat_pad, emb_pad, half_e_sq_pad)

    zq_flat = zq_pad[:N]
    idx = idx_pad[:N, 0]
    # one-hot encodings materialized outside the kernel (kernel only writes indices)
    encodings = jax.nn.one_hot(idx, K, dtype=jnp.float32)

    # tiny scalar finalization in the wrapper
    sse = jnp.sum(sse_part[:, 0, 0])
    colsum = jnp.sum(colsum_part[:, 0, :K], axis=0)
    loss = jnp.float32(commitment_cost) * (sse / jnp.float32(N * D))
    avg_probs = colsum / jnp.float32(N)
    perplexity = jnp.exp(-jnp.sum(avg_probs * jnp.log(avg_probs + 1e-10)))

    z_q_nhwc = zq_flat.reshape(B, H, W, C)
    # straight-through estimator: values identical in forward
    z_q_st = z_nhwc + lax.stop_gradient(z_q_nhwc - z_nhwc)
    z_q_out = jnp.transpose(z_q_st, (0, 3, 1, 2))
    # TODO(synk): training-mode EMA buffer updates (_ema_cluster_size, _ema_w,
    # embedding reassignment) are stateful and do not affect the returned
    # values; they are not implemented here.
    # TODO(synk): for very small D the z_q store is a masked partial store; a
    # lane-dense (N*D//128, 128) output layout would need an in-kernel relayout.
    return loss, z_q_out, perplexity, encodings


def _reference(z_e_nchw, embedding, commitment_cost):
    z = jnp.transpose(z_e_nchw, (0, 2, 3, 1))
    shape = z.shape
    flat = z.reshape(-1, embedding.shape[1])
    dist = (jnp.sum(flat ** 2, axis=1, keepdims=True)
            + jnp.sum(embedding ** 2, axis=1)
            - 2.0 * flat @ embedding.T)
    idx = jnp.argmin(dist, axis=1)
    enc = jax.nn.one_hot(idx, embedding.shape[0], dtype=jnp.float32)
    zq = (enc @ embedding).reshape(shape)
    loss = commitment_cost * jnp.mean((zq - z) ** 2)
    avg_probs = jnp.mean(enc, axis=0)
    perp = jnp.exp(-jnp.sum(avg_probs * jnp.log(avg_probs + 1e-10)))
    return loss, jnp.transpose(zq, (0, 3, 1, 2)), perp, enc


if __name__ == "__main__":
    import numpy as np

    n_embeddings = 16
    embedding_dim = 4
    commitment_cost = 0.25

    key = jax.random.PRNGKey(0)
    k_emb, k_x, k_x2 = jax.random.split(key, 3)
    # nn.Embedding(...).weight.data.normal_() -> standard normal codebook
    embedding = jax.random.normal(k_emb, (n_embeddings, embedding_dim), jnp.float32)
    # encoder output z_e in NCHW
    z_e = jax.random.normal(k_x, (2, embedding_dim, 16, 16), jnp.float32)

    loss, z_q, perplexity, encodings = jax.block_until_ready(
        vector_quantize_ema_forward(z_e, embedding, commitment_cost))

    loss_r, z_q_r, perp_r, enc_r = _reference(z_e, embedding, commitment_cost)
    np.testing.assert_allclose(np.asarray(loss), np.asarray(loss_r), rtol=1e-5, atol=1e-5)
    np.testing.assert_allclose(np.asarray(z_q), np.asarray(z_q_r), rtol=1e-5, atol=1e-5)
    np.testing.assert_allclose(np.asarray(perplexity), np.asarray(perp_r), rtol=1e-5, atol=1e-5)
    np.testing.assert_allclose(np.asarray(encodings), np.asarray(enc_r), rtol=0, atol=0)

    # second case: multi-program grid + ragged N (exercises masking path)
    z_e2 = jax.random.normal(k_x2, (3, embedding_dim, 10, 12), jnp.float32)
    loss2, z_q2, perp2, enc2 = jax.block_until_ready(
        vector_quantize_ema_forward(z_e2, embedding, commitment_cost, tile_n=128))
    loss2_r, z_q2_r, perp2_r, enc2_r = _reference(z_e2, embedding, commitment_cost)
    np.testing.assert_allclose(np.asarray(loss2), np.asarray(loss2_r), rtol=1e-5, atol=1e-5)
    np.testing.assert_allclose(np.asarray(z_q2), np.asarray(z_q2_r), rtol=1e-5, atol=1e-5)
    np.testing.assert_allclose(np.asarray(perp2), np.asarray(perp2_r), rtol=1e-5, atol=1e-5)
    np.testing.assert_allclose(np.asarray(enc2), np.asarray(enc2_r), rtol=0, atol=0)

    print("KERNEL_OK")
</pallas_src>

<mosaic_0001>
module attributes {stable_mosaic.version = 11 : i64} {
  func.func @_vq_kernel(%arg0: i32, %arg1: memref<512x4xf32, #tpu.memory_space<vmem>>, %arg2: memref<128x4xf32, #tpu.memory_space<vmem>>, %arg3: memref<1x128xf32, #tpu.memory_space<vmem>>, %arg4: memref<512x4xf32, #tpu.memory_space<vmem>>, %arg5: memref<512x1xi32, #tpu.memory_space<vmem>>, %arg6: memref<1x1x128xf32, #tpu.memory_space<vmem>>, %arg7: memref<1x1x128xf32, #tpu.memory_space<vmem>>) attributes {dimension_semantics = [#tpu.dimension_semantics<parallel>], iteration_bounds = array<i64: 1>, scalar_prefetch = 0 : i64, scratch_operands = 0 : i64, tpu.core_type = #tpu.core_type<tc>, window_params = [{transform_indices = @transform_0, window_bounds = array<i64: 512, 4>}, {pipeline_mode = #tpu.pipeline_mode<synchronous>, transform_indices = @transform_1, window_bounds = array<i64: 128, 4>}, {pipeline_mode = #tpu.pipeline_mode<synchronous>, transform_indices = @transform_2, window_bounds = array<i64: 1, 128>}, {transform_indices = @transform_3, window_bounds = array<i64: 512, 4>}, {transform_indices = @transform_4, window_bounds = array<i64: 512, 1>}, {transform_indices = @transform_5, window_bounds = array<i64: 1, 1, 128>}, {transform_indices = @transform_6, window_bounds = array<i64: 1, 1, 128>}]} {
    %c0 = arith.constant 0 : index
    %c0_0 = arith.constant 0 : index
    %0 = vector.load %arg1[%c0, %c0_0] : memref<512x4xf32, #tpu.memory_space<vmem>>, vector<512x4xf32>
    %c0_1 = arith.constant 0 : index
    %c0_2 = arith.constant 0 : index
    %1 = vector.load %arg2[%c0_1, %c0_2] : memref<128x4xf32, #tpu.memory_space<vmem>>, vector<128x4xf32>
    %c0_3 = arith.constant 0 : index
    %c0_4 = arith.constant 0 : index
    %2 = vector.load %arg3[%c0_3, %c0_4] : memref<1x128xf32, #tpu.memory_space<vmem>>, vector<1x128xf32>
    %cst = arith.constant dense<0.000000e+00> : vector<512x128xf32>
    %3 = tpu.matmul %0, %1, %cst {dimension_numbers = #tpu.dot_dimension_numbers<[1], [1], [0], [0], [0, 0, 1, 0], [], []>} : vector<512x4xf32>, vector<128x4xf32>, vector<512x128xf32> -> vector<512x128xf32>
    %4 = vector.broadcast %2 : vector<1x128xf32> to vector<512x128xf32>
    %5 = arith.subf %4, %3 : vector<512x128xf32>
    %6 = tpu.iota {dimensions = array<i32: 1>} : vector<512x128xi32>
    %cst_5 = arith.constant dense<0x7F800000> : vector<512xf32>
    %7 = vector.multi_reduction <minimumf>, %5, %cst_5 [1] : vector<512x128xf32> to vector<512xf32>
    %8 = vector.shape_cast %7 : vector<512xf32> to vector<512x1xf32>
    %9 = vector.broadcast %8 : vector<512x1xf32> to vector<512x128xf32>
    %10 = arith.cmpf oeq, %5, %9 : vector<512x128xf32>
    %c128_i32 = arith.constant 128 : i32
    %11 = vector.broadcast %c128_i32 : i32 to vector<512x128xi32>
    %12 = arith.select %10, %6, %11 : vector<512x128xi1>, vector<512x128xi32>
    %cst_6 = arith.constant dense<2147483647> : vector<512xi32>
    %13 = vector.multi_reduction <minsi>, %12, %cst_6 [1] : vector<512x128xi32> to vector<512xi32>
    %14 = vector.shape_cast %13 : vector<512xi32> to vector<512x1xi32>
    %15 = vector.broadcast %14 : vector<512x1xi32> to vector<512x128xi32>
    %16 = arith.cmpi eq, %6, %15 : vector<512x128xi32>
    %17 = arith.extui %16 : vector<512x128xi1> to vector<512x128xi32>
    %18 = arith.sitofp %17 : vector<512x128xi32> to vector<512x128xf32>
    %cst_7 = arith.constant dense<0.000000e+00> : vector<512x4xf32>
    %19 = tpu.matmul %18, %1, %cst_7 {dimension_numbers = #tpu.dot_dimension_numbers<[1], [0], [0], [1], [0, 0, 1, 1], [], []>} : vector<512x128xf32>, vector<128x4xf32>, vector<512x4xf32> -> vector<512x4xf32>
    %c0_8 = arith.constant 0 : index
    %c0_9 = arith.constant 0 : index
    %20 = vector.load %arg5[%c0_8, %c0_9] : memref<512x1xi32, #tpu.memory_space<vmem>>, vector<512x1xi32>
    tpu.vector_store %arg5[%c0_8, %c0_9], %14 {strides = array<i32>} : memref<512x1xi32, #tpu.memory_space<vmem>>, vector<512x1xi32>,
    %c0_10 = arith.constant 0 : index
    %c0_11 = arith.constant 0 : index
    %21 = vector.load %arg4[%c0_10, %c0_11] : memref<512x4xf32, #tpu.memory_space<vmem>>, vector<512x4xf32>
    tpu.vector_store %arg4[%c0_10, %c0_11], %19 {strides = array<i32>} : memref<512x4xf32, #tpu.memory_space<vmem>>, vector<512x4xf32>,
    %22 = arith.subf %19, %0 : vector<512x4xf32>
    %23 = arith.mulf %22, %22 : vector<512x4xf32>
    %24 = vector.shape_cast %23 : vector<512x4xf32> to vector<1x512x4xf32>
    %cst_12 = arith.constant dense<0.000000e+00> : vector<1xf32>
    %25 = vector.multi_reduction <add>, %24, %cst_12 [1, 2] : vector<1x512x4xf32> to vector<1xf32>
    %26 = vector.shape_cast %25 : vector<1xf32> to vector<1x1x1xf32>
    %27 = vector.extract %26[0, 0, 0] : f32 from vector<1x1x1xf32>
    %cst_13 = arith.constant dense<0.000000e+00> : vector<128xf32>
    %28 = vector.multi_reduction <add>, %18, %cst_13 [0] : vector<512x128xf32> to vector<128xf32>
    %29 = vector.shape_cast %28 : vector<128xf32> to vector<1x128xf32>
    %30 = vector.shape_cast %29 : vector<1x128xf32> to vector<1x1x128xf32>
    %c0_14 = arith.constant 0 : index
    %c0_15 = arith.constant 0 : index
    %c0_16 = arith.constant 0 : index
    %31 = vector.load %arg6[%c0_14, %c0_15, %c0_16] : memref<1x1x128xf32, #tpu.memory_space<vmem>>, vector<1x1x128xf32>
    tpu.vector_store %arg6[%c0_14, %c0_15, %c0_16], %30 {strides = array<i32>} : memref<1x1x128xf32, #tpu.memory_space<vmem>>, vector<1x1x128xf32>,
    %32 = vector.broadcast %27 : f32 to vector<1x1x128xf32>
    %c0_17 = arith.constant 0 : index
    %c0_18 = arith.constant 0 : index
    %c0_19 = arith.constant 0 : index
    %33 = vector.load %arg7[%c0_17, %c0_18, %c0_19] : memref<1x1x128xf32, #tpu.memory_space<vmem>>, vector<1x1x128xf32>
    tpu.vector_store %arg7[%c0_17, %c0_18, %c0_19], %32 {strides = array<i32>} : memref<1x1x128xf32, #tpu.memory_space<vmem>>, vector<1x1x128xf32>,
    return
  }
  func.func @transform_0(%arg0: i32) -> (i32, i32) {
    %c0_i32 = arith.constant 0 : i32
    %c0_i32_0 = arith.constant 0 : i32
    return %arg0, %c0_i32 : i32, i32
  }
  func.func @transform_1(%arg0: i32) -> (i32, i32) {
    %c0_i32 = arith.constant 0 : i32
    %c0_i32_0 = arith.constant 0 : i32
    %c0_i32_1 = arith.constant 0 : i32
    return %c0_i32, %c0_i32_0 : i32, i32
  }
  func.func @transform_2(%arg0: i32) -> (i32, i32) {
    %c0_i32 = arith.constant 0 : i32
    %c0_i32_0 = arith.constant 0 : i32
    %c0_i32_1 = arith.constant 0 : i32
    return %c0_i32, %c0_i32_0 : i32, i32
  }
  func.func @transform_3(%arg0: i32) -> (i32, i32) {
    %c0_i32 = arith.constant 0 : i32
    %c0_i32_0 = arith.constant 0 : i32
    return %arg0, %c0_i32 : i32, i32
  }
  func.func @transform_4(%arg0: i32) -> (i32, i32) {
    %c0_i32 = arith.constant 0 : i32
    %c0_i32_0 = arith.constant 0 : i32
    return %arg0, %c0_i32 : i32, i32
  }
  func.func @transform_5(%arg0: i32) -> (i32, i32, i32) {
    %c0_i32 = arith.constant 0 : i32
    %c0_i32_0 = arith.constant 0 : i32
    %c0_i32_1 = arith.constant 0 : i32
    return %arg0, %c0_i32, %c0_i32_0 : i32, i32, i32
  }
  func.func @transform_6(%arg0: i32) -> (i32, i32, i32) {
    %c0_i32 = arith.constant 0 : i32
    %c0_i32_0 = arith.constant 0 : i32
    %c0_i32_1 = arith.constant 0 : i32
    return %arg0, %c0_i32, %c0_i32_0 : i32, i32, i32
  }
}

</mosaic_0001>

<bundles_post_ra>
// kernel: tpu_custom_call.1
= control target key start
LH: loop header
LB: loop body
LE: loop exit
PB: predicated region body
PF: predicated region fallthrough
CT: control target
= control target key end

     0   :  { %12 = vsyncpa [#allocation3], 0  ;;  %vm101_vm0 = vcmask 31744   ;;  %s6480_s0 = inlined_call_operand.vmem [shape: f32[512,4], index: 0, kind: input, shape index: {}]   ;;  %s6481_s1 = inlined_call_operand.vmem [shape: f32[128,4], index: 1, kind: input, shape index: {}]   ;;  %s6482_s2 = inlined_call_operand.vmem [shape: f32[1,128], index: 2, kind: input, shape index: {}]   ;;  %s6483_s3 = inlined_call_operand.vmem [shape: f32[512,4], index: 3, kind: output, shape index: {0}]   ;;  %s6484_s4 = inlined_call_operand.vmem [shape: s32[512,1], index: 4, kind: output, shape index: {1}]   ;;  %s6485_s5 = inlined_call_operand.hbm [shape: f32[1,1,128], index: 5, kind: output, shape index: {2}]   ;;  %s6486_s6 = inlined_call_operand.hbm [shape: f32[1,1,128], index: 6, kind: output, shape index: {3}]  }
   0x1   :  { %v3117_v0 = vld [vmem:[%s6481_s1 + $0x78] sm:$0xff]  ;;  %v3126_v1 = vld [vmem:[%s6481_s1 + $0x70] sm:$0xff] }
   0x2   :  { %2678 = vmatpush.xpose.msk.msra.mxu0 %vm101_vm0, %v3117_v0  ;;  %2886 = vmatpush.xpose.msk.msra.mxu2 %vm101_vm0, %v3117_v0 }
   0x3   :  { %2887 = vmatpush.xpose.msk.msra.mxu3 %vm101_vm0, %v3117_v0  ;;  %2918 = vmatpush.msra.mxu1 %v3117_v0 }
   0x4   :  { %13 = vsyncpa [#allocation5], 0  ;;  %v3139_v2 = vld [vmem:[%s6481_s1 + $0x68] sm:$0xff]  ;;  %v3147_v3 = vld [vmem:[%s6481_s1 + $0x60] sm:$0xff]  ;;  %s3077_s7 = smov [#allocation2]   ;;  %s2649_s10 = sshll.u32 %s6485_s5, 4  ;;  %s2650_s10 = int_to_ptr.hbm [resolvable:$true] %s2649_s10 }
   0x5   :  { %2920 = vmatpush.msra.mxu1 %v3126_v1  ;;  %v3157_v4 = vld [vmem:[%s6481_s1 + $0x58] sm:$0xff]  ;;  %v3165_v5 = vld [vmem:[%s6481_s1 + $0x50] sm:$0xff]  ;;  %v3175_v6 = vld [vmem:[%s6481_s1 + $0x48] sm:$0xff]  ;;  %s2660_s13 = sshll.u32 %s6486_s6, 4  ;;  %s2661_s13 = int_to_ptr.hbm [resolvable:$true] %s2660_s13 }
   0x6   :  { %2679 = vmatpush.xpose.msk.msra.mxu0 %vm101_vm0, %v3126_v1  ;;  %2888 = vmatpush.xpose.msk.msra.mxu2 %vm101_vm0, %v3126_v1  ;;  %v3183_v7 = vld [vmem:[%s6481_s1 + $0x40] sm:$0xff]  ;;  %v3193_v8 = vld [vmem:[%s6481_s1 + $0x38] sm:$0xff]  ;;  %v3201_v9 = vld [vmem:[%s6481_s1 + $0x30] sm:$0xff] }
   0x7   :  { %2889 = vmatpush.xpose.msk.msra.mxu3 %vm101_vm0, %v3126_v1  ;;  %2922 = vmatpush.msra.mxu1 %v3139_v2  ;;  %v3211_v10 = vld [vmem:[%s6481_s1 + $0x28] sm:$0xff]  ;;  %v3219_v11 = vld [vmem:[%s6481_s1 + $0x20] sm:$0xff]  ;;  %v3229_v12 = vld [vmem:[%s6481_s1 + $0x18] sm:$0xff] }
   0x8   :  { %v3237_v13 = vld [vmem:[%s6481_s1 + $0x10] sm:$0xff]  ;;  %v3247_v14 = vld [vmem:[%s6481_s1 + $0x8] sm:$0xff]  ;;  %v3255_v15 = vld [vmem:[%s6481_s1] sm:$0xff] }
   0x9   :  { %2924 = vmatpush.msra.mxu1 %v3147_v3  ;;  %v20_v16 = vld [vmem:[%s6480_s0] sm:$0xff]  ;;  %v49_v17 = vld [vmem:[%s6480_s0 + $0xe8] sm:$0xff]  ;;  %v50_v19 = vld [vmem:[%s6480_s0 + $0xf0] sm:$0xff] }
   0xa   :  { %2680 = vmatpush.xpose.msk.msra.mxu0 %vm101_vm0, %v3139_v2  ;;  %2890 = vmatpush.xpose.msk.msra.mxu2 %vm101_vm0, %v3139_v2  ;;  %v21_v18 = vld [vmem:[%s6480_s0 + $0x8] sm:$0xff]  ;;  %v22_v20 = vld [vmem:[%s6480_s0 + $0x10] sm:$0xff]  ;;  %v51_v21 = vld [vmem:[%s6480_s0 + $0xf8] sm:$0xff] }
   0xb   :  { %2891 = vmatpush.xpose.msk.msra.mxu3 %vm101_vm0, %v3139_v2  ;;  %2926 = vmatpush.msra.mxu1 %v3157_v4  ;;  %v23_v22 = vld [vmem:[%s6480_s0 + $0x18] sm:$0xff]  ;;  %v52_v23 = vld [vmem:[%s6480_s0 + $0x100] sm:$0xff]  ;;  %v53_v25 = vld [vmem:[%s6480_s0 + $0x108] sm:$0xff] }
   0xc   :  { %v24_v24 = vld [vmem:[%s6480_s0 + $0x20] sm:$0xff]  ;;  %v25_v26 = vld [vmem:[%s6480_s0 + $0x28] sm:$0xff]  ;;  %v54_v27 = vld [vmem:[%s6480_s0 + $0x110] sm:$0xff] }
   0xd   :  { %2928 = vmatpush.msra.mxu1 %v3165_v5  ;;  %v26_v28 = vld [vmem:[%s6480_s0 + $0x30] sm:$0xff]  ;;  %v55_v29 = vld [vmem:[%s6480_s0 + $0x118] sm:$0xff]  ;;  %v56_v31 = vld [vmem:[%s6480_s0 + $0x120] sm:$0xff] }
   0xe   :  { %2681 = vmatpush.xpose.msk.msra.mxu0 %vm101_vm0, %v3147_v3  ;;  %2892 = vmatpush.xpose.msk.msra.mxu2 %vm101_vm0, %v3147_v3  ;;  %v27_v30 = vld [vmem:[%s6480_s0 + $0x38] sm:$0xff]  ;;  %v28_v32 = vld [vmem:[%s6480_s0 + $0x40] sm:$0xff]  ;;  %v57_v33 = vld [vmem:[%s6480_s0 + $0x128] sm:$0xff] }
   0xf   :  { %2893 = vmatpush.xpose.msk.msra.mxu3 %vm101_vm0, %v3147_v3  ;;  %2930 = vmatpush.msra.mxu1 %v3175_v6  ;;  %v29_v34 = vld [vmem:[%s6480_s0 + $0x48] sm:$0xff]  ;;  %v58_v35 = vld [vmem:[%s6480_s0 + $0x130] sm:$0xff]  ;;  %v59_v37 = vld [vmem:[%s6480_s0 + $0x138] sm:$0xff] }
  0x10   :  { %v30_v36 = vld [vmem:[%s6480_s0 + $0x50] sm:$0xff]  ;;  %v31_v38 = vld [vmem:[%s6480_s0 + $0x58] sm:$0xff]  ;;  %v60_v39 = vld [vmem:[%s6480_s0 + $0x140] sm:$0xff] }
  0x11   :  { %2932 = vmatpush.msra.mxu1 %v3183_v7  ;;  %v32_v40 = vld [vmem:[%s6480_s0 + $0x60] sm:$0xff]  ;;  %v61_v41 = vld [vmem:[%s6480_s0 + $0x148] sm:$0xff]  ;;  %v62_v43 = vld [vmem:[%s6480_s0 + $0x150] sm:$0xff] }
  0x12   :  { %2682 = vmatpush.xpose.msk.msra.mxu0 %vm101_vm0, %v3157_v4  ;;  %2894 = vmatpush.xpose.msk.msra.mxu2 %vm101_vm0, %v3157_v4  ;;  %v33_v42 = vld [vmem:[%s6480_s0 + $0x68] sm:$0xff]  ;;  %v34_v44 = vld [vmem:[%s6480_s0 + $0x70] sm:$0xff]  ;;  %v63_v45 = vld [vmem:[%s6480_s0 + $0x158] sm:$0xff] }
  0x13   :  { %2895 = vmatpush.xpose.msk.msra.mxu3 %vm101_vm0, %v3157_v4  ;;  %2934 = vmatpush.msra.mxu1 %v3193_v8  ;;  %v35_v46 = vld [vmem:[%s6480_s0 + $0x78] sm:$0xff]  ;;  %v64_v47 = vld [vmem:[%s6480_s0 + $0x160] sm:$0xff]  ;;  %v65_v51 = vld [vmem:[%s6480_s0 + $0x168] sm:$0xff] }
  0x14   :  { %v3469_v48 = vld [vmem:[%s6482_s2] ss:$0 sm:$0xff]  ;;  %v37_v56 = vld [vmem:[%s6480_s0 + $0x88] sm:$0xff]  ;;  %v66_v57 = vld [vmem:[%s6480_s0 + $0x170] sm:$0xff] }
  0x15   :  { %2936 = vmatpush.msra.mxu1 %v3201_v9  ;;  %v36_v50 = vld [vmem:[%s6480_s0 + $0x80] sm:$0xff]  ;;  %v38_v61 = vld [vmem:[%s6480_s0 + $0x90] sm:$0xff]  ;;  %v67_v62 = vld [vmem:[%s6480_s0 + $0x178] sm:$0xff] }
  0x16   :  { %2683 = vmatpush.xpose.msk.msra.mxu0 %vm101_vm0, %v3165_v5  ;;  %2896 = vmatpush.xpose.msk.msra.mxu2 %vm101_vm0, %v3165_v5 }
  0x17   :  { %2897 = vmatpush.xpose.msk.msra.mxu3 %vm101_vm0, %v3165_v5  ;;  %2938 = vmatpush.msra.mxu1 %v3211_v10 }
  0x19   :  { %2940 = vmatpush.msra.mxu1 %v3219_v11 }
  0x1a   :  { %2684 = vmatpush.xpose.msk.msra.mxu0 %vm101_vm0, %v3175_v6  ;;  %2898 = vmatpush.xpose.msk.msra.mxu2 %vm101_vm0, %v3175_v6 }
  0x1b   :  { %2899 = vmatpush.xpose.msk.msra.mxu3 %vm101_vm0, %v3175_v6  ;;  %2942 = vmatpush.msra.mxu1 %v3229_v12 }
  0x1d   :  { %2944 = vmatpush.msra.mxu1 %v3237_v13 }
  0x1e   :  { %2685 = vmatpush.xpose.msk.msra.mxu0 %vm101_vm0, %v3183_v7  ;;  %2900 = vmatpush.xpose.msk.msra.mxu2 %vm101_vm0, %v3183_v7 }
  0x1f   :  { %2901 = vmatpush.xpose.msk.msra.mxu3 %vm101_vm0, %v3183_v7  ;;  %2946 = vmatpush.msra.mxu1 %v3247_v14 }
  0x21   :  { %2948 = vmatpush.msra.mxu1 %v3255_v15 }
  0x22   :  { %2686 = vmatpush.xpose.msk.msra.mxu0 %vm101_vm0, %v3193_v8  ;;  %2902 = vmatpush.xpose.msk.msra.mxu2 %vm101_vm0, %v3193_v8 }
  0x23   :  { %2903 = vmatpush.xpose.msk.msra.mxu3 %vm101_vm0, %v3193_v8 }
  0x26   :  { %2687 = vmatpush.xpose.msk.msra.mxu0 %vm101_vm0, %v3201_v9  ;;  %2904 = vmatpush.xpose.msk.msra.mxu2 %vm101_vm0, %v3201_v9 }
  0x27   :  { %2905 = vmatpush.xpose.msk.msra.mxu3 %vm101_vm0, %v3201_v9 }
  0x2a   :  { %2688 = vmatpush.xpose.msk.msra.mxu0 %vm101_vm0, %v3211_v10  ;;  %2906 = vmatpush.xpose.msk.msra.mxu2 %vm101_vm0, %v3211_v10 }
  0x2b   :  { %2907 = vmatpush.xpose.msk.msra.mxu3 %vm101_vm0, %v3211_v10 }
  0x2e   :  { %2689 = vmatpush.xpose.msk.msra.mxu0 %vm101_vm0, %v3219_v11  ;;  %2908 = vmatpush.xpose.msk.msra.mxu2 %vm101_vm0, %v3219_v11 }
  0x2f   :  { %2909 = vmatpush.xpose.msk.msra.mxu3 %vm101_vm0, %v3219_v11 }
  0x32   :  { %2690 = vmatpush.xpose.msk.msra.mxu0 %vm101_vm0, %v3229_v12  ;;  %2910 = vmatpush.xpose.msk.msra.mxu2 %vm101_vm0, %v3229_v12 }
  0x33   :  { %2911 = vmatpush.xpose.msk.msra.mxu3 %vm101_vm0, %v3229_v12 }
  0x36   :  { %2691 = vmatpush.xpose.msk.msra.mxu0 %vm101_vm0, %v3237_v13  ;;  %2912 = vmatpush.xpose.msk.msra.mxu2 %vm101_vm0, %v3237_v13 }
  0x37   :  { %2913 = vmatpush.xpose.msk.msra.mxu3 %vm101_vm0, %v3237_v13 }
  0x3a   :  { %2692 = vmatpush.xpose.msk.msra.mxu0 %vm101_vm0, %v3247_v14  ;;  %2914 = vmatpush.xpose.msk.msra.mxu2 %vm101_vm0, %v3247_v14 }
  0x3b   :  { %2915 = vmatpush.xpose.msk.msra.mxu3 %vm101_vm0, %v3247_v14 }
  0x3e   :  { %2693 = vmatpush.xpose.msk.msra.mxu0 %vm101_vm0, %v3255_v15  ;;  %2916 = vmatpush.xpose.msk.msra.mxu2 %vm101_vm0, %v3255_v15 }
  0x3f   :  { %2917 = vmatpush.xpose.msk.msra.mxu3 %vm101_vm0, %v3255_v15 }
  0x41   :  { %2694 = vmatmul.msk.f32.vlgmr.msra.gmra.mxu0 %vm101_vm0, %v20_v16  ;;  %2723 = vmatmul.msk.f32.vlgmr.msra.gmra.mxu2 %vm101_vm0, %v49_v17 }
  0x42   :  { %1964 = vmatpush.msrb.mxu0 %v3117_v0 }
  0x43   :  { %2919 = vmatpush.msrb.mxu3 %v3117_v0 }
  0x44   :  { %1965 = vmatpush.msrb.mxu0 %v3126_v1 }
  0x45   :  { %2921 = vmatpush.msrb.mxu3 %v3126_v1 }
  0x46   :  { %1966 = vmatpush.msrb.mxu0 %v3139_v2 }
  0x47   :  { %2923 = vmatpush.msrb.mxu3 %v3139_v2  ;;  %v39_v2 = vld [vmem:[%s6480_s0 + $0x98] sm:$0xff] }
  0x48   :  { %1967 = vmatpush.msrb.mxu0 %v3147_v3 }
  0x49   :  { %2925 = vmatpush.msrb.mxu3 %v3147_v3  ;;  %2695 = vmatmul.msk.f32.gmra.mxu0 %vm101_vm0, %v21_v18  ;;  %v68_v3 = vld [vmem:[%s6480_s0 + $0x180] sm:$0xff] }
  0x4a   :  { %1968 = vmatpush.msrb.mxu0 %v3157_v4  ;;  %2724 = vmatmul.msk.f32.gmra.mxu2 %vm101_vm0, %v50_v19 }
  0x4b   :  { %2927 = vmatpush.msrb.mxu3 %v3157_v4 }
  0x4c   :  { %1969 = vmatpush.msrb.mxu0 %v3165_v5 }
  0x4d   :  { %2929 = vmatpush.msrb.mxu3 %v3165_v5 }
  0x4e   :  { %1970 = vmatpush.msrb.mxu0 %v3175_v6 }
  0x4f   :  { %2931 = vmatpush.msrb.mxu3 %v3175_v6 }
  0x50   :  { %1971 = vmatpush.msrb.mxu0 %v3183_v7 }
  0x51   :  { %2933 = vmatpush.msrb.mxu3 %v3183_v7  ;;  %2696 = vmatmul.msk.f32.gmra.mxu0 %vm101_vm0, %v22_v20  ;;  %v40_v7 = vld [vmem:[%s6480_s0 + $0xa0] sm:$0xff]  ;;  %v42_v20 = vld [vmem:[%s6480_s0 + $0xb0] sm:$0xff] }
  0x52   :  { %1972 = vmatpush.msrb.mxu0 %v3193_v8  ;;  %2725 = vmatmul.msk.f32.gmra.mxu2 %vm101_vm0, %v51_v21  ;;  %v71_v21 = vld [vmem:[%s6480_s0 + $0x198] sm:$0xff] }
  0x53   :  { %2935 = vmatpush.msrb.mxu3 %v3193_v8  ;;  %v69_v8 = vld [vmem:[%s6480_s0 + $0x188] sm:$0xff] }
  0x54   :  { %1973 = vmatpush.msrb.mxu0 %v3201_v9 }
  0x55   :  { %2937 = vmatpush.msrb.mxu3 %v3201_v9 }
  0x56   :  { %1974 = vmatpush.msrb.mxu0 %v3211_v10 }
  0x57   :  { %2939 = vmatpush.msrb.mxu3 %v3211_v10 }
  0x58   :  { %1975 = vmatpush.msrb.mxu0 %v3219_v11 }
  0x59   :  { %2941 = vmatpush.msrb.mxu3 %v3219_v11  ;;  %2697 = vmatmul.msk.f32.gmra.mxu0 %vm101_vm0, %v23_v22 }
  0x5a   :  { %1976 = vmatpush.msrb.mxu0 %v3229_v12  ;;  %2726 = vmatmul.msk.f32.gmra.mxu2 %vm101_vm0, %v52_v23 }
  0x5b   :  { %2943 = vmatpush.msrb.mxu3 %v3229_v12 }
  0x5c   :  { %1977 = vmatpush.msrb.mxu0 %v3237_v13 }
  0x5d   :  { %2945 = vmatpush.msrb.mxu3 %v3237_v13  ;;  %v41_v13 = vld [vmem:[%s6480_s0 + $0xa8] sm:$0xff] }
  0x5e   :  { %1978 = vmatpush.msrb.mxu0 %v3247_v14 }
  0x5f   :  { %2947 = vmatpush.msrb.mxu3 %v3247_v14  ;;  %v70_v14 = vld [vmem:[%s6480_s0 + $0x190] sm:$0xff] }
  0x60   :  { %1979 = vmatpush.msrb.mxu0 %v3255_v15 }
  0x61   :  { %2949 = vmatpush.msrb.mxu3 %v3255_v15  ;;  %2698 = vmatmul.msk.f32.gmra.mxu0 %vm101_vm0, %v24_v24 }
  0x62   :  { %2727 = vmatmul.msk.f32.gmra.mxu2 %vm101_vm0, %v53_v25 }
  0x69   :  { %2699 = vmatmul.msk.f32.gmra.mxu0 %vm101_vm0, %v25_v26 }
  0x6a   :  { %2728 = vmatmul.msk.f32.gmra.mxu2 %vm101_vm0, %v54_v27  ;;  %v43_v27 = vld [vmem:[%s6480_s0 + $0xb8] sm:$0xff] }
  0x71   :  { %2700 = vmatmul.msk.f32.gmra.mxu0 %vm101_vm0, %v26_v28  ;;  %v72_v28 = vld [vmem:[%s6480_s0 + $0x1a0] sm:$0xff] }
  0x72   :  { %2729 = vmatmul.msk.f32.gmra.mxu2 %vm101_vm0, %v55_v29 }
  0x79   :  { %2701 = vmatmul.msk.f32.gmra.mxu0 %vm101_vm0, %v27_v30 }
  0x7a   :  { %2730 = vmatmul.msk.f32.gmra.mxu2 %vm101_vm0, %v56_v31 }
  0x81   :  { %2702 = vmatmul.msk.f32.gmra.mxu0 %vm101_vm0, %v28_v32  ;;  %v44_v32 = vld [vmem:[%s6480_s0 + $0xc0] sm:$0xff] }
  0x82   :  { %2731 = vmatmul.msk.f32.gmra.mxu2 %vm101_vm0, %v57_v33 }
  0x89   :  { %2703 = vmatmul.msk.f32.gmra.mxu0 %vm101_vm0, %v29_v34  ;;  %v73_v34 = vld [vmem:[%s6480_s0 + $0x1a8] sm:$0xff] }
  0x8a   :  { %2732 = vmatmul.msk.f32.gmra.mxu2 %vm101_vm0, %v58_v35 }
  0x91   :  { %2704 = vmatmul.msk.f32.gmra.mxu0 %vm101_vm0, %v30_v36 }
  0x92   :  { %2733 = vmatmul.msk.f32.gmra.mxu2 %vm101_vm0, %v59_v37 }
  0x99   :  { %2705 = vmatmul.msk.f32.gmra.mxu0 %vm101_vm0, %v31_v38  ;;  %v45_v38 = vld [vmem:[%s6480_s0 + $0xc8] sm:$0xff] }
  0x9a   :  { %2734 = vmatmul.msk.f32.gmra.mxu2 %vm101_vm0, %v60_v39  ;;  %v74_v39 = vld [vmem:[%s6480_s0 + $0x1b0] sm:$0xff] }
  0xa1   :  { %2706 = vmatmul.msk.f32.gmra.mxu0 %vm101_vm0, %v32_v40 }
  0xa2   :  { %2735 = vmatmul.msk.f32.gmra.mxu2 %vm101_vm0, %v61_v41 }
  0xa9   :  { %2707 = vmatmul.msk.f32.gmra.mxu0 %vm101_vm0, %v33_v42 }
  0xaa   :  { %2736 = vmatmul.msk.f32.gmra.mxu2 %vm101_vm0, %v62_v43 }
  0xb1   :  { %2708 = vmatmul.msk.f32.gmra.mxu0 %vm101_vm0, %v34_v44  ;;  %v46_v44 = vld [vmem:[%s6480_s0 + $0xd0] sm:$0xff] }
  0xb2   :  { %2737 = vmatmul.msk.f32.gmra.mxu2 %vm101_vm0, %v63_v45 }
  0xb9   :  { %2709 = vmatmul.msk.f32.gmra.mxu0 %vm101_vm0, %v35_v46 }
  0xba   :  { %2738 = vmatmul.msk.f32.gmra.mxu2 %vm101_vm0, %v64_v47 }
  0xbe   :  { %v359_v49 = vpop.f32.mrf.mxu0 }
  0xbf   :  { %v3478_v52 = vsub.f32 %v3469_v48, %v359_v49 }
  0xc1   :  { %2710 = vmatmul.msk.f32.gmra.mxu0 %vm101_vm0, %v36_v50  ;;  %620 = vmin.xlane.f32.xlu2 %v3478_v52 }
  0xc2   :  { %2739 = vmatmul.msk.f32.gmra.mxu2 %vm101_vm0, %v65_v51  ;;  %v47_v51 = vld [vmem:[%s6480_s0 + $0xd8] sm:$0xff] }
  0xc4   :  { %v446_v53 = vpop.f32.mrf.mxu2 }
  0xc5   :  { %v3484_v54 = vsub.f32 %v3469_v48, %v446_v53 }
  0xc6   :  { %v362_v55 = vpop.f32.mrf.mxu0 }
  0xc7   :  { %6612 = vst [vmem:[#allocation8_spill] sm:$0xff] %v3484_v54  ;;  %678 = vmin.xlane.f32.xlu0 %v3484_v54  ;;  %v3496_v59 = vsub.f32 %v3469_v48, %v362_v55 }
  0xc9   :  { %2711 = vmatmul.msk.f32.gmra.mxu0 %vm101_vm0, %v37_v56 }
  0xca   :  { %2740 = vmatmul.msk.f32.gmra.mxu2 %vm101_vm0, %v66_v57  ;;  %v48_v57 = vld [vmem:[%s6480_s0 + $0xe0] sm:$0xff] }
  0xcd   :  { %v449_v58 = vpop.f32.mrf.mxu2 }
  0xce   :  { %v365_v60 = vpop.f32.mrf.mxu0  ;;  %v3508_v0 = vsub.f32 %v3469_v48, %v449_v58 }
  0xcf   :  { %622 = vmin.xlane.f32.xlu0 %v3496_v59  ;;  %v3520_v5 = vsub.f32 %v3469_v48, %v365_v60 }
  0xd0   :  { %6613 = vst [vmem:[#allocation9_spill] sm:$0xff] %v3508_v0 }
  0xd1   :  { %2712 = vmatmul.msk.f32.gmra.mxu0 %vm101_vm0, %v38_v61 }
  0xd2   :  { %2741 = vmatmul.msk.f32.gmra.mxu2 %vm101_vm0, %v67_v62 }
  0xd5   :  { %v452_v63 = vpop.f32.mrf.mxu2 }
  0xd6   :  { %v368_v1 = vpop.f32.mrf.mxu0  ;;  %v3536_v11 = vsub.f32 %v3469_v48, %v452_v63 }
  0xd7   :  { %680 = vmin.xlane.f32.xlu0 %v3508_v0  ;;  %v3555_v18 = vsub.f32 %v3469_v48, %v368_v1 }
  0xd8   :  { %6614 = vst [vmem:[#allocation10_spill] sm:$0xff] %v3536_v11 }
  0xd9   :  { %2713 = vmatmul.msk.f32.gmra.mxu0 %vm101_vm0, %v39_v2 }
  0xda   :  { %2742 = vmatmul.msk.f32.gmra.mxu2 %vm101_vm0, %v68_v3 }
  0xdd   :  { %v455_v4 = vpop.f32.mrf.mxu2 }
  0xde   :  { %v371_v6 = vpop.f32.mrf.mxu0  ;;  %v3577_v25 = vsub.f32 %v3469_v48, %v455_v4 }
  0xdf   :  { %624 = vmin.xlane.f32.xlu0 %v3520_v5  ;;  %v3530_v9 = vsub.f32 %v3469_v48, %v371_v6 }
  0xe0   :  { %6618 = vst [vmem:[#allocation14_spill] sm:$0xff] %v3577_v25 }
  0xe1   :  { %2714 = vmatmul.msk.f32.gmra.mxu0 %vm101_vm0, %v40_v7  ;;  %628 = vmin.xlane.f32.xlu1 %v3530_v9 }
  0xe2   :  { %2743 = vmatmul.msk.f32.gmra.mxu2 %vm101_vm0, %v69_v8 }
  0xe5   :  { %v458_v10 = vpop.f32.mrf.mxu2 }
  0xe6   :  { %v374_v12 = vpop.f32.mrf.mxu0  ;;  %v3546_v15 = vsub.f32 %v3469_v48, %v458_v10  ;;  %v618_v10 = vlaneseq }
  0xe7   :  { %682 = vmin.xlane.f32.xlu0 %v3536_v11  ;;  %v3566_v22 = vsub.f32 %v3469_v48, %v374_v12 }
  0xe8   :  { %6615 = vst [vmem:[#allocation11_spill] sm:$0xff] %v3546_v15 }
  0xe9   :  { %2715 = vmatmul.msk.f32.gmra.mxu0 %vm101_vm0, %v41_v13  ;;  %686 = vmin.xlane.f32.xlu1 %v3546_v15 }
  0xea   :  { %2744 = vmatmul.msk.f32.gmra.mxu2 %vm101_vm0, %v70_v14  ;;  %v3681_v14 = vand.u32 127, %v618_v10 }
  0xed   :  { %v461_v16 = vpop.f32.mrf.mxu2 }
  0xee   :  { %v3552_v17 = vsub.f32 %v3469_v48, %v461_v16  ;;  %v377_v19 = vpop.f32.mrf.mxu0 }
  0xef   :  { %626 = vmin.xlane.f32.xlu0 %v3555_v18  ;;  %v3572_v23 = vsub.f32 %v3469_v48, %v377_v19 }
  0xf0   :  { %6616 = vst [vmem:[#allocation12_spill] sm:$0xff] %v3552_v17  ;;  %688 = vmin.xlane.f32.xlu2 %v3552_v17 }
  0xf1   :  { %2716 = vmatmul.msk.f32.gmra.mxu0 %vm101_vm0, %v42_v20  ;;  %630 = vmin.xlane.f32.xlu1 %v3566_v22 }
  0xf2   :  { %2745 = vmatmul.msk.f32.gmra.mxu2 %vm101_vm0, %v71_v21 }
  0xf5   :  { %v3574_v24 = vpop.f32.mrf.mxu2 }
  0xf6   :  { %6617 = vst [vmem:[#allocation13_spill] sm:$0xff] %v3574_v24  ;;  %v380_v26 = vpop.f32.mrf.mxu0 }
  0xf7   :  { %684 = vmin.xlane.f32.xlu0 %v3577_v25  ;;  %v3590_v29 = vsub.f32 %v3469_v48, %v380_v26 }
  0xf8   :  { %632 = vmin.xlane.f32.xlu2 %v3572_v23 }
  0xf9   :  { %2717 = vmatmul.msk.f32.gmra.mxu0 %vm101_vm0, %v43_v27 }
  0xfa   :  { %2746 = vmatmul.msk.f32.gmra.mxu2 %vm101_vm0, %v72_v28 }
  0xfd   :  { %v3592_v30 = vpop.f32.mrf.mxu2 }
  0xfe   :  { %6619 = vst [vmem:[#allocation15_spill] sm:$0xff] %v3592_v30  ;;  %v383_v31 = vpop.f32.mrf.mxu0 }
  0xff   :  { %v3598_v33 = vsub.f32 %v3469_v48, %v383_v31 }
 0x100   :  { %634 = vmin.xlane.f32.xlu2 %v3590_v29 }
 0x101   :  { %2718 = vmatmul.msk.f32.gmra.mxu0 %vm101_vm0, %v44_v32  ;;  %636 = vmin.xlane.f32.xlu1 %v3598_v33 }
 0x102   :  { %2747 = vmatmul.msk.f32.gmra.mxu2 %vm101_vm0, %v73_v34 }
 0x105   :  { %v470_v35 = vpop.f32.mrf.mxu2 }
 0x106   :  { %v3608_v36 = vsub.f32 %v3469_v48, %v470_v35  ;;  %v386_v37 = vpop.f32.mrf.mxu0 }
 0x107   :  { %v3620_v40 = vsub.f32 %v3469_v48, %v386_v37 }
 0x108   :  { %694 = vmin.xlane.f32.xlu0 %v3608_v36 }
 0x109   :  { %2719 = vmatmul.msk.f32.gmra.mxu0 %vm101_vm0, %v45_v38 }
 0x10a   :  { %2748 = vmatmul.msk.f32.gmra.mxu2 %vm101_vm0, %v74_v39 }
 0x10d   :  { %v473_v41 = vpop.f32.mrf.mxu2 }
 0x10e   :  { %v3623_v42 = vsub.f32 %v3469_v48, %v473_v41  ;;  %v389_v43 = vpop.f32.mrf.mxu0 }
 0x10f   :  { %v3629_v45 = vsub.f32 %v3469_v48, %v389_v43 }
 0x110   :  { %696 = vmin.xlane.f32.xlu1 %v3623_v42  ;;  %638 = vmin.xlane.f32.xlu0 %v3620_v40 }
 0x111   :  { %640 = vmin.xlane.f32.xlu2 %v3629_v45  ;;  %2720 = vmatmul.msk.f32.gmra.mxu0 %vm101_vm0, %v46_v44 }
 0x115   :  { %v476_v46 = vpop.f32.mrf.mxu2 }
 0x116   :  { %v392_v47 = vpop.f32.mrf.mxu0  ;;  %v3636_v49 = vsub.f32 %v3469_v48, %v476_v46 }
 0x117   :  { %v3639_v50 = vsub.f32 %v3469_v48, %v392_v47 }
 0x119   :  { %698 = vmin.xlane.f32.xlu2 %v3636_v49  ;;  %642 = vmin.xlane.f32.xlu1 %v3639_v50 }
 0x11a   :  { %2721 = vmatmul.msk.f32.gmra.mxu0 %vm101_vm0, %v47_v51 }
 0x11d   :  { %v479_v53 = vpop.f32.mrf.mxu2 }
 0x11e   :  { %v3648_v55 = vsub.f32 %v3469_v48, %v479_v53  ;;  %v395_v56 = vpop.f32.mrf.mxu0 }
 0x11f   :  { %v3656_v58 = vsub.f32 %v3469_v48, %v395_v56 }
 0x120   :  { %700 = vmin.xlane.f32.xlu0 %v3648_v55 }
 0x122   :  { %2722 = vmatmul.msk.f32.gmra.mxu0 %vm101_vm0, %v48_v57 }
 0x125   :  { %v482_v60 = vpop.f32.mrf.mxu2 }
 0x126   :  { %v3659_v61 = vsub.f32 %v3469_v48, %v482_v60  ;;  %v398_v62 = vpop.f32.mrf.mxu0 }
 0x127   :  { %v3662_v63 = vsub.f32 %v3469_v48, %v398_v62 }
 0x128   :  { %702 = vmin.xlane.f32.xlu1 %v3659_v61  ;;  %644 = vmin.xlane.f32.xlu0 %v3656_v58 }
 0x129   :  { %646 = vmin.xlane.f32.xlu2 %v3662_v63 }
 0x12d   :  { %v485_v1 = vpop.f32.mrf.mxu2 }
 0x12e   :  { %v401_v2 = vpop.f32.mrf.mxu0  ;;  %v3668_v3 = vsub.f32 %v3469_v48, %v485_v1 }
 0x12f   :  { %v3675_v8 = vsub.f32 %v3469_v48, %v401_v2 }
 0x131   :  { %704 = vmin.xlane.f32.xlu2 %v3668_v3 }
 0x134   :  { %v621_v12 = vpop.xlane.xlu2 %620 }
 0x135   :  { %v488_v4 = vpop.f32.mrf.mxu2  ;;  %vm748_vm1 = vcmp.eq.f32.partialorder %v3478_v52, %v621_v12 }
 0x136   :  { %v3672_v6 = vsub.f32 %v3469_v48, %v488_v4  ;;  %v404_v7 = vpop.f32.mrf.mxu0  ;;  %v3692_v26 = vsel %vm748_vm1, %v3681_v14, 128 }
 0x137   :  { %v3688_v21 = vsub.f32 %v3469_v48, %v404_v7  ;;  %6621 = vst [vmem:[#allocation17_spill] sm:$0xff] %v3692_v26  ;;  %v877_v28 = vshra.s32 %v3692_v26, 16 }
 0x138   :  { %706 = vmin.xlane.f32.xlu1 %v3672_v6 }
 0x139   :  { %648 = vmin.xlane.f32.xlu2 %v3675_v8  ;;  %v3703_v37 = vcvt.s32.f32 %v877_v28 }
 0x13a   :  { %v3679_v13 = vpop.xlane.xlu0 %678 }
 0x13b   :  { %6620 = vst [vmem:[#allocation16_spill] sm:$0xff] %v3679_v13 }
 0x13c   :  { %6624 = vst [vmem:[#allocation20_spill] sm:$0xff] %v3703_v37 }
 0x13d   :  { %v491_v16 = vpop.f32.mrf.mxu2 }
 0x13e   :  { %v3685_v19 = vsub.f32 %v3469_v48, %v491_v16  ;;  %v407_v20 = vpop.f32.mrf.mxu0 }
 0x13f   :  { %v3713_v43 = vsub.f32 %v3469_v48, %v407_v20 }
 0x140   :  { %708 = vmin.xlane.f32.xlu0 %v3685_v19 }
 0x141   :  { %650 = vmin.xlane.f32.xlu2 %v3688_v21 }
 0x142   :  { %v623_v27 = vpop.xlane.xlu0 %622 }
 0x143   :  { %vm749_vm2 = vcmp.eq.f32.partialorder %v3496_v59, %v623_v27 }
 0x144   :  { %v3698_v52 = vsel %vm749_vm2, %v3681_v14, 128 }
 0x145   :  { %6622 = vst [vmem:[#allocation18_spill] sm:$0xff] %v3698_v52  ;;  %v494_v31 = vpop.f32.mrf.mxu2  ;;  %v891_v32 = vshra.s32 %v3698_v52, 16 }
 0x146   :  { %v410_v34 = vpop.f32.mrf.mxu0  ;;  %v3731_v62 = vsub.f32 %v3469_v48, %v494_v31 }
 0x147   :  { %v3701_v35 = vcvt.s32.f32 %v891_v32  ;;  %v3716_v44 = vsub.f32 %v3469_v48, %v410_v34 }
 0x149   :  { %6623 = vst [vmem:[#allocation19_spill] sm:$0xff] %v3701_v35  ;;  %894 = vmin.xlane.f32.xlu0 %v3701_v35  ;;  %880 = vmin.xlane.f32.xlu2 %v3703_v37 }
 0x14a   :  { %v3707_v38 = vpop.xlane.xlu0 %680 }
 0x14b   :  { %6625 = vst [vmem:[#allocation21_spill] sm:$0xff] %v3707_v38 }
 0x14d   :  { %v497_v59 = vpop.f32.mrf.mxu2 }
 0x14e   :  { %v3710_v39 = vsub.f32 %v3469_v48, %v497_v59  ;;  %v413_v41 = vpop.f32.mrf.mxu0 }
 0x14f   :  { %v3722_v47 = vsub.f32 %v3469_v48, %v413_v41 }
 0x150   :  { %712 = vmin.xlane.f32.xlu1 %v3710_v39 }
 0x151   :  { %652 = vmin.xlane.f32.xlu2 %v3713_v43  ;;  %654 = vmin.xlane.f32.xlu0 %v3716_v44 }
 0x152   :  { %v625_v46 = vpop.xlane.xlu0 %624 }
 0x153   :  { %vm750_vm3 = vcmp.eq.f32.partialorder %v3520_v5, %v625_v46 }
 0x154   :  { %v3726_v51 = vsel %vm750_vm3, %v3681_v14, 128  ;;  %v629_v56 = vpop.xlane.xlu1 %628 }
 0x155   :  { %v500_v53 = vpop.f32.mrf.mxu2  ;;  %v905_v57 = vshra.s32 %v3726_v51, 16  ;;  %vm752_vm4 = vcmp.eq.f32.partialorder %v3530_v9, %v629_v56 }
 0x156   :  { %v416_v60 = vpop.f32.mrf.mxu0  ;;  %v3734_v1 = vsel %vm752_vm4, %v3681_v14, 128  ;;  %v3747_v12 = vsub.f32 %v3469_v48, %v500_v53 }
 0x157   :  { %v3737_v2 = vcvt.s32.f32 %v905_v57  ;;  %v933_v5 = vshra.s32 %v3734_v1, 16 }
 0x158   :  { %656 = vmin.xlane.f32.xlu1 %v3722_v47 }
 0x159   :  { %710 = vmin.xlane.f32.xlu2 %v3731_v62  ;;  %908 = vmin.xlane.f32.xlu0 %v3737_v2  ;;  %v3744_v7 = vcvt.s32.f32 %v933_v5 }
 0x15a   :  { %v3742_v4 = vpop.xlane.xlu0 %682 }
 0x15b   :  { %6626 = vst [vmem:[#allocation22_spill] sm:$0xff] %v3742_v4 }
 0x15c   :  { %v3750_v16 = vpop.xlane.xlu1 %686 }
 0x15d   :  { %v503_v9 = vpop.f32.mrf.mxu2  ;;  %6627 = vst [vmem:[#allocation23_spill] sm:$0xff] %v3750_v16 }
 0x15e   :  { %v419_v10 = vpop.f32.mrf.mxu0  ;;  %v3764_v41 = vsub.f32 %v3469_v48, %v503_v9  ;;  %v3777_v9 = vsub.f32 %v3469_v48, %v416_v60 }
 0x160   :  { %936 = vmin.xlane.f32.xlu1 %v3744_v7 }
 0x161   :  { %714 = vmin.xlane.f32.xlu0 %v3747_v12 }
 0x162   :  { %v627_v27 = vpop.xlane.xlu0 %626 }
 0x163   :  { %v3753_v20 = vpop.xlane.xlu2 %688  ;;  %vm751_vm5 = vcmp.eq.f32.partialorder %v3555_v18, %v627_v27  ;;  %v3780_v27 = vsub.f32 %v3469_v48, %v419_v10 }
 0x164   :  { %6628 = vst [vmem:[#allocation24_spill] sm:$0xff] %v3753_v20  ;;  %v3757_v28 = vsel %vm751_vm5, %v3681_v14, 128  ;;  %v631_v18 = vpop.xlane.xlu1 %630 }
 0x165   :  { %v506_v31 = vpop.f32.mrf.mxu2  ;;  %v919_v34 = vshra.s32 %v3757_v28, 16  ;;  %vm753_vm6 = vcmp.eq.f32.partialorder %v3566_v22, %v631_v18 }
 0x166   :  { %v3760_v32 = vsub.f32 %v3469_v48, %v506_v31  ;;  %v422_v59 = vpop.f32.mrf.mxu0  ;;  %v3784_v31 = vsel %vm753_vm6, %v3681_v14, 128 }
 0x167   :  { %v3767_v46 = vcvt.s32.f32 %v919_v34  ;;  %v3772_v56 = vsub.f32 %v3469_v48, %v422_v59  ;;  %v947_v59 = vshra.s32 %v3784_v31, 16 }
 0x168   :  { %718 = vmin.xlane.f32.xlu1 %v3760_v32 }
 0x169   :  { %922 = vmin.xlane.f32.xlu2 %v3767_v46  ;;  %716 = vmin.xlane.f32.xlu0 %v3764_v41  ;;  %v3805_v35 = vcvt.s32.f32 %v947_v59 }
 0x16a   :  { %v3791_v22 = vpop.xlane.xlu0 %684 }
 0x16b   :  { %v633_v53 = vpop.xlane.xlu2 %632  ;;  %6629 = vst [vmem:[#allocation25_spill] sm:$0xff] %v3791_v22 }
 0x16c   :  { %vm754_vm7 = vcmp.eq.f32.partialorder %v3572_v23, %v633_v53 }
 0x16d   :  { %v509_v57 = vpop.f32.mrf.mxu2  ;;  %v3787_v34 = vsel %vm754_vm7, %v3681_v14, 128 }
 0x16e   :  { %v425_v5 = vpop.f32.mrf.mxu0  ;;  %v3794_v60 = vsub.f32 %v3469_v48, %v509_v57  ;;  %v961_v10 = vshra.s32 %v3787_v34, 16 }
 0x16f   :  { %v3811_v52 = vsub.f32 %v3469_v48, %v425_v5 }
 0x170   :  { %662 = vmin.xlane.f32.xlu1 %v3772_v56  ;;  %v3803_v20 = vcvt.s32.f32 %v961_v10 }
 0x171   :  { %658 = vmin.xlane.f32.xlu2 %v3777_v9  ;;  %660 = vmin.xlane.f32.xlu0 %v3780_v27 }
 0x173   :  { %v635_v23 = vpop.xlane.xlu2 %634 }
 0x174   :  { %vm755_vm8 = vcmp.eq.f32.partialorder %v3590_v29, %v635_v23  ;;  %v637_v16 = vpop.xlane.xlu1 %636 }
 0x175   :  { %v512_v18 = vpop.f32.mrf.mxu2  ;;  %v3800_v53 = vsel %vm755_vm8, %v3681_v14, 128  ;;  %vm756_vm10 = vcmp.eq.f32.partialorder %v3598_v33, %v637_v16 }
 0x176   :  { %v428_v17 = vpop.f32.mrf.mxu0  ;;  %v975_v29 = vshra.s32 %v3800_v53, 16 }
 0x177   :  { %v3814_v15 = vsub.f32 %v3469_v48, %v428_v17  ;;  %v3827_v17 = vsub.f32 %v3469_v48, %v512_v18 }
 0x178   :  { %720 = vmin.xlane.f32.xlu1 %v3794_v60  ;;  %v3817_v10 = vcvt.s32.f32 %v975_v29 }
 0x179   :  { %964 = vmin.xlane.f32.xlu2 %v3803_v20  ;;  %950 = vmin.xlane.f32.xlu0 %v3805_v35  ;;  %6630 = vst [vmem:[#allocation26_spill] sm:$0xff] %v3827_v17 }
 0x17b   :  { %v695_v57 = vpop.xlane.xlu0 %694 }
 0x17c   :  { %vm785_vm9 = vcmp.eq.f32.partialorder %v3608_v36, %v695_v57  ;;  %v3833_v57 = vsel %vm756_vm10, %v3681_v14, 128 }
 0x17d   :  { %v515_v23 = vpop.f32.mrf.mxu2  ;;  %v3821_v25 = vsel %vm785_vm9, %v3681_v14, 128  ;;  %v989_v33 = vshra.s32 %v3833_v57, 16 }
 0x17e   :  { %v431_v59 = vpop.f32.mrf.mxu0  ;;  %v1395_v36 = vshra.s32 %v3821_v25, 16 }
 0x17f   :  { %v3845_v0 = vcvt.s32.f32 %v989_v33 }
 0x180   :  { %978 = vmin.xlane.f32.xlu1 %v3817_v10  ;;  %v3839_v26 = vcvt.s32.f32 %v1395_v36 }
 0x181   :  { %664 = vmin.xlane.f32.xlu0 %v3811_v52  ;;  %666 = vmin.xlane.f32.xlu2 %v3814_v15 }
 0x183   :  { %v697_v16 = vpop.xlane.xlu1 %696  ;;  %v639_v18 = vpop.xlane.xlu0 %638 }
 0x184   :  { %v3830_v5 = vpop.xlane.xlu2 %640  ;;  %vm757_vm13 = vcmp.eq.f32.partialorder %v3620_v40, %v639_v18  ;;  %vm786_vm1 = vcmp.eq.f32.partialorder %v3623_v42, %v697_v16 }
 0x185   :  { %v518_v29 = vpop.f32.mrf.mxu2  ;;  %vm758_vm3 = vcmp.eq.f32.partialorder %v3629_v45, %v3830_v5  ;;  %v75_v45 = vld [vmem:[%s6480_s0 + $0x1b8] sm:$0xff] }
 0x186   :  { %v434_v22 = vpop.f32.mrf.mxu0  ;;  %2749 = vmatmul.msk.f32.gmra.mxu2 %vm101_vm0, %v75_v45 }
 0x187   :  { %v3836_v37 = vsub.f32 %v3469_v48, %v434_v22 }
 0x188   :  { %722 = vmin.xlane.f32.xlu1 %v3827_v17  ;;  %v3872_v17 = vsub.f32 %v3469_v48, %v431_v59 }
 0x189   :  { %1398 = vmin.xlane.f32.xlu2 %v3839_v26  ;;  %670 = vmin.xlane.f32.xlu0 %v3836_v37 }
 0x18c   :  { %v699_v11 = vpop.xlane.xlu2 %698  ;;  %v643_v30 = vpop.xlane.xlu1 %642 }
 0x18d   :  { %vm787_vm11 = vcmp.eq.f32.partialorder %v3636_v49, %v699_v11  ;;  %v521_v4 = vpop.f32.mrf.mxu2  ;;  %v3859_v49 = vsub.f32 %v3469_v48, %v515_v23  ;;  %vm759_vm12 = vcmp.eq.f32.partialorder %v3639_v50, %v643_v30 }
 0x18e   :  { %v3848_v22 = vsel %vm787_vm11, %v3681_v14, 128  ;;  %v3851_v36 = vsub.f32 %v3469_v48, %v521_v4  ;;  %v437_v38 = vpop.f32.mrf.mxu0  ;;  %v3868_v33 = vsel %vm759_vm12, %v3681_v14, 128 }
 0x18f   :  { %6631 = vst [vmem:[#allocation27_spill] sm:$0xff] %v3848_v22  ;;  %v1423_v54 = vshra.s32 %v3848_v22, 16  ;;  %v3864_v4 = vsub.f32 %v3469_v48, %v437_v38  ;;  %v1031_v30 = vshra.s32 %v3868_v33, 16 }
 0x190   :  { %6632 = vst [vmem:[#allocation28_spill] sm:$0xff] %v3851_v36  ;;  %992 = vmin.xlane.f32.xlu1 %v3845_v0 }
 0x191   :  { %728 = vmin.xlane.f32.xlu2 %v3851_v36  ;;  %v3856_v13 = vcvt.s32.f32 %v1423_v54  ;;  %6634 = vst [vmem:[#allocation30_spill] sm:$0xff] %v3859_v49  ;;  %v3890_v40 = vcvt.s32.f32 %v1031_v30 }
 0x193   :  { %6633 = vst [vmem:[#allocation29_spill] sm:$0xff] %v3856_v13  ;;  %v701_v11 = vpop.xlane.xlu0 %700  ;;  %1426 = vmin.xlane.f32.xlu0 %v3856_v13 }
 0x194   :  { %vm788_vm15 = vcmp.eq.f32.partialorder %v3648_v55, %v701_v11 }
 0x197   :  { %v440_v36 = vpop.f32.mrf.mxu0 }
 0x198   :  { %724 = vmin.xlane.f32.xlu1 %v3859_v49  ;;  %v3885_v49 = vsel %vm757_vm13, %v3681_v14, 128 }
 0x199   :  { %672 = vmin.xlane.f32.xlu2 %v3864_v4  ;;  %v1003_v55 = vshra.s32 %v3885_v49, 16 }
 0x19b   :  { %v645_v54 = vpop.xlane.xlu0 %644  ;;  %v703_v22 = vpop.xlane.xlu1 %702 }
 0x19c   :  { %vm760_vm14 = vcmp.eq.f32.partialorder %v3656_v58, %v645_v54  ;;  %v3880_v38 = vpop.xlane.xlu2 %646  ;;  %v3893_v58 = vsel %vm788_vm15, %v3681_v14, 128  ;;  %vm789_vm6 = vcmp.eq.f32.partialorder %v3659_v61, %v703_v22 }
 0x19d   :  { %v3878_v50 = vsel %vm760_vm14, %v3681_v14, 128  ;;  %6635 = vst [vmem:[#allocation31_spill] sm:$0xff] %v3893_v58  ;;  %v1437_v11 = vshra.s32 %v3893_v58, 16  ;;  %v3913_v58 = vsub.f32 %v3469_v48, %v518_v29  ;;  %vm761_vm8 = vcmp.eq.f32.partialorder %v3662_v63, %v3880_v38 }
 0x19e   :  { %v1045_v23 = vshra.s32 %v3878_v50, 16 }
 0x19f   :  { %v443_v18 = vpop.f32.mrf.mxu0  ;;  %v3907_v30 = vcvt.s32.f32 %v1437_v11  ;;  %6637 = vst [vmem:[#allocation33_spill] sm:$0xff] %v3913_v58 }
 0x1a0   :  { %668 = vmin.xlane.f32.xlu1 %v3872_v17  ;;  %v3888_v59 = vcvt.s32.f32 %v1045_v23  ;;  %v3902_v13 = vsub.f32 %v3469_v48, %v443_v18  ;;  %v3904_v23 = vcvt.s32.f32 %v1003_v55  ;;  %v3916_v18 = vsub.f32 %v3469_v48, %v440_v36 }
 0x1a1   :  { %1034 = vmin.xlane.f32.xlu2 %v3890_v40  ;;  %v3920_v55 = vsel %vm786_vm1, %v3681_v14, 128  ;;  %v3936_v36 = vsel %vm758_vm3, %v3681_v14, 128 }
 0x1a2   :  { %1048 = vmin.xlane.f32.xlu0 %v3888_v59  ;;  %6636 = vst [vmem:[#allocation32_spill] sm:$0xff] %v3902_v13  ;;  %v1409_v42 = vshra.s32 %v3920_v55, 16 }
 0x1a4   :  { %v3899_v54 = vpop.xlane.xlu2 %704 }
 0x1a5   :  { %vm790_vm9 = vcmp.eq.f32.partialorder %v3668_v3, %v3899_v54 }
 0x1a8   :  { %1006 = vmin.xlane.f32.xlu1 %v3904_v23 }
 0x1a9   :  { %1440 = vmin.xlane.f32.xlu2 %v3907_v30 }
 0x1aa   :  { %676 = vmin.xlane.f32.xlu0 %v3902_v13 }
 0x1ab   :  { %v707_v29 = vpop.xlane.xlu1 %706 }
 0x1ac   :  { %v649_v24 = vpop.xlane.xlu2 %648  ;;  %vm791_vm4 = vcmp.eq.f32.partialorder %v3672_v6, %v707_v29  ;;  %v1017_v29 = vshra.s32 %v3936_v36, 16 }
 0x1ad   :  { %vm762_vm2 = vcmp.eq.f32.partialorder %v3675_v8, %v649_v24  ;;  %v3933_v8 = vcvt.s32.f32 %v1409_v42 }
 0x1ae   :  { %v3924_v11 = vsel %vm762_vm2, %v3681_v14, 128  ;;  %v3964_v45 = vcvt.s32.f32 %v1017_v29 }
 0x1af   :  { %v1073_v48 = vshra.s32 %v3924_v11, 16 }
 0x1b0   :  { %726 = vmin.xlane.f32.xlu1 %v3913_v58 }
 0x1b1   :  { %674 = vmin.xlane.f32.xlu2 %v3916_v18  ;;  %v3945_v5 = vcvt.s32.f32 %v1073_v48 }
 0x1b3   :  { %v709_v16 = vpop.xlane.xlu0 %708 }
 0x1b4   :  { %v651_v24 = vpop.xlane.xlu2 %650  ;;  %vm792_vm7 = vcmp.eq.f32.partialorder %v3685_v19, %v709_v16 }
 0x1b5   :  { %vm763_vm5 = vcmp.eq.f32.partialorder %v3688_v21, %v651_v24  ;;  %v3950_v21 = vsel %vm791_vm4, %v3681_v14, 128  ;;  %v3973_v61 = vsel %vm792_vm7, %v3681_v14, 128 }
 0x1b6   :  { %v3939_v13 = vsel %vm763_vm5, %v3681_v14, 128  ;;  %v1479_v48 = vshra.s32 %v3950_v21, 16  ;;  %6644 = vst [vmem:[#allocation40_spill] sm:$0xff] %v3973_v61  ;;  %v1493_v19 = vshra.s32 %v3973_v61, 16 }
 0x1b7   :  { %6638 = vst [vmem:[#allocation34_spill] sm:$0xff] %v3939_v13  ;;  %v1087_v6 = vshra.s32 %v3939_v13, 16  ;;  %v3967_v13 = vsel %vm789_vm6, %v3681_v14, 128 }
 0x1b8   :  { %1412 = vmin.xlane.f32.xlu1 %v3933_v8  ;;  %6642 = vst [vmem:[#allocation38_spill] sm:$0xff] %v3967_v13  ;;  %v1451_v22 = vshra.s32 %v3967_v13, 16  ;;  %v904_v13 = vand.u32 65535, %v3726_v51  ;;  %v4006_v51 = vsel %vm790_vm9, %v3681_v14, 128 }
 0x1b9   :  { %1076 = vmin.xlane.f32.xlu2 %v3945_v5  ;;  %v3953_v42 = vcvt.s32.f32 %v1087_v6  ;;  %v3970_v6 = vcvt.s32.f32 %v1479_v48  ;;  %v3983_v48 = vsel %vm761_vm8, %v3681_v14, 128 }
 0x1ba   :  { %v1059_v63 = vshra.s32 %v3983_v48, 16  ;;  %v906_v61 = vcvt.s32.f32 %v904_v13 }
 0x1bb   :  { %6639 = vst [vmem:[#allocation35_spill] sm:$0xff] %v3953_v42  ;;  %1090 = vmin.xlane.f32.xlu0 %v3953_v42  ;;  %v3986_v42 = vcvt.s32.f32 %v1493_v19 }
 0x1bc   :  { %v3959_v24 = vpop.xlane.xlu0 %894  ;;  %v3961_v58 = vpop.xlane.xlu2 %880  ;;  %6643 = vst [vmem:[#allocation39_spill] sm:$0xff] %v3970_v6 }
 0x1bd   :  { %6640 = vst [vmem:[#allocation36_spill] sm:$0xff] %v3959_v24 }
 0x1be   :  { %6641 = vst [vmem:[#allocation37_spill] sm:$0xff] %v3961_v58  ;;  %v3980_v58 = vcvt.s32.f32 %v1451_v22 }
 0x1c0   :  { %1020 = vmin.xlane.f32.xlu1 %v3964_v45  ;;  %6645 = vst [vmem:[#allocation41_spill] sm:$0xff] %v3980_v58 }
 0x1c1   :  { %1482 = vmin.xlane.f32.xlu2 %v3970_v6  ;;  %v76_v6 = vld [vmem:[%s6480_s0 + $0x1c0] sm:$0xff] }
 0x1c2   :  { %2750 = vmatmul.msk.f32.gmra.mxu2 %vm101_vm0, %v76_v6 }
 0x1c3   :  { %v713_v24 = vpop.xlane.xlu1 %712 }
 0x1c4   :  { %v653_v16 = vpop.xlane.xlu2 %652  ;;  %v655_v29 = vpop.xlane.xlu0 %654  ;;  %vm794_vm13 = vcmp.eq.f32.partialorder %v3710_v39, %v713_v24 }
 0x1c5   :  { %vm765_vm10 = vcmp.eq.f32.partialorder %v3716_v44, %v655_v29  ;;  %v4022_v29 = vsel %vm794_vm13, %v3681_v14, 128  ;;  %vm764_vm14 = vcmp.eq.f32.partialorder %v3713_v43, %v653_v16  ;;  %v77_v43 = vld [vmem:[%s6480_s0 + $0x1c8] sm:$0xff]  ;;  %v918_v16 = vand.u32 65535, %v3757_v28 }
 0x1c6   :  { %v4009_v6 = vsel %vm765_vm10, %v3681_v14, 128  ;;  %6648 = vst [vmem:[#allocation44_spill] sm:$0xff] %v4022_v29 }
 0x1c7   :  { %6646 = vst [vmem:[#allocation42_spill] sm:$0xff] %v4009_v6  ;;  %v1115_v54 = vshra.s32 %v4009_v6, 16 }
 0x1c8   :  { %1454 = vmin.xlane.f32.xlu1 %v3980_v58  ;;  %v4001_v58 = vcvt.s32.f32 %v1059_v63 }
 0x1c9   :  { %1496 = vmin.xlane.f32.xlu2 %v3986_v42 }
 0x1ca   :  { %2751 = vmatmul.msk.f32.gmra.mxu2 %vm101_vm0, %v77_v43  ;;  %v932_v43 = vand.u32 65535, %v3734_v1 }
 0x1cb   :  { %v657_v38 = vpop.xlane.xlu1 %656 }
 0x1cc   :  { %v711_v22 = vpop.xlane.xlu2 %710  ;;  %v3998_v19 = vpop.xlane.xlu0 %908  ;;  %vm766_vm15 = vcmp.eq.f32.partialorder %v3722_v47, %v657_v38 }
 0x1cd   :  { %vm793_vm11 = vcmp.eq.f32.partialorder %v3731_v62, %v711_v22  ;;  %vm910_vm12 = vcmp.eq.f32.partialorder %v3737_v2, %v3998_v19  ;;  %v1465_v2 = vshra.s32 %v4006_v51, 16  ;;  %v1521_v22 = vshra.s32 %v4022_v29, 16 }
 0x1ce   :  { %v4012_v3 = vsel %vm793_vm11, %v3681_v14, 128  ;;  %v911_v44 = vsel %vm910_vm12, %v906_v61, inf  ;;  %v4030_v61 = vcvt.s32.f32 %v1115_v54  ;;  %v4048_v54 = vsel %vm766_vm15, %v3681_v14, 128 }
 0x1cf   :  { %912 = vmin.xlane.f32.xlu0 %v911_v44  ;;  %v1507_v13 = vshra.s32 %v4012_v3, 16  ;;  %v4028_v24 = vcvt.s32.f32 %v1465_v2  ;;  %v4034_v44 = vsel %vm764_vm14, %v3681_v14, 128  ;;  %v1129_v28 = vshra.s32 %v4048_v54, 16 }
 0x1d0   :  { %1062 = vmin.xlane.f32.xlu1 %v4001_v58  ;;  %6649 = vst [vmem:[#allocation45_spill] sm:$0xff] %v4030_v61  ;;  %v1101_v2 = vshra.s32 %v4034_v44, 16 }
 0x1d1   :  { %v4017_v62 = vcvt.s32.f32 %v1507_v13  ;;  %v4044_v13 = vcvt.s32.f32 %v1521_v22 }
 0x1d2   :  { %v4053_v6 = vcvt.s32.f32 %v1101_v2 }
 0x1d3   :  { %6647 = vst [vmem:[#allocation43_spill] sm:$0xff] %v4017_v62  ;;  %v4024_v63 = vpop.xlane.xlu1 %936  ;;  %1510 = vmin.xlane.f32.xlu2 %v4017_v62 }
 0x1d4   :  { %v715_v39 = vpop.xlane.xlu0 %714  ;;  %6650 = vst [vmem:[#allocation46_spill] sm:$0xff] %v4044_v13  ;;  %vm938_vm4 = vcmp.eq.f32.partialorder %v3744_v7, %v4024_v63  ;;  %v78_v7 = vld [vmem:[%s6480_s0 + $0x1d0] sm:$0xff] }
 0x1d5   :  { %vm795_vm2 = vcmp.eq.f32.partialorder %v3747_v12, %v715_v39  ;;  %v934_v39 = vcvt.s32.f32 %v932_v43  ;;  %2752 = vmatmul.msk.f32.gmra.mxu2 %vm101_vm0, %v78_v7 }
 0x1d6   :  { %v4064_v62 = vsel %vm795_vm2, %v3681_v14, 128 }
 0x1d7   :  { %1118 = vmin.xlane.f32.xlu0 %v4030_v61  ;;  %v920_v61 = vcvt.s32.f32 %v918_v16  ;;  %v1535_v1 = vshra.s32 %v4064_v62, 16 }
 0x1d8   :  { %1468 = vmin.xlane.f32.xlu1 %v4028_v24 }
 0x1db   :  { %v719_v47 = vpop.xlane.xlu1 %718  ;;  %1524 = vmin.xlane.f32.xlu2 %v4044_v13  ;;  %v4061_v13 = vcvt.s32.f32 %v1129_v28  ;;  %v939_v28 = vsel %vm938_vm4, %v934_v39, inf }
 0x1dc   :  { %v4051_v38 = vpop.xlane.xlu2 %922  ;;  %v717_v29 = vpop.xlane.xlu0 %716  ;;  %vm797_vm7 = vcmp.eq.f32.partialorder %v3760_v32, %v719_v47 }
 0x1dd   :  { %vm924_vm1 = vcmp.eq.f32.partialorder %v3767_v46, %v4051_v38  ;;  %vm796_vm3 = vcmp.eq.f32.partialorder %v3764_v41, %v717_v29 }
 0x1de   :  { %v925_v22 = vsel %vm924_vm1, %v920_v61, inf  ;;  %v4073_v61 = vsel %vm796_vm3, %v3681_v14, 128 }
 0x1df   :  { %926 = vmin.xlane.f32.xlu0 %v925_v22  ;;  %6651 = vst [vmem:[#allocation47_spill] sm:$0xff] %v4073_v61  ;;  %v1549_v22 = vshra.s32 %v4073_v61, 16 }
 0x1e0   :  { %1104 = vmin.xlane.f32.xlu1 %v4053_v6 }
 0x1e3   :  { %v663_v16 = vpop.xlane.xlu1 %662  ;;  %1132 = vmin.xlane.f32.xlu2 %v4061_v13 }
 0x1e4   :  { %v659_v46 = vpop.xlane.xlu2 %658  ;;  %v661_v12 = vpop.xlane.xlu0 %660  ;;  %vm769_vm10 = vcmp.eq.f32.partialorder %v3772_v56, %v663_v16  ;;  %v1394_v56 = vand.u32 65535, %v3821_v25 }
 0x1e5   :  { %vm767_vm5 = vcmp.eq.f32.partialorder %v3777_v9, %v659_v46  ;;  %v4085_v9 = vcvt.s32.f32 %v1535_v1  ;;  %vm768_vm6 = vcmp.eq.f32.partialorder %v3780_v27, %v661_v12  ;;  %v4099_v1 = vcvt.s32.f32 %v1549_v22 }
 0x1e6   :  { %v4076_v2 = vsel %vm767_vm5, %v3681_v14, 128  ;;  %v4102_v7 = vsel %vm768_vm6, %v3681_v14, 128 }
 0x1e7   :  { %940 = vmin.xlane.f32.xlu0 %v939_v28  ;;  %v1143_v41 = vshra.s32 %v4076_v2, 16  ;;  %v946_v28 = vand.u32 65535, %v3784_v31  ;;  %v1157_v31 = vshra.s32 %v4102_v7, 16 }
 0x1e9   :  { %v4083_v29 = vcvt.s32.f32 %v1143_v41  ;;  %v960_v41 = vand.u32 65535, %v3787_v34  ;;  %v948_v27 = vcvt.s32.f32 %v946_v28  ;;  %v4112_v34 = vsel %vm797_vm7, %v3681_v14, 128 }
 0x1ea   :  { %6653 = vst [vmem:[#allocation49_spill] sm:$0xff] %v4112_v34  ;;  %v4117_v47 = vcvt.s32.f32 %v1157_v31  ;;  %v4121_v28 = vsel %vm769_vm10, %v3681_v14, 128 }
 0x1eb   :  { %6652 = vst [vmem:[#allocation48_spill] sm:$0xff] %v4083_v29  ;;  %v4088_v43 = vpop.xlane.xlu1 %720  ;;  %1146 = vmin.xlane.f32.xlu1 %v4083_v29  ;;  %1538 = vmin.xlane.f32.xlu2 %v4085_v9  ;;  %v962_v12 = vcvt.s32.f32 %v960_v41  ;;  %v79_v41 = vld [vmem:[%s6480_s0 + $0x1d8] sm:$0xff] }
 0x1ec   :  { %v4093_v46 = vpop.xlane.xlu2 %964  ;;  %v4095_v39 = vpop.xlane.xlu0 %950  ;;  %2753 = vmatmul.msk.f32.gmra.mxu2 %vm101_vm0, %v79_v41 }
 0x1ed   :  { %vm952_vm8 = vcmp.eq.f32.partialorder %v3805_v35, %v4095_v39  ;;  %vm966_vm9 = vcmp.eq.f32.partialorder %v3803_v20, %v4093_v46  ;;  %v1563_v20 = vshra.s32 %v4112_v34, 16 }
 0x1ee   :  { %v953_v61 = vsel %vm952_vm8, %v948_v27, inf  ;;  %v967_v29 = vsel %vm966_vm9, %v962_v12, inf  ;;  %v1396_v12 = vcvt.s32.f32 %v1394_v56  ;;  %vm798_vm8 = vcmp.eq.f32.partialorder %v3794_v60, %v4088_v43  ;;  %v6664_v60 = vld [vmem:[#allocation13_spill] sm:$0xff] }
 0x1ef   :  { %1552 = vmin.xlane.f32.xlu0 %v4099_v1  ;;  %v4130_v16 = vcvt.s32.f32 %v1563_v20  ;;  %v974_v20 = vand.u32 65535, %v3800_v53 }
 0x1f1   :  { %6654 = vst [vmem:[#allocation50_spill] sm:$0xff] %v4130_v16  ;;  %v976_v56 = vcvt.s32.f32 %v974_v20 }
 0x1f3   :  { %v4114_v22 = vpop.xlane.xlu1 %978  ;;  %954 = vmin.xlane.f32.xlu1 %v953_v61  ;;  %968 = vmin.xlane.f32.xlu2 %v967_v29  ;;  %v1171_v61 = vshra.s32 %v4121_v28, 16 }
 0x1f4   :  { %v665_v32 = vpop.xlane.xlu0 %664  ;;  %v667_v35 = vpop.xlane.xlu2 %666  ;;  %vm980_vm13 = vcmp.eq.f32.partialorder %v3817_v10, %v4114_v22 }
 0x1f5   :  { %vm770_vm11 = vcmp.eq.f32.partialorder %v3811_v52, %v665_v32  ;;  %v4143_v25 = vcvt.s32.f32 %v1171_v61  ;;  %v988_v61 = vand.u32 65535, %v3833_v57  ;;  %vm771_vm14 = vcmp.eq.f32.partialorder %v3814_v15, %v667_v35 }
 0x1f6   :  { %v4134_v29 = vsel %vm770_vm11, %v3681_v14, 128  ;;  %v4166_v10 = vsel %vm771_vm14, %v3681_v14, 128 }
 0x1f7   :  { %1160 = vmin.xlane.f32.xlu0 %v4117_v47  ;;  %v1185_v31 = vshra.s32 %v4134_v29, 16  ;;  %v990_v53 = vcvt.s32.f32 %v988_v61  ;;  %v1199_v15 = vshra.s32 %v4166_v10, 16 }
 0x1f9   :  { %v4148_v41 = vcvt.s32.f32 %v1185_v31  ;;  %v80_v31 = vld [vmem:[%s6480_s0 + $0x1e0] sm:$0xff]  ;;  %v4174_v35 = vcvt.s32.f32 %v1199_v15 }
 0x1fa   :  { %2754 = vmatmul.msk.f32.vlgmr.msra.gmra.mxu3 %vm101_vm0, %v80_v31 }
 0x1fb   :  { %v4136_v27 = vpop.xlane.xlu1 %722  ;;  %1566 = vmin.xlane.f32.xlu1 %v4130_v16 }
 0x1fc   :  { %v4139_v52 = vpop.xlane.xlu2 %1398  ;;  %v671_v61 = vpop.xlane.xlu0 %670 }
 0x1fd   :  { %vm1400_vm12 = vcmp.eq.f32.partialorder %v3839_v26, %v4139_v52  ;;  %vm773_vm2 = vcmp.eq.f32.partialorder %v3836_v37, %v671_v61  ;;  %v1030_v37 = vand.u32 65535, %v3868_v33 }
 0x1fe   :  { %v1401_v32 = vsel %vm1400_vm12, %v1396_v12, inf  ;;  %v981_v12 = vsel %vm980_vm13, %v976_v56, inf }
 0x1ff   :  { %1402 = vmin.xlane.f32.xlu2 %v1401_v32  ;;  %1174 = vmin.xlane.f32.xlu0 %v4143_v25 }
 0x203   :  { %v4150_v34 = vpop.xlane.xlu1 %992  ;;  %1188 = vmin.xlane.f32.xlu1 %v4148_v41 }
 0x204   :  { %v4155_v26 = vpop.xlane.xlu2 %728  ;;  %vm994_vm15 = vcmp.eq.f32.partialorder %v3845_v0, %v4150_v34  ;;  %v81_v0 = vld [vmem:[%s6480_s0 + $0x1e8] sm:$0xff] }
 0x205   :  { %v995_v57 = vsel %vm994_vm15, %v990_v53, inf  ;;  %2755 = vmatmul.msk.f32.gmra.mxu3 %vm101_vm0, %v81_v0  ;;  %v4190_v0 = vsel %vm773_vm2, %v3681_v14, 128  ;;  %vm2173_vm15 = vcmask 7168  }
 0x206   :  { %6657 = vst [vmem:[#allocation53_spill] sm:$0xff] %v4190_v0  ;;  %v4202_v61 = vpop.xlane.xlu0 %1426 }
 0x207   :  { %982 = vmin.xlane.f32.xlu0 %v981_v12  ;;  %6658 = vst [vmem:[#allocation54_spill] sm:$0xff] %v4202_v61 }
 0x20b   :  { %v4168_v32 = vpop.xlane.xlu1 %724  ;;  %996 = vmin.xlane.f32.xlu1 %v995_v57  ;;  %v1002_v57 = vand.u32 65535, %v3885_v49  ;;  %v1227_v49 = vshra.s32 %v4190_v0, 16 }
 0x20c   :  { %v673_v20 = vpop.xlane.xlu2 %672 }
 0x20d   :  { %vm774_vm4 = vcmp.eq.f32.partialorder %v3864_v4, %v673_v20 }
 0x213   :  { %v669_v56 = vpop.xlane.xlu1 %668  ;;  %1202 = vmin.xlane.f32.xlu1 %v4174_v35 }
 0x214   :  { %vm772_vm1 = vcmp.eq.f32.partialorder %v3872_v17, %v669_v56  ;;  %v4182_v53 = vpop.xlane.xlu2 %1034  ;;  %v1004_v56 = vcvt.s32.f32 %v1002_v57  ;;  %v4209_v57 = vsel %vm774_vm4, %v3681_v14, 128 }
 0x215   :  { %v4180_v12 = vsel %vm772_vm1, %v3681_v14, 128  ;;  %vm1036_vm5 = vcmp.eq.f32.partialorder %v3890_v40, %v4182_v53  ;;  %v1241_v4 = vshra.s32 %v4209_v57, 16  ;;  %v1408_v40 = vand.u32 65535, %v3920_v55 }
 0x216   :  { %6655 = vst [vmem:[#allocation51_spill] sm:$0xff] %v4180_v12  ;;  %v1213_v31 = vshra.s32 %v4180_v12, 16  ;;  %v1044_v55 = vand.u32 65535, %v3878_v50 }
 0x218   :  { %v4187_v15 = vcvt.s32.f32 %v1213_v31  ;;  %v4204_v31 = vcvt.s32.f32 %v1227_v49  ;;  %v4221_v49 = vpop.xlane.xlu0 %1048 }
 0x219   :  { %6660 = vst [vmem:[#allocation56_spill] sm:$0xff] %v4221_v49  ;;  %vm1050_vm9 = vcmp.eq.f32.partialorder %v3888_v59, %v4221_v49 }
 0x21a   :  { %6656 = vst [vmem:[#allocation52_spill] sm:$0xff] %v4187_v15 }
 0x21b   :  { %v4192_v17 = vpop.xlane.xlu1 %1006  ;;  %1216 = vmin.xlane.f32.xlu1 %v4187_v15  ;;  %6659 = vst [vmem:[#allocation55_spill] sm:$0xff] %v4204_v31  ;;  %v4223_v15 = vcvt.s32.f32 %v1241_v4  ;;  %v1046_v4 = vcvt.s32.f32 %v1044_v55 }
 0x21c   :  { %vm1008_vm3 = vcmp.eq.f32.partialorder %v3904_v23, %v4192_v17  ;;  %v4197_v16 = vpop.xlane.xlu2 %1440 }
 0x21d   :  { %v1009_v12 = vsel %vm1008_vm3, %v1004_v56, inf  ;;  %v1032_v56 = vcvt.s32.f32 %v1030_v37  ;;  %v1051_v50 = vsel %vm1050_vm9, %v1046_v4, inf  ;;  %vm1442_vm14 = vcmp.eq.f32.partialorder %v3907_v30, %v4197_v16 }
 0x21e   :  { %1010 = vmin.xlane.f32.xlu2 %v1009_v12  ;;  %v1464_v30 = vand.u32 65535, %v4006_v51  ;;  %v6677_v51 = vld [vmem:[#allocation39_spill] sm:$0xff] }
 0x21f   :  { %v1037_v0 = vsel %vm1036_vm5, %v1032_v56, inf }
 0x223   :  { %v4211_v23 = vpop.xlane.xlu1 %726  ;;  %1230 = vmin.xlane.f32.xlu1 %v4204_v31  ;;  %v1410_v31 = vcvt.s32.f32 %v1408_v40  ;;  %v4242_v40 = vsel %vm798_vm8, %v3681_v14, 128 }
 0x224   :  { %v675_v12 = vpop.xlane.xlu2 %674  ;;  %6662 = vst [vmem:[#allocation58_spill] sm:$0xff] %v4242_v40  ;;  %v1577_v55 = vshra.s32 %v4242_v40, 16 }
 0x225   :  { %vm775_vm6 = vcmp.eq.f32.partialorder %v3916_v18, %v675_v12  ;;  %v1016_v12 = vand.u32 65535, %v3936_v36  ;;  %v4251_v36 = vld [vmem:[%s6482_s2] ss:$0 sm:$0xff] }
 0x226   :  { %1038 = vmin.xlane.f32.xlu2 %v1037_v0  ;;  %v4217_v33 = vsel %vm775_vm6, %v3681_v14, 128  ;;  %v4255_v43 = vsub.f32 %v4251_v36, %v6664_v60  ;;  %v4266_v49 = vcvt.s32.f32 %v1577_v55  ;;  %v6669_v60 = vld [vmem:[#allocation29_spill] sm:$0xff] }
 0x227   :  { %v1255_v20 = vshra.s32 %v4217_v33, 16  ;;  %vm1428_vm12 = vcmp.eq.f32.partialorder %v6669_v60, %v4202_v61  ;;  %v6673_v60 = vld [vmem:[#allocation31_spill] sm:$0xff] }
 0x228   :  { %6665 = vst [vmem:[#allocation13_spill] sm:$0xff] %v4255_v43  ;;  %v1436_v61 = vand.u32 65535, %v6673_v60  ;;  %v1478_v60 = vand.u32 65535, %v3950_v21  ;;  %v82_v21 = vld [vmem:[%s6480_s0 + $0x1f0] sm:$0xff] }
 0x229   :  { %v4228_v18 = vcvt.s32.f32 %v1255_v20  ;;  %v1018_v20 = vcvt.s32.f32 %v1016_v12  ;;  %v6666_v12 = vld [vmem:[#allocation27_spill] sm:$0xff]  ;;  %2756 = vmatmul.msk.f32.gmra.mxu3 %vm101_vm0, %v82_v21  ;;  %v1058_v21 = vand.u32 65535, %v3983_v48 }
 0x22a   :  { %v1422_v4 = vand.u32 65535, %v6666_v12  ;;  %6668 = vst [vmem:[#allocation27_spill] sm:$0xff] %v4266_v49 }
 0x22b   :  { %v4225_v37 = vpop.xlane.xlu1 %1412  ;;  %1244 = vmin.xlane.f32.xlu1 %v4223_v15  ;;  %6661 = vst [vmem:[#allocation57_spill] sm:$0xff] %v4228_v18 }
 0x22c   :  { %vm1414_vm7 = vcmp.eq.f32.partialorder %v3933_v8, %v4225_v37  ;;  %v4232_v0 = vpop.xlane.xlu2 %1076  ;;  %v4244_v8 = vpop.xlane.xlu0 %676 }
 0x22d   :  { %v1415_v56 = vsel %vm1414_vm7, %v1410_v31, inf  ;;  %vm1078_vm13 = vcmp.eq.f32.partialorder %v3945_v5, %v4232_v0 }
 0x22e   :  { %1258 = vmin.xlane.f32.xlu2 %v4228_v18  ;;  %1416 = vmin.xlane.f32.xlu0 %v1415_v56 }
 0x233   :  { %v4246_v31 = vpop.xlane.xlu1 %1020  ;;  %1052 = vmin.xlane.f32.xlu1 %v1051_v50  ;;  %v6667_v50 = vld [vmem:[#allocation26_spill] sm:$0xff] }
 0x234   :  { %6663 = vst [vmem:[#allocation59_spill] sm:$0xff] %v4246_v31  ;;  %vm1022_vm10 = vcmp.eq.f32.partialorder %v3964_v45, %v4246_v31  ;;  %v4259_v59 = vpop.xlane.xlu2 %1482  ;;  %vm799_vm11 = vcmp.eq.f32.partialorder %v6667_v50, %v4136_v27  ;;  %v4273_v31 = vpop.xlane.xlu0 %1090  ;;  %v1072_v50 = vand.u32 65535, %v3924_v11 }
 0x235   :  { %v1023_v56 = vsel %vm1022_vm10, %v1018_v20, inf  ;;  %v4271_v45 = vsel %vm799_vm11, %v3681_v14, 128  ;;  %vm1484_vm2 = vcmp.eq.f32.partialorder %v6677_v51, %v4259_v59 }
 0x236   :  { %690 = vmin.xlane.f32.xlu2 %v4255_v43  ;;  %1024 = vmin.xlane.f32.xlu0 %v1023_v56  ;;  %6670 = vst [vmem:[#allocation26_spill] sm:$0xff] %v4271_v45  ;;  %v1424_v56 = vcvt.s32.f32 %v1422_v4  ;;  %v6671_v43 = vld [vmem:[#allocation15_spill] sm:$0xff]  ;;  %v1591_v55 = vshra.s32 %v4271_v45, 16  ;;  %v915_v4 = vcvt.f32.s32 %v3998_v19 }
 0x237   :  { %v4279_v40 = vsub.f32 %v4251_v36, %v6671_v43 }
 0x238   :  { %v1429_v27 = vsel %vm1428_vm12, %v1424_v56, inf  ;;  %v4289_v18 = vcvt.s32.f32 %v1591_v55  ;;  %v916_v45 = vshll.u32 %v915_v4, 16  ;;  %v1466_v4 = vcvt.s32.f32 %v1464_v30 }
 0x239   :  { %6672 = vst [vmem:[#allocation29_spill] sm:$0xff] %v4279_v40 }
 0x23a   :  { %6674 = vst [vmem:[#allocation15_spill] sm:$0xff] %v4289_v18 }
 0x23b   :  { %v4275_v20 = vpop.xlane.xlu1 %1454  ;;  %1580 = vmin.xlane.f32.xlu1 %v4266_v49 }
 0x23c   :  { %v4284_v12 = vpop.xlane.xlu2 %1496 }
 0x23d   :  { %vm1498_vm5 = vcmp.eq.f32.partialorder %v3986_v42, %v4284_v12 }
 0x23e   :  { %692 = vmin.xlane.f32.xlu2 %v4279_v40  ;;  %1430 = vmin.xlane.f32.xlu0 %v1429_v27  ;;  %v1074_v27 = vcvt.s32.f32 %v1072_v50  ;;  %v1438_v40 = vcvt.s32.f32 %v1436_v61  ;;  %v6676_v61 = vld [vmem:[#allocation38_spill] sm:$0xff] }
 0x240   :  { %v1079_v11 = vsel %vm1078_vm13, %v1074_v27, inf  ;;  %v1443_v19 = vsel %vm1442_vm14, %v1438_v40, inf  ;;  %v6535_v40 = vmov 1.0   ;;  %v6678_v27 = vld [vmem:[#allocation41_spill] sm:$0xff] }
 0x241   :  { %vm1456_vm3 = vcmp.eq.f32.partialorder %v6678_v27, %v4275_v20  ;;  %v929_v27 = vcvt.f32.s32 %v4051_v38 }
 0x242   :  { %v913_v56 = vpop.xlane.xlu0 %912 }
 0x243   :  { %v4295_v43 = vpop.xlane.xlu1 %1062  ;;  %v914_v49 = vcvt.f32.s32 %v913_v56  ;;  %1594 = vmin.xlane.f32.xlu1 %v4289_v18  ;;  %v1480_v56 = vcvt.s32.f32 %v1478_v60  ;;  %v6680_v60 = vld [vmem:[#allocation34_spill] sm:$0xff]  ;;  %v930_v38 = vshll.u32 %v929_v27, 16  ;;  %v943_v27 = vcvt.f32.s32 %v4024_v63  ;;  %v6685_v63 = vld [vmem:[#allocation43_spill] sm:$0xff] }
 0x244   :  { %v1086_v18 = vand.u32 65535, %v6680_v60  ;;  %vm1064_vm7 = vcmp.eq.f32.partialorder %v4001_v58, %v4295_v43  ;;  %v1506_v58 = vand.u32 65535, %v4012_v3  ;;  %v6684_v3 = vld [vmem:[#allocation30_spill] sm:$0xff] }
 0x245   :  { %v4298_v55 = vadd.s32 %v916_v45, %v914_v49  ;;  %v1450_v49 = vand.u32 65535, %v6676_v61  ;;  %v1485_v61 = vsel %vm1484_vm2, %v1480_v56, inf  ;;  %vm800_vm9 = vcmp.eq.f32.partialorder %v6684_v3, %v4168_v32 }
 0x246   :  { %1080 = vmin.xlane.f32.xlu2 %v1079_v11  ;;  %1444 = vmin.xlane.f32.xlu0 %v1443_v19  ;;  %v4300_v5 = vpop.xlane.xlu2 %1510 }
 0x247   :  { %6675 = vst [vmem:[#allocation31_spill] sm:$0xff] %v4298_v55  ;;  %vm1774_vm1 = vcmp.eq.s32.totalorder %v3681_v14, %v4298_v55  ;;  %v1452_v11 = vcvt.s32.f32 %v1450_v49  ;;  %v83_v49 = vld [vmem:[%s6480_s0 + $0x1f8] sm:$0xff]  ;;  %vm1512_vm10 = vcmp.eq.f32.partialorder %v6685_v63, %v4300_v5 }
 0x248   :  { %2176 = vst.msk [vmem:[%s6484_s4 + $0x10] sm:$0xff] %vm2173_vm15, %v4298_v55  ;;  %2824 = vmatmul.msk.f32.vlgmr.msra.gmra.mxu1 %vm1774_vm1, %v6535_v40  ;;  %v6679_v55 = vld [vmem:[#allocation40_spill] sm:$0xff]  ;;  %2757 = vmatmul.msk.f32.gmra.mxu3 %vm101_vm0, %v83_v49 }
 0x249   :  { %v1457_v51 = vsel %vm1456_vm3, %v1452_v11, inf  ;;  %v1492_v30 = vand.u32 65535, %v6679_v55  ;;  %v1088_v55 = vcvt.s32.f32 %v1086_v18  ;;  %v1060_v11 = vcvt.s32.f32 %v1058_v21  ;;  %v524_v21 = vpop.f32.mrf.mxu2  ;;  %v6687_v49 = vld [vmem:[#allocation8_spill] sm:$0xff] }
 0x24a   :  { %v4323_v50 = vpop.xlane.xlu0 %1118  ;;  %v1100_v18 = vand.u32 65535, %v4034_v44  ;;  %v6686_v44 = vld [vmem:[#allocation16_spill] sm:$0xff] }
 0x24b   :  { %v4321_v45 = vpop.xlane.xlu1 %1468  ;;  %v1494_v56 = vcvt.s32.f32 %v1492_v30  ;;  %vm777_vm12 = vcmp.eq.f32.partialorder %v6687_v49, %v6686_v44  ;;  %v6690_v44 = vld [vmem:[#allocation45_spill] sm:$0xff] }
 0x24c   :  { %vm1470_vm4 = vcmp.eq.f32.partialorder %v4028_v24, %v4321_v45  ;;  %v6681_v24 = vld [vmem:[#allocation35_spill] sm:$0xff]  ;;  %vm1120_vm14 = vcmp.eq.f32.partialorder %v6690_v44, %v4323_v50  ;;  %v1534_v44 = vand.u32 65535, %v4064_v62  ;;  %v6695_v62 = vld [vmem:[#allocation21_spill] sm:$0xff] }
 0x24d   :  { %v1471_v19 = vsel %vm1470_vm4, %v1466_v4, inf  ;;  %vm1092_vm6 = vcmp.eq.f32.partialorder %v6681_v24, %v4273_v31  ;;  %v6683_v24 = vmov 1.0  }
 0x24e   :  { %1472 = vmin.xlane.f32.xlu1 %v1471_v19  ;;  %1486 = vmin.xlane.f32.xlu2 %v1485_v61  ;;  %v4330_v40 = vpop.xlane.xlu2 %1524  ;;  %v1499_v19 = vsel %vm1498_vm5, %v1494_v56, inf  ;;  %v1093_v42 = vsel %vm1092_vm6, %v1088_v55, inf  ;;  %v1508_v55 = vcvt.s32.f32 %v1506_v58 }
 0x24f   :  { %1458 = vmin.xlane.f32.xlu0 %v1457_v51  ;;  %v1065_v51 = vsel %vm1064_vm7, %v1060_v11, inf }
 0x250   :  { %v1513_v32 = vsel %vm1512_vm10, %v1508_v55, inf  ;;  %v971_v55 = vcvt.f32.s32 %v4093_v46 }
 0x252   :  { %v927_v4 = vpop.xlane.xlu0 %926 }
 0x253   :  { %v928_v48 = vcvt.f32.s32 %v927_v4  ;;  %v4348_v60 = vpop.xlane.xlu1 %1104  ;;  %v4375_v4 = vsub.f32 %v4251_v36, %v524_v21 }
 0x254   :  { %vm1106_vm11 = vcmp.eq.f32.partialorder %v4053_v6, %v4348_v60 }
 0x255   :  { %v4346_v61 = vadd.s32 %v930_v38, %v928_v48  ;;  %v1102_v38 = vcvt.s32.f32 %v1100_v18  ;;  %v944_v48 = vshll.u32 %v943_v27, 16  ;;  %v6689_v18 = vld [vmem:[#allocation42_spill] sm:$0xff] }
 0x256   :  { %1500 = vmin.xlane.f32.xlu2 %v1499_v19  ;;  %1094 = vmin.xlane.f32.xlu1 %v1093_v42  ;;  %v4350_v30 = vpop.xlane.xlu2 %1132  ;;  %v4378_v19 = vsel %vm800_vm9, %v3681_v14, 128  ;;  %v1114_v27 = vand.u32 65535, %v6689_v18 }
 0x257   :  { %6682 = vst [vmem:[#allocation38_spill] sm:$0xff] %v4346_v61  ;;  %1066 = vmin.xlane.f32.xlu0 %v1065_v51  ;;  %vm1775_vm8 = vcmp.eq.s32.totalorder %v3681_v14, %v4346_v61  ;;  %v1107_v42 = vsel %vm1106_vm11, %v1102_v38, inf  ;;  %v4381_v51 = vsel %vm777_vm12, %v3681_v14, 128  ;;  %v1605_v3 = vshra.s32 %v4378_v19, 16 }
 0x258   :  { %2177 = vst.msk [vmem:[%s6484_s4 + $0x18] sm:$0xff] %vm2173_vm15, %v4346_v61  ;;  %2825 = vmatmul.msk.f32.gmra.mxu1 %vm1775_vm8, %v6683_v24  ;;  %v1283_v63 = vshra.s32 %v4381_v51, 16  ;;  %v957_v38 = vcvt.f32.s32 %v4095_v39  ;;  %vm1134_vm4 = vcmp.eq.f32.partialorder %v4061_v13, %v4350_v30 }
 0x25a   :  { %v941_v56 = vpop.xlane.xlu0 %940  ;;  %v958_v46 = vshll.u32 %v957_v38, 16 }
 0x25b   :  { %v942_v11 = vcvt.f32.s32 %v941_v56  ;;  %v1116_v56 = vcvt.s32.f32 %v1114_v27  ;;  %v1128_v27 = vand.u32 65535, %v4048_v54  ;;  %v6696_v54 = vld [vmem:[#allocation9_spill] sm:$0xff] }
 0x25c   :  { %vm778_vm5 = vcmp.eq.f32.partialorder %v6696_v54, %v6695_v62 }
 0x25d   :  { %v4383_v6 = vadd.s32 %v944_v48, %v942_v11  ;;  %v4410_v48 = vcvt.s32.f32 %v1605_v3  ;;  %v4412_v11 = vcvt.s32.f32 %v1283_v63  ;;  %v527_v3 = vpop.f32.mrf.mxu2  ;;  %v6692_v63 = vld [vmem:[#allocation33_spill] sm:$0xff] }
 0x25e   :  { %1514 = vmin.xlane.f32.xlu2 %v1513_v32  ;;  %1108 = vmin.xlane.f32.xlu1 %v1107_v42  ;;  %v4386_v21 = vpop.xlane.xlu1 %1146  ;;  %v4388_v58 = vpop.xlane.xlu2 %1538  ;;  %v1121_v32 = vsel %vm1120_vm14, %v1116_v56, inf  ;;  %vm801_vm2 = vcmp.eq.f32.partialorder %v6692_v63, %v4211_v23  ;;  %v1130_v23 = vcvt.s32.f32 %v1128_v27 }
 0x25f   :  { %6688 = vst [vmem:[#allocation39_spill] sm:$0xff] %v4383_v6  ;;  %730 = vmin.xlane.f32.xlu0 %v4375_v4  ;;  %vm1776_vm13 = vcmp.eq.s32.totalorder %v3681_v14, %v4383_v6  ;;  %vm1540_vm3 = vcmp.eq.f32.partialorder %v4085_v9, %v4388_v58  ;;  %v4443_v13 = vsel %vm801_vm2, %v3681_v14, 128 }
 0x260   :  { %2178 = vst.msk [vmem:[%s6484_s4 + $0x20] sm:$0xff] %vm2173_vm15, %v4383_v6  ;;  %2826 = vmatmul.msk.f32.gmra.mxu1 %vm1776_vm13, %v6683_v24  ;;  %v972_v6 = vshll.u32 %v971_v55, 16  ;;  %v4431_v55 = vsub.f32 %v4251_v36, %v527_v3  ;;  %v1619_v27 = vshra.s32 %v4443_v13, 16 }
 0x261   :  { %6691 = vst [vmem:[#allocation41_spill] sm:$0xff] %v4410_v48 }
 0x262   :  { %v4406_v49 = vpop.xlane.xlu0 %1552 }
 0x263   :  { %vm1554_vm12 = vcmp.eq.f32.partialorder %v4099_v1, %v4406_v49 }
 0x266   :  { %1608 = vmin.xlane.f32.xlu1 %v4410_v48  ;;  %1122 = vmin.xlane.f32.xlu2 %v1121_v32  ;;  %v955_v42 = vpop.xlane.xlu1 %954  ;;  %v969_v18 = vpop.xlane.xlu2 %968  ;;  %v1536_v32 = vcvt.s32.f32 %v1534_v44  ;;  %v1405_v44 = vcvt.f32.s32 %v4139_v52 }
 0x267   :  { %1286 = vmin.xlane.f32.xlu0 %v4412_v11  ;;  %v956_v61 = vcvt.f32.s32 %v955_v42  ;;  %v970_v39 = vcvt.f32.s32 %v969_v18  ;;  %v1142_v18 = vand.u32 65535, %v4076_v2 }
 0x268   :  { %v1541_v9 = vsel %vm1540_vm3, %v1536_v32, inf  ;;  %v1406_v54 = vshll.u32 %v1405_v44, 16  ;;  %v1156_v44 = vand.u32 65535, %v4102_v7  ;;  %v6700_v7 = vld [vmem:[#allocation28_spill] sm:$0xff] }
 0x269   :  { %v4420_v56 = vadd.s32 %v958_v46, %v956_v61  ;;  %v4422_v48 = vadd.s32 %v972_v6, %v970_v39  ;;  %v1135_v61 = vsel %vm1134_vm4, %v1130_v23, inf  ;;  %v4455_v6 = vsel %vm778_vm5, %v3681_v14, 128  ;;  %v6697_v39 = vld [vmem:[#allocation48_spill] sm:$0xff] }
 0x26a   :  { %v4433_v38 = vpop.xlane.xlu0 %1160  ;;  %v1297_v46 = vshra.s32 %v4455_v6, 16  ;;  %vm1148_vm7 = vcmp.eq.f32.partialorder %v6697_v39, %v4386_v21  ;;  %v1144_v62 = vcvt.s32.f32 %v1142_v18  ;;  %v4470_v23 = vcvt.s32.f32 %v1619_v27 }
 0x26b   :  { %6693 = vst [vmem:[#allocation40_spill] sm:$0xff] %v4420_v56  ;;  %vm1777_vm6 = vcmp.eq.s32.totalorder %v3681_v14, %v4420_v56  ;;  %vm1778_vm9 = vcmp.eq.s32.totalorder %v3681_v14, %v4422_v48  ;;  %v985_v39 = vcvt.f32.s32 %v4114_v22  ;;  %vm802_vm11 = vcmp.eq.f32.partialorder %v6700_v7, %v4155_v26  ;;  %v6701_v22 = vld [vmem:[#allocation32_spill] sm:$0xff] }
 0x26c   :  { %6694 = vst [vmem:[#allocation34_spill] sm:$0xff] %v4422_v48  ;;  %2827 = vmatmul.msk.f32.gmra.mxu1 %vm1777_vm6, %v6683_v24  ;;  %v4476_v2 = vcvt.s32.f32 %v1297_v46  ;;  %v1149_v52 = vsel %vm1148_vm7, %v1144_v62, inf  ;;  %v530_v46 = vpop.f32.mrf.mxu2  ;;  %vm1162_vm14 = vcmp.eq.f32.partialorder %v4117_v47, %v4433_v38  ;;  %vm776_vm2 = vcmp.eq.f32.partialorder %v6701_v22, %v4244_v8 }
 0x26d   :  { %2179 = vst.msk [vmem:[%s6484_s4 + $0x28] sm:$0xff] %vm2173_vm15, %v4420_v56  ;;  %v4511_v26 = vsel %vm802_vm11, %v3681_v14, 128  ;;  %v4514_v47 = vsel %vm776_vm2, %v3681_v14, 128 }
 0x26e   :  { %2180 = vst.msk [vmem:[%s6484_s4 + $0x30] sm:$0xff] %vm2173_vm15, %v4422_v48  ;;  %1542 = vmin.xlane.f32.xlu1 %v1541_v9  ;;  %1136 = vmin.xlane.f32.xlu2 %v1135_v61  ;;  %v4458_v42 = vpop.xlane.xlu1 %1566  ;;  %v6699_v61 = vld [vmem:[#allocation47_spill] sm:$0xff] }
 0x26f   :  { %732 = vmin.xlane.f32.xlu0 %v4431_v55  ;;  %v1548_v18 = vand.u32 65535, %v6699_v61  ;;  %v999_v61 = vcvt.f32.s32 %v4150_v34 }
 0x272   :  { %v1403_v3 = vpop.xlane.xlu2 %1402  ;;  %v4466_v63 = vpop.xlane.xlu0 %1174 }
 0x273   :  { %v1404_v32 = vcvt.f32.s32 %v1403_v3  ;;  %v4507_v3 = vsub.f32 %v4251_v36, %v530_v46  ;;  %v1269_v46 = vshra.s32 %v4514_v47, 16 }
 0x274   :  { %2828 = vmatmul.msk.f32.gmra.mxu1 %vm1778_vm9, %v6683_v24 }
 0x275   :  { %v4478_v9 = vadd.s32 %v1406_v54, %v1404_v32  ;;  %v1550_v54 = vcvt.s32.f32 %v1548_v18  ;;  %v1158_v32 = vcvt.s32.f32 %v1156_v44  ;;  %v6703_v18 = vld [vmem:[#allocation44_spill] sm:$0xff] }
 0x276   :  { %1622 = vmin.xlane.f32.xlu1 %v4470_v23  ;;  %1150 = vmin.xlane.f32.xlu2 %v1149_v52  ;;  %v4484_v27 = vpop.xlane.xlu1 %1188  ;;  %v986_v52 = vshll.u32 %v985_v39, 16  ;;  %v1520_v44 = vand.u32 65535, %v6703_v18  ;;  %v1000_v39 = vshll.u32 %v999_v61, 16  ;;  %v1184_v18 = vand.u32 65535, %v4134_v29 }
 0x277   :  { %6698 = vst [vmem:[#allocation35_spill] sm:$0xff] %v4478_v9  ;;  %1300 = vmin.xlane.f32.xlu0 %v4476_v2  ;;  %vm6569_vm10 = vcmp.eq.s32.totalorder %v3681_v14, %v4478_v9  ;;  %v1555_v1 = vsel %vm1554_vm12, %v1550_v54, inf  ;;  %v1163_v7 = vsel %vm1162_vm14, %v1158_v32, inf  ;;  %v6706_v54 = vld [vmem:[#allocation22_spill] sm:$0xff]  ;;  %vm1190_vm11 = vcmp.eq.f32.partialorder %v4148_v41, %v4484_v27 }
 0x278   :  { %2211 = vst.msk [vmem:[%s6484_s4 + $0x128] sm:$0xff] %vm2173_vm15, %v4478_v9  ;;  %2859 = vmatmul.msk.f32.vlgmr.msrb.gmra.mxu3 %vm6569_vm10, %v6683_v24  ;;  %v6707_v32 = vld [vmem:[#allocation10_spill] sm:$0xff]  ;;  %v1186_v29 = vcvt.s32.f32 %v1184_v18 }
 0x279   :  { %vm779_vm5 = vcmp.eq.f32.partialorder %v6707_v32, %v6706_v54  ;;  %v1013_v54 = vcvt.f32.s32 %v4192_v17  ;;  %v1198_v32 = vand.u32 65535, %v4166_v10  ;;  %v6713_v17 = vld [vmem:[#allocation37_spill] sm:$0xff] }
 0x27a   :  { %v983_v62 = vpop.xlane.xlu0 %982 }
 0x27b   :  { %v984_v9 = vcvt.f32.s32 %v983_v62  ;;  %v6705_v62 = vld [vmem:[#allocation46_spill] sm:$0xff]  ;;  %v1014_v18 = vshll.u32 %v1013_v54, 16  ;;  %v1200_v10 = vcvt.s32.f32 %v1198_v32 }
 0x27c   :  { %vm1526_vm4 = vcmp.eq.f32.partialorder %v6705_v62, %v4330_v40  ;;  %v1191_v62 = vsel %vm1190_vm11, %v1186_v29, inf  ;;  %v6714_v29 = vld [vmem:[#allocation20_spill] sm:$0xff] }
 0x27d   :  { %v4516_v48 = vadd.s32 %v986_v52, %v984_v9  ;;  %v1633_v9 = vshra.s32 %v4511_v26, 16  ;;  %v1522_v52 = vcvt.s32.f32 %v1520_v44  ;;  %vm882_vm14 = vcmp.eq.f32.partialorder %v6714_v29, %v6713_v17 }
 0x27e   :  { %1556 = vmin.xlane.f32.xlu1 %v1555_v1  ;;  %1164 = vmin.xlane.f32.xlu2 %v1163_v7  ;;  %v997_v8 = vpop.xlane.xlu1 %996  ;;  %v4546_v1 = vcvt.s32.f32 %v1269_v46 }
 0x27f   :  { %6702 = vst [vmem:[#allocation30_spill] sm:$0xff] %v4516_v48  ;;  %734 = vmin.xlane.f32.xlu0 %v4507_v3  ;;  %v998_v34 = vcvt.f32.s32 %v997_v8  ;;  %vm1779_vm3 = vcmp.eq.s32.totalorder %v3681_v14, %v4516_v48  ;;  %v4544_v61 = vcvt.s32.f32 %v1633_v9  ;;  %v1527_v7 = vsel %vm1526_vm4, %v1522_v52, inf }
 0x280   :  { %2181 = vst.msk [vmem:[%s6484_s4 + $0x38] sm:$0xff] %vm2173_vm15, %v4516_v48  ;;  %2829 = vmatmul.msk.f32.gmra.mxu1 %vm1779_vm3, %v6683_v24  ;;  %v4549_v8 = vsel %vm779_vm5, %v3681_v14, 128  ;;  %v6716_v48 = vld [vmem:[#allocation14_spill] sm:$0xff]  ;;  %vm1176_vm4 = vcmp.eq.f32.partialorder %v4143_v25, %v4466_v63  ;;  %v6719_v25 = vld [vmem:[#allocation51_spill] sm:$0xff] }
 0x281   :  { %v4533_v22 = vadd.s32 %v1000_v39, %v998_v34  ;;  %6708 = vst [vmem:[#allocation16_spill] sm:$0xff] %v4544_v61  ;;  %v533_v39 = vpop.f32.mrf.mxu2  ;;  %v1311_v34 = vshra.s32 %v4549_v8, 16 }
 0x282   :  { %6709 = vst [vmem:[#allocation8_spill] sm:$0xff] %v4549_v8  ;;  %v4564_v9 = vsub.f32 %v4251_v36, %v533_v39  ;;  %v539_v8 = vpop.f32.mrf.mxu3 }
 0x283   :  { %6704 = vst [vmem:[#allocation43_spill] sm:$0xff] %v4533_v22  ;;  %vm1780_vm7 = vcmp.eq.s32.totalorder %v3681_v14, %v4533_v22  ;;  %v4568_v46 = vcvt.s32.f32 %v1311_v34 }
 0x284   :  { %2182 = vst.msk [vmem:[%s6484_s4 + $0x40] sm:$0xff] %vm2173_vm15, %v4533_v22  ;;  %v1170_v22 = vand.u32 65535, %v4121_v28 }
 0x285   :  { %6710 = vst [vmem:[#allocation42_spill] sm:$0xff] %v4568_v46 }
 0x286   :  { %1636 = vmin.xlane.f32.xlu1 %v4544_v61  ;;  %1528 = vmin.xlane.f32.xlu2 %v1527_v7  ;;  %v4554_v44 = vpop.xlane.xlu1 %1202  ;;  %v6712_v7 = vld [vmem:[#allocation17_spill] sm:$0xff]  ;;  %v1172_v28 = vcvt.s32.f32 %v1170_v22  ;;  %v1212_v22 = vand.u32 65535, %v6719_v25  ;;  %v1254_v25 = vand.u32 65535, %v4217_v33 }
 0x287   :  { %1272 = vmin.xlane.f32.xlu0 %v4546_v1  ;;  %v876_v39 = vand.u32 65535, %v6712_v7  ;;  %vm1204_vm12 = vcmp.eq.f32.partialorder %v4174_v35, %v4554_v44  ;;  %v1041_v35 = vcvt.f32.s32 %v4182_v53  ;;  %v6728_v33 = vld [vmem:[#allocation53_spill] sm:$0xff] }
 0x288   :  { %2830 = vmatmul.msk.f32.gmra.mxu1 %vm1780_vm7, %v6683_v24 }
 0x289   :  { %v878_v56 = vcvt.s32.f32 %v876_v39  ;;  %v536_v53 = vpop.f32.mrf.mxu2 }
 0x28a   :  { %v4610_v29 = vsub.f32 %v4251_v36, %v536_v53  ;;  %v1226_v53 = vand.u32 65535, %v6728_v33  ;;  %v6734_v33 = vld [vmem:[#allocation57_spill] sm:$0xff] }
 0x28b   :  { %v883_v54 = vsel %vm882_vm14, %v878_v56, inf }
 0x28c   :  { %6721 = vst [vmem:[#allocation9_spill] sm:$0xff] %v4610_v29 }
 0x28e   :  { %1192 = vmin.xlane.f32.xlu1 %v1191_v62  ;;  %736 = vmin.xlane.f32.xlu2 %v4564_v9  ;;  %v4574_v52 = vpop.xlane.xlu1 %1216  ;;  %v6715_v62 = vld [vmem:[#allocation25_spill] sm:$0xff] }
 0x28f   :  { %1314 = vmin.xlane.f32.xlu0 %v4568_v46  ;;  %6711 = vst [vmem:[#allocation45_spill] sm:$0xff] %v4574_v52  ;;  %vm780_vm2 = vcmp.eq.f32.partialorder %v6716_v48, %v6715_v62  ;;  %v1205_v46 = vsel %vm1204_vm12, %v1200_v10, inf  ;;  %v1177_v48 = vsel %vm1176_vm4, %v1172_v28, inf  ;;  %v6722_v62 = vld [vmem:[#allocation23_spill] sm:$0xff]  ;;  %v1240_v28 = vand.u32 65535, %v4209_v57  ;;  %v6727_v57 = vld [vmem:[#allocation18_spill] sm:$0xff] }
 0x290   :  { %v6723_v10 = vld [vmem:[#allocation11_spill] sm:$0xff] }
 0x291   :  { %v1011_v41 = vpop.xlane.xlu2 %1010  ;;  %vm781_vm12 = vcmp.eq.f32.partialorder %v6723_v10, %v6722_v62  ;;  %v6731_v62 = vld [vmem:[#allocation36_spill] sm:$0xff] }
 0x292   :  { %v1012_v34 = vcvt.f32.s32 %v1011_v41  ;;  %v4589_v41 = vsel %vm780_vm2, %v3681_v14, 128 }
 0x293   :  { %6718 = vst [vmem:[#allocation21_spill] sm:$0xff] %v4589_v41  ;;  %v1325_v39 = vshra.s32 %v4589_v41, 16 }
 0x294   :  { %v4586_v7 = vadd.s32 %v1014_v18, %v1012_v34  ;;  %v6720_v18 = vld [vmem:[#allocation52_spill] sm:$0xff] }
 0x295   :  { %vm1218_vm11 = vcmp.eq.f32.partialorder %v6720_v18, %v4574_v52  ;;  %v4618_v41 = vcvt.s32.f32 %v1325_v39  ;;  %v1242_v39 = vcvt.s32.f32 %v1240_v28  ;;  %v6733_v28 = vld [vmem:[#allocation55_spill] sm:$0xff] }
 0x296   :  { %6717 = vst [vmem:[#allocation33_spill] sm:$0xff] %v4586_v7  ;;  %1206 = vmin.xlane.f32.xlu1 %v1205_v46  ;;  %884 = vmin.xlane.f32.xlu2 %v883_v54  ;;  %vm1781_vm5 = vcmp.eq.s32.totalorder %v3681_v14, %v4586_v7  ;;  %v4600_v56 = vpop.xlane.xlu1 %1230  ;;  %v1042_v46 = vshll.u32 %v1041_v35, 16  ;;  %v1214_v54 = vcvt.s32.f32 %v1212_v22  ;;  %v4621_v35 = vsel %vm781_vm12, %v3681_v14, 128 }
 0x297   :  { %2183 = vst.msk [vmem:[%s6484_s4 + $0x48] sm:$0xff] %vm2173_vm15, %v4586_v7  ;;  %1178 = vmin.xlane.f32.xlu0 %v1177_v48  ;;  %2831 = vmatmul.msk.f32.gmra.mxu1 %vm1781_vm5, %v6683_v24  ;;  %v890_v22 = vand.u32 65535, %v6727_v57  ;;  %v1339_v10 = vshra.s32 %v4621_v35, 16  ;;  %vm1232_vm4 = vcmp.eq.f32.partialorder %v6733_v28, %v4600_v56 }
 0x298   :  { %v1219_v7 = vsel %vm1218_vm11, %v1214_v54, inf  ;;  %6725 = vst [vmem:[#allocation47_spill] sm:$0xff] %v4618_v41 }
 0x299   :  { %v1039_v32 = vpop.xlane.xlu2 %1038  ;;  %6726 = vst [vmem:[#allocation28_spill] sm:$0xff] %v4621_v35 }
 0x29a   :  { %v1040_v34 = vcvt.f32.s32 %v1039_v32  ;;  %v1419_v32 = vcvt.f32.s32 %v4225_v37  ;;  %v1256_v37 = vcvt.s32.f32 %v1254_v25  ;;  %v892_v25 = vcvt.s32.f32 %v890_v22 }
 0x29c   :  { %v4615_v48 = vadd.s32 %v1042_v46, %v1040_v34  ;;  %v1420_v57 = vshll.u32 %v1419_v32, 16  ;;  %v4654_v32 = vcvt.s32.f32 %v1339_v10  ;;  %v6740_v10 = vld [vmem:[#allocation12_spill] sm:$0xff] }
 0x29e   :  { %6724 = vst [vmem:[#allocation48_spill] sm:$0xff] %v4615_v48  ;;  %1220 = vmin.xlane.f32.xlu1 %v1219_v7  ;;  %738 = vmin.xlane.f32.xlu2 %v4610_v29  ;;  %v4633_v46 = vpop.xlane.xlu1 %1244  ;;  %v6732_v7 = vld [vmem:[#allocation19_spill] sm:$0xff]  ;;  %v6735_v29 = vld [vmem:[#allocation56_spill] sm:$0xff] }
 0x29f   :  { %2185 = vst.msk [vmem:[%s6484_s4 + $0x58] sm:$0xff] %vm2173_vm15, %v4615_v48  ;;  %1328 = vmin.xlane.f32.xlu0 %v4618_v41  ;;  %vm1246_vm14 = vcmp.eq.f32.partialorder %v4223_v15, %v4633_v46  ;;  %vm896_vm2 = vcmp.eq.f32.partialorder %v6732_v7, %v6731_v62  ;;  %v1228_v15 = vcvt.s32.f32 %v1226_v53  ;;  %v1055_v52 = vcvt.f32.s32 %v6735_v29  ;;  %v6737_v7 = vld [vmem:[#allocation59_spill] sm:$0xff] }
 0x2a0   :  { %6729 = vst [vmem:[#allocation32_spill] sm:$0xff] %v4633_v46  ;;  %v4642_v54 = vsel %vm1246_vm14, %v1242_v39, inf  ;;  %v1027_v35 = vcvt.f32.s32 %v6737_v7  ;;  %v897_v62 = vsel %vm896_vm2, %v892_v25, inf  ;;  %v4676_v7 = vsub.f32 %v4251_v36, %v539_v8 }
 0x2a1   :  { %v4637_v18 = vpop.xlane.xlu2 %1258  ;;  %v1417_v34 = vpop.xlane.xlu0 %1416  ;;  %v1233_v39 = vsel %vm1232_vm4, %v1228_v15, inf  ;;  %v1056_v53 = vshll.u32 %v1055_v52, 16 }
 0x2a2   :  { %6730 = vst [vmem:[#allocation44_spill] sm:$0xff] %v4637_v18  ;;  %vm1260_vm11 = vcmp.eq.f32.partialorder %v6734_v33, %v4637_v18  ;;  %v1418_v41 = vcvt.f32.s32 %v1417_v34  ;;  %v6739_v34 = vld [vmem:[#allocation24_spill] sm:$0xff]  ;;  %v6741_v33 = vld [vmem:[#allocation50_spill] sm:$0xff]  ;;  %v1083_v18 = vcvt.f32.s32 %v4232_v0 }
 0x2a3   :  { %v4648_v46 = vsel %vm1260_vm11, %v1256_v37, inf  ;;  %vm782_vm14 = vcmp.eq.f32.partialorder %v6740_v10, %v6739_v34  ;;  %vm1568_vm2 = vcmp.eq.f32.partialorder %v6741_v33, %v4458_v42 }
 0x2a4   :  { %v4651_v61 = vadd.s32 %v1420_v57, %v1418_v41  ;;  %v6738_v41 = vld [vmem:[#allocation49_spill] sm:$0xff]  ;;  %v1028_v57 = vshll.u32 %v1027_v35, 16  ;;  %v4686_v35 = vsel %vm782_vm14, %v3681_v14, 128  ;;  %vm6598_vm14 = vcmp.eq.s32.totalorder %v3681_v14, %v4615_v48 }
 0x2a5   :  { %v1562_v29 = vand.u32 65535, %v6738_v41  ;;  %v1489_v48 = vcvt.f32.s32 %v4259_v59 }
 0x2a6   :  { %6736 = vst [vmem:[#allocation46_spill] sm:$0xff] %v4651_v61  ;;  %1234 = vmin.xlane.f32.xlu1 %v1233_v39  ;;  %898 = vmin.xlane.f32.xlu2 %v897_v62  ;;  %vm6568_vm12 = vcmp.eq.s32.totalorder %v3681_v14, %v4651_v61  ;;  %v1053_v22 = vpop.xlane.xlu1 %1052 }
 0x2a7   :  { %2212 = vst.msk [vmem:[%s6484_s4 + $0x130] sm:$0xff] %vm2173_vm15, %v4651_v61  ;;  %1342 = vmin.xlane.f32.xlu0 %v4654_v32  ;;  %2860 = vmatmul.msk.f32.gmra.mxu3 %vm6568_vm12, %v6683_v24  ;;  %v1054_v37 = vcvt.f32.s32 %v1053_v22  ;;  %v1564_v39 = vcvt.s32.f32 %v1562_v29  ;;  %v6743_v22 = vld [vmem:[#allocation54_spill] sm:$0xff]  ;;  %v542_v29 = vpop.f32.mrf.mxu3  ;;  %v1447_v61 = vcvt.f32.s32 %v4197_v16 }
 0x2a9   :  { %v691_v62 = vpop.xlane.xlu2 %690  ;;  %v1025_v28 = vpop.xlane.xlu0 %1024  ;;  %v4673_v15 = vadd.s32 %v1056_v53, %v1054_v37  ;;  %v1569_v41 = vsel %vm1568_vm2, %v1564_v39, inf  ;;  %v1433_v53 = vcvt.f32.s32 %v6743_v22  ;;  %v1353_v37 = vshra.s32 %v4686_v35, 16 }
 0x2aa   :  { %v1026_v25 = vcvt.f32.s32 %v1025_v28  ;;  %v6744_v28 = vld [vmem:[#allocation13_spill] sm:$0xff] }
 0x2ab   :  { %6742 = vst [vmem:[#allocation22_spill] sm:$0xff] %v4673_v15  ;;  %vm783_vm11 = vcmp.eq.f32.partialorder %v6744_v28, %v691_v62 }
 0x2ac   :  { %2186 = vst.msk [vmem:[%s6484_s4 + $0x60] sm:$0xff] %vm2173_vm15, %v4673_v15  ;;  %v4683_v52 = vadd.s32 %v1028_v57, %v1026_v25  ;;  %v1434_v57 = vshll.u32 %v1433_v53, 16  ;;  %v4708_v25 = vsub.f32 %v4251_v36, %v542_v29  ;;  %v4715_v22 = vsel %vm783_vm11, %v3681_v14, 128 }
 0x2ad   :  { %v1367_v16 = vshra.s32 %v4715_v22, 16  ;;  %v1448_v53 = vshll.u32 %v1447_v61, 16  ;;  %v1084_v29 = vshll.u32 %v1083_v18, 16  ;;  %vm6575_vm11 = vcmp.eq.s32.totalorder %v3681_v14, %v4673_v15 }
 0x2ae   :  { %2184 = vst.msk [vmem:[%s6484_s4 + $0x50] sm:$0xff] %vm2173_vm15, %v4683_v52  ;;  %1570 = vmin.xlane.f32.xlu1 %v1569_v41  ;;  %740 = vmin.xlane.f32.xlu2 %v4676_v7  ;;  %vm1782_vm4 = vcmp.eq.s32.totalorder %v3681_v14, %v4683_v52  ;;  %v4697_v8 = vpop.xlane.xlu1 %1580  ;;  %v4712_v41 = vcvt.s32.f32 %v1353_v37  ;;  %v1461_v61 = vcvt.f32.s32 %v4275_v20  ;;  %v1490_v18 = vshll.u32 %v1489_v48, 16 }
 0x2af   :  { %2832 = vmatmul.msk.f32.gmra.mxu1 %vm1782_vm4, %v6683_v24 }
 0x2b1   :  { %v4704_v34 = vpop.xlane.xlu2 %692  ;;  %v1431_v10 = vpop.xlane.xlu0 %1430 }
 0x2b2   :  { %v1432_v33 = vcvt.f32.s32 %v1431_v10 }
 0x2b4   :  { %v4710_v39 = vadd.s32 %v1434_v57, %v1432_v33  ;;  %v4741_v57 = vcvt.s32.f32 %v1367_v16 }
 0x2b6   :  { %6745 = vst [vmem:[#allocation10_spill] sm:$0xff] %v4710_v39  ;;  %742 = vmin.xlane.f32.xlu1 %v4708_v25  ;;  %1356 = vmin.xlane.f32.xlu2 %v4712_v41  ;;  %vm6561_vm2 = vcmp.eq.s32.totalorder %v3681_v14, %v4710_v39  ;;  %v4739_v0 = vpop.xlane.xlu1 %1594 }
 0x2b7   :  { %2213 = vst.msk [vmem:[%s6484_s4 + $0x138] sm:$0xff] %vm2173_vm15, %v4710_v39  ;;  %2833 = vmatmul.msk.f32.gmra.mxu1 %vm6598_vm14, %v6683_v24  ;;  %2861 = vmatmul.msk.f32.gmra.mxu3 %vm6561_vm2, %v6683_v24  ;;  %v1475_v39 = vcvt.f32.s32 %v4321_v45 }
 0x2b8   :  { %6746 = vst [vmem:[#allocation17_spill] sm:$0xff] %v4741_v57 }
 0x2b9   :  { %v1081_v36 = vpop.xlane.xlu2 %1080  ;;  %v1445_v62 = vpop.xlane.xlu0 %1444  ;;  %v1476_v20 = vshll.u32 %v1475_v39, 16  ;;  %v1069_v39 = vcvt.f32.s32 %v4295_v43 }
 0x2ba   :  { %v1082_v37 = vcvt.f32.s32 %v1081_v36  ;;  %v1446_v10 = vcvt.f32.s32 %v1445_v62 }
 0x2bc   :  { %v4743_v28 = vadd.s32 %v1084_v29, %v1082_v37  ;;  %v4745_v33 = vadd.s32 %v1448_v53, %v1446_v10  ;;  %v1462_v53 = vshll.u32 %v1461_v61, 16 }
 0x2be   :  { %6747 = vst [vmem:[#allocation37_spill] sm:$0xff] %v4745_v33  ;;  %1370 = vmin.xlane.f32.xlu1 %v4741_v57  ;;  %vm6565_vm2 = vcmp.eq.s32.totalorder %v3681_v14, %v4745_v33  ;;  %v1097_v57 = vcvt.f32.s32 %v4273_v31 }
 0x2bf   :  { %2188 = vst.msk [vmem:[%s6484_s4 + $0x70] sm:$0xff] %vm2173_vm15, %v4743_v28  ;;  %2834 = vmatmul.msk.f32.gmra.mxu1 %vm6575_vm11, %v6683_v24  ;;  %2862 = vmatmul.msk.f32.gmra.mxu3 %vm6565_vm2, %v6683_v24 }
 0x2c0   :  { %2214 = vst.msk [vmem:[%s6484_s4 + $0x140] sm:$0xff] %vm2173_vm15, %v4745_v33  ;;  %v1503_v33 = vcvt.f32.s32 %v4284_v12  ;;  %v1098_v43 = vshll.u32 %v1097_v57, 16 }
 0x2c1   :  { %v1473_v59 = vpop.xlane.xlu1 %1472  ;;  %v1487_v45 = vpop.xlane.xlu2 %1486 }
 0x2c2   :  { %v1474_v16 = vcvt.f32.s32 %v1473_v59  ;;  %v1488_v36 = vcvt.f32.s32 %v1487_v45  ;;  %v1459_v62 = vpop.xlane.xlu0 %1458  ;;  %v1504_v61 = vshll.u32 %v1503_v33, 16 }
 0x2c3   :  { %v1460_v29 = vcvt.f32.s32 %v1459_v62 }
 0x2c4   :  { %v4773_v37 = vadd.s32 %v1476_v20, %v1474_v16  ;;  %v4775_v10 = vadd.s32 %v1490_v18, %v1488_v36  ;;  %v1070_v20 = vshll.u32 %v1069_v39, 16 }
 0x2c5   :  { %v4777_v15 = vadd.s32 %v1462_v53, %v1460_v29  ;;  %v4786_v48 = vpop.f32.mrf.mxu1  ;;  %v1517_v29 = vcvt.f32.s32 %v4300_v5 }
 0x2c6   :  { %6748 = vst [vmem:[#allocation20_spill] sm:$0xff] %v4773_v37  ;;  %vm6570_vm12 = vcmp.eq.s32.totalorder %v3681_v14, %v4773_v37 }
 0x2c7   :  { %6749 = vst [vmem:[#allocation25_spill] sm:$0xff] %v4775_v10  ;;  %vm6567_vm2 = vcmp.eq.s32.totalorder %v3681_v14, %v4777_v15  ;;  %v1518_v57 = vshll.u32 %v1517_v29, 16 }
 0x2c8   :  { %6750 = vst [vmem:[#allocation14_spill] sm:$0xff] %v4777_v15  ;;  %2863 = vmatmul.msk.f32.gmra.mxu3 %vm6567_vm2, %v6683_v24 }
 0x2c9   :  { %2216 = vst.msk [vmem:[%s6484_s4 + $0x150] sm:$0xff] %vm2173_vm15, %v4773_v37  ;;  %v1501_v31 = vpop.xlane.xlu2 %1500  ;;  %v1095_v12 = vpop.xlane.xlu1 %1094 }
 0x2ca   :  { %6751 = vst [vmem:[#allocation51_spill] sm:$0xff] %v4786_v48  ;;  %v1502_v59 = vcvt.f32.s32 %v1501_v31  ;;  %v1096_v45 = vcvt.f32.s32 %v1095_v12  ;;  %v1067_v18 = vpop.xlane.xlu0 %1066 }
 0x2cb   :  { %2217 = vst.msk [vmem:[%s6484_s4 + $0x158] sm:$0xff] %vm2173_vm15, %v4775_v10  ;;  %v1068_v16 = vcvt.f32.s32 %v1067_v18  ;;  %v1282_v18 = vand.u32 65535, %v4381_v51 }
 0x2cc   :  { %2215 = vst.msk [vmem:[%s6484_s4 + $0x148] sm:$0xff] %vm2173_vm15, %v4777_v15  ;;  %v4810_v36 = vadd.s32 %v1504_v61, %v1502_v59  ;;  %v4812_v62 = vadd.s32 %v1098_v43, %v1096_v45  ;;  %v1111_v15 = vcvt.f32.s32 %v4348_v60 }
 0x2cd   :  { %2240 = vst.msk [vmem:[%s6483_s3 + $0x10] sm:$0xff] %vm101_vm0, %v4786_v48  ;;  %v4814_v53 = vadd.s32 %v1070_v20, %v1068_v16  ;;  %v1125_v20 = vcvt.f32.s32 %v4323_v50  ;;  %v6755_v16 = vld [vmem:[#allocation58_spill] sm:$0xff]  ;;  %v1573_v48 = vcvt.f32.s32 %v4458_v42 }
 0x2ce   :  { %6752 = vst [vmem:[#allocation52_spill] sm:$0xff] %v4810_v36  ;;  %v1112_v33 = vshll.u32 %v1111_v15, 16  ;;  %v1576_v29 = vand.u32 65535, %v6755_v16 }
 0x2cf   :  { %2218 = vst.msk [vmem:[%s6484_s4 + $0x160] sm:$0xff] %vm2173_vm15, %v4810_v36  ;;  %vm6574_vm2 = vcmp.eq.s32.totalorder %v3681_v14, %v4814_v53 }
 0x2d0   :  { %2189 = vst.msk [vmem:[%s6484_s4 + $0x78] sm:$0xff] %vm2173_vm15, %v4812_v62  ;;  %2835 = vmatmul.msk.f32.gmra.mxu1 %vm6574_vm2, %v6683_v24  ;;  %2864 = vmatmul.msk.f32.gmra.mxu3 %vm6570_vm12, %v6683_v24  ;;  %vm6572_vm12 = vcmp.eq.s32.totalorder %v3681_v14, %v4775_v10  ;;  %v1545_v10 = vcvt.f32.s32 %v4388_v58  ;;  %vm6577_vm2 = vcmp.eq.s32.totalorder %v3681_v14, %v4810_v36 }
 0x2d1   :  { %2187 = vst.msk [vmem:[%s6484_s4 + $0x68] sm:$0xff] %vm2173_vm15, %v4814_v53  ;;  %v1515_v5 = vpop.xlane.xlu2 %1514  ;;  %v1109_v60 = vpop.xlane.xlu1 %1108 }
 0x2d2   :  { %v1516_v39 = vcvt.f32.s32 %v1515_v5  ;;  %v1110_v31 = vcvt.f32.s32 %v1109_v60  ;;  %v731_v12 = vpop.xlane.xlu0 %730  ;;  %v1126_v5 = vshll.u32 %v1125_v20, 16  ;;  %v1546_v16 = vshll.u32 %v1545_v10, 16 }
 0x2d3   :  { %vm803_vm10 = vcmp.eq.f32.partialorder %v4375_v4, %v731_v12  ;;  %v6756_v12 = vld [vmem:[#allocation27_spill] sm:$0xff] }
 0x2d4   :  { %v4846_v43 = vadd.s32 %v1518_v57, %v1516_v39  ;;  %v4848_v61 = vadd.s32 %v1112_v33, %v1110_v31  ;;  %v4851_v59 = vsel %vm803_vm10, %v3681_v14, 128  ;;  %vm6571_vm10 = vcmp.eq.s32.totalorder %v3681_v14, %v4743_v28 }
 0x2d5   :  { %v1647_v45 = vshra.s32 %v4851_v59, 16  ;;  %v4861_v4 = vpop.f32.mrf.mxu1  ;;  %v1284_v33 = vcvt.s32.f32 %v1282_v18 }
 0x2d6   :  { %6753 = vst [vmem:[#allocation23_spill] sm:$0xff] %v4846_v43 }
 0x2d7   :  { %2219 = vst.msk [vmem:[%s6484_s4 + $0x168] sm:$0xff] %vm2173_vm15, %v4846_v43  ;;  %v4868_v15 = vcvt.s32.f32 %v1647_v45  ;;  %v1139_v45 = vcvt.f32.s32 %v4350_v30 }
 0x2d8   :  { %6754 = vst [vmem:[#allocation11_spill] sm:$0xff] %v4861_v4  ;;  %2836 = vmatmul.msk.f32.gmra.mxu1 %vm6571_vm10, %v6683_v24  ;;  %2865 = vmatmul.msk.f32.gmra.mxu3 %vm6572_vm12, %v6683_v24  ;;  %vm1582_vm12 = vcmp.eq.f32.partialorder %v6756_v12, %v4697_v8 }
 0x2d9   :  { %2190 = vst.msk [vmem:[%s6484_s4 + $0x80] sm:$0xff] %vm2173_vm15, %v4848_v61  ;;  %1650 = vmin.xlane.f32.xlu0 %v4868_v15  ;;  %v4888_v50 = vpop.xlane.xlu1 %1608  ;;  %v1123_v51 = vpop.xlane.xlu2 %1122 }
 0x2da   :  { %2241 = vst.msk [vmem:[%s6483_s3 + $0x18] sm:$0xff] %vm101_vm0, %v4861_v4  ;;  %v1124_v60 = vcvt.f32.s32 %v1123_v51  ;;  %v4891_v57 = vpop.xlane.xlu0 %1286  ;;  %v1140_v51 = vshll.u32 %v1139_v45, 16 }
 0x2db   :  { %vm1288_vm10 = vcmp.eq.f32.partialorder %v4412_v11, %v4891_v57  ;;  %v1578_v11 = vcvt.s32.f32 %v1576_v29 }
 0x2dc   :  { %v4895_v39 = vadd.s32 %v1126_v5, %v1124_v60  ;;  %v1289_v31 = vsel %vm1288_vm10, %v1284_v33, inf  ;;  %vm6585_vm10 = vcmp.eq.s32.totalorder %v3681_v14, %v4812_v62 }
 0x2dd   :  { %1290 = vmin.xlane.f32.xlu2 %v1289_v31  ;;  %v4906_v18 = vpop.f32.mrf.mxu1  ;;  %v1583_v30 = vsel %vm1582_vm12, %v1578_v11, inf  ;;  %v1296_v11 = vand.u32 65535, %v4455_v6  ;;  %vm6579_vm12 = vcmp.eq.s32.totalorder %v3681_v14, %v4848_v61 }
 0x2de   :  { %2191 = vst.msk [vmem:[%s6484_s4 + $0x88] sm:$0xff] %vm2173_vm15, %v4895_v39 }
 0x2df   :  { %6757 = vst [vmem:[#allocation18_spill] sm:$0xff] %v4906_v18 }
 0x2e0   :  { %2242 = vst.msk [vmem:[%s6483_s3 + $0x20] sm:$0xff] %vm101_vm0, %v4906_v18  ;;  %2837 = vmatmul.msk.f32.gmra.mxu1 %vm6585_vm10, %v6683_v24  ;;  %2866 = vmatmul.msk.f32.gmra.mxu3 %vm6577_vm2, %v6683_v24  ;;  %v6770_v18 = vld [vmem:[#allocation8_spill] sm:$0xff] }
 0x2e1   :  { %1584 = vmin.xlane.f32.xlu0 %v1583_v30  ;;  %v1543_v58 = vpop.xlane.xlu1 %1542  ;;  %v1137_v20 = vpop.xlane.xlu2 %1136  ;;  %v1153_v30 = vcvt.f32.s32 %v4386_v21  ;;  %v1310_v4 = vand.u32 65535, %v6770_v18 }
 0x2e2   :  { %v1544_v29 = vcvt.f32.s32 %v1543_v58  ;;  %v1138_v5 = vcvt.f32.s32 %v1137_v20  ;;  %v733_v60 = vpop.xlane.xlu0 %732 }
 0x2e3   :  { %vm804_vm11 = vcmp.eq.f32.partialorder %v4431_v55, %v733_v60  ;;  %v4941_v55 = vpop.f32.mrf.mxu3  ;;  %v1154_v58 = vshll.u32 %v1153_v30, 16  ;;  %v6761_v60 = vld [vmem:[#allocation15_spill] sm:$0xff] }
 0x2e4   :  { %v4926_v33 = vadd.s32 %v1546_v16, %v1544_v29  ;;  %v4928_v31 = vadd.s32 %v1140_v51, %v1138_v5  ;;  %v4931_v12 = vsel %vm804_vm11, %v3681_v14, 128  ;;  %vm6578_vm11 = vcmp.eq.s32.totalorder %v3681_v14, %v4846_v43 }
 0x2e5   :  { %v1661_v36 = vshra.s32 %v4931_v12, 16  ;;  %v1298_v29 = vcvt.s32.f32 %v1296_v11  ;;  %v1167_v11 = vcvt.f32.s32 %v4433_v38 }
 0x2e6   :  { %6758 = vst [vmem:[#allocation53_spill] sm:$0xff] %v4926_v33 }
 0x2e7   :  { %2221 = vst.msk [vmem:[%s6484_s4 + $0x178] sm:$0xff] %vm2173_vm15, %v4926_v33  ;;  %v4948_v10 = vcvt.s32.f32 %v1661_v36  ;;  %v6759_v36 = vld [vmem:[#allocation26_spill] sm:$0xff] }
 0x2e8   :  { %2192 = vst.msk [vmem:[%s6484_s4 + $0x90] sm:$0xff] %vm2173_vm15, %v4928_v31  ;;  %2838 = vmatmul.msk.f32.gmra.mxu1 %vm6579_vm12, %v6683_v24  ;;  %2867 = vmatmul.msk.f32.gmra.mxu3 %vm6578_vm11, %v6683_v24  ;;  %v1590_v45 = vand.u32 65535, %v6759_v36  ;;  %vm1596_vm11 = vcmp.eq.f32.partialorder %v6761_v60, %v4739_v0  ;;  %vm6584_vm12 = vcmp.eq.s32.totalorder %v3681_v14, %v4895_v39 }
 0x2e9   :  { %1248 = vmin.xlane.f32.xlu0 %v4642_v54  ;;  %1664 = vmin.xlane.f32.xlu2 %v4948_v10  ;;  %v4964_v21 = vpop.xlane.xlu1 %1622  ;;  %v1151_v6 = vpop.xlane.xlu2 %1150 }
 0x2ea   :  { %v1152_v20 = vcvt.f32.s32 %v1151_v6  ;;  %v4967_v51 = vpop.xlane.xlu0 %1300  ;;  %v4969_v16 = vpop.f32.mrf.mxu1  ;;  %v1592_v30 = vcvt.s32.f32 %v1590_v45  ;;  %v1559_v6 = vcvt.f32.s32 %v4406_v49 }
 0x2eb   :  { %6760 = vst [vmem:[#allocation19_spill] sm:$0xff] %v4969_v16  ;;  %vm1302_vm2 = vcmp.eq.f32.partialorder %v4476_v2, %v4967_v51  ;;  %v548_v36 = vpop.f32.mrf.mxu3 }
 0x2ec   :  { %2243 = vst.msk [vmem:[%s6483_s3 + $0x28] sm:$0xff] %vm101_vm0, %v4969_v16  ;;  %v4978_v54 = vadd.s32 %v1154_v58, %v1152_v20  ;;  %v1303_v5 = vsel %vm1302_vm2, %v1298_v29, inf  ;;  %v1597_v2 = vsel %vm1596_vm11, %v1592_v30, inf  ;;  %v1560_v45 = vshll.u32 %v1559_v6, 16 }
 0x2ed   :  { %1304 = vmin.xlane.f32.xlu1 %v1303_v5  ;;  %v1168_v58 = vshll.u32 %v1167_v11, 16  ;;  %vm6583_vm11 = vcmp.eq.s32.totalorder %v3681_v14, %v4928_v31 }
 0x2ee   :  { %2193 = vst.msk [vmem:[%s6484_s4 + $0x98] sm:$0xff] %vm2173_vm15, %v4978_v54 }
 0x2f0   :  { %2839 = vmatmul.msk.f32.gmra.mxu1 %vm6584_vm12, %v6683_v24  ;;  %vm6597_vm12 = vcmp.eq.s32.totalorder %v3681_v14, %v4978_v54 }
 0x2f1   :  { %1262 = vmin.xlane.f32.xlu0 %v4648_v46  ;;  %1598 = vmin.xlane.f32.xlu2 %v1597_v2  ;;  %v1557_v49 = vpop.xlane.xlu1 %1556  ;;  %v1165_v38 = vpop.xlane.xlu2 %1164  ;;  %v2958_v2 = vld [vmem:[%s6482_s2] ss:$0 sm:$0xff]  ;;  %s2647_s2 = sshll.u32 %s3077_s7, 4  ;;  %s2648_s2 = int_to_ptr.vmem [resolvable:$true] %s2647_s2 }
 0x2f2   :  { %v1558_v20 = vcvt.f32.s32 %v1557_v49  ;;  %v1166_v29 = vcvt.f32.s32 %v1165_v38  ;;  %v735_v5 = vpop.xlane.xlu0 %734  ;;  %v4996_v60 = vpop.f32.mrf.mxu1  ;;  %v1268_v49 = vand.u32 65535, %v4514_v47  ;;  %v1531_v38 = vcvt.f32.s32 %v4330_v40 }
 0x2f3   :  { %6762 = vst [vmem:[#allocation55_spill] sm:$0xff] %v4996_v60  ;;  %vm805_vm2 = vcmp.eq.f32.partialorder %v4507_v3, %v735_v5  ;;  %v5015_v3 = vsub.f32 %v2958_v2, %v548_v36  ;;  %v1604_v36 = vand.u32 65535, %v4378_v19 }
 0x2f4   :  { %2244 = vst.msk [vmem:[%s6483_s3 + $0x30] sm:$0xff] %vm101_vm0, %v4996_v60  ;;  %v5004_v30 = vadd.s32 %v1560_v45, %v1558_v20  ;;  %v5006_v46 = vadd.s32 %v1168_v58, %v1166_v29  ;;  %v5009_v6 = vsel %vm805_vm2, %v3681_v14, 128  ;;  %v1270_v58 = vcvt.s32.f32 %v1268_v49  ;;  %v6766_v60 = vld [vmem:[#allocation41_spill] sm:$0xff] }
 0x2f5   :  { %v1675_v11 = vshra.s32 %v5009_v6, 16  ;;  %v1532_v20 = vshll.u32 %v1531_v38, 16  ;;  %v1606_v19 = vcvt.s32.f32 %v1604_v36  ;;  %v1195_v49 = vcvt.f32.s32 %v4484_v27 }
 0x2f6   :  { %6763 = vst [vmem:[#allocation57_spill] sm:$0xff] %v5004_v30  ;;  %v1618_v36 = vand.u32 65535, %v4443_v13 }
 0x2f7   :  { %2222 = vst.msk [vmem:[%s6484_s4 + $0x180] sm:$0xff] %vm2173_vm15, %v5004_v30  ;;  %v5029_v45 = vcvt.s32.f32 %v1675_v11 }
 0x2f8   :  { %2194 = vst.msk [vmem:[%s6484_s4 + $0xa0] sm:$0xff] %vm2173_vm15, %v5006_v46  ;;  %2840 = vmatmul.msk.f32.gmra.mxu1 %vm6583_vm11, %v6683_v24  ;;  %vm1610_vm11 = vcmp.eq.f32.partialorder %v6766_v60, %v4888_v50  ;;  %v5085_v60 = vsub.f32 %v2958_v2, %v4941_v55  ;;  %v887_v2 = vcvt.f32.s32 %v6713_v17  ;;  %v1620_v13 = vcvt.s32.f32 %v1618_v36 }
 0x2f9   :  { %746 = vmin.xlane.f32.xlu2 %v5015_v3  ;;  %1678 = vmin.xlane.f32.xlu1 %v5029_v45  ;;  %v5039_v40 = vpop.xlane.xlu1 %1636  ;;  %v1529_v47 = vpop.xlane.xlu2 %1528  ;;  %v1611_v27 = vsel %vm1610_vm11, %v1606_v19, inf  ;;  %vm1624_vm11 = vcmp.eq.f32.partialorder %v4470_v23, %v4964_v21  ;;  %v1181_v23 = vcvt.f32.s32 %v4466_v63 }
 0x2fa   :  { %v1530_v29 = vcvt.f32.s32 %v1529_v47  ;;  %v5042_v5 = vpop.xlane.xlu0 %1272  ;;  %v1625_v63 = vsel %vm1624_vm11, %v1620_v13, inf }
 0x2fb   :  { %vm1274_vm2 = vcmp.eq.f32.partialorder %v4546_v1, %v5042_v5  ;;  %v5048_v43 = vpop.f32.mrf.mxu3 }
 0x2fc   :  { %v5046_v11 = vadd.s32 %v1532_v20, %v1530_v29  ;;  %6765 = vst [vmem:[#allocation59_spill] sm:$0xff] %v5048_v43  ;;  %v1275_v37 = vsel %vm1274_vm2, %v1270_v58, inf  ;;  %v1196_v58 = vshll.u32 %v1195_v49, 16 }
 0x2fd   :  { %2275 = vst.msk [vmem:[%s6483_s3 + $0x128] sm:$0xff] %vm101_vm0, %v5048_v43  ;;  %1276 = vmin.xlane.f32.xlu0 %v1275_v37  ;;  %v5063_v1 = vpop.f32.mrf.mxu1  ;;  %v6768_v37 = vld [vmem:[#allocation29_spill] sm:$0xff] }
 0x2fe   :  { %6764 = vst [vmem:[#allocation56_spill] sm:$0xff] %v5046_v11  ;;  %vm6586_vm2 = vcmp.eq.s32.totalorder %v3681_v14, %v5046_v11  ;;  %vm784_vm10 = vcmp.eq.f32.partialorder %v6768_v37, %v4704_v34 }
 0x2ff   :  { %2220 = vst.msk [vmem:[%s6484_s4 + $0x170] sm:$0xff] %vm2173_vm15, %v5046_v11  ;;  %2868 = vmatmul.msk.f32.gmra.mxu3 %vm6586_vm2, %v6683_v24  ;;  %v5095_v19 = vsel %vm784_vm10, %v3681_v14, 128  ;;  %vm6595_vm10 = vcmp.eq.s32.totalorder %v3681_v14, %v4926_v33  ;;  %v1182_v33 = vshll.u32 %v1181_v23, 16 }
 0x300   :  { %6767 = vst [vmem:[#allocation49_spill] sm:$0xff] %v5063_v1  ;;  %2841 = vmatmul.msk.f32.gmra.mxu1 %vm6597_vm12, %v6683_v24  ;;  %v1381_v17 = vshra.s32 %v5095_v19, 16 }
 0x301   :  { %2245 = vst.msk [vmem:[%s6483_s3 + $0x38] sm:$0xff] %vm101_vm0, %v5063_v1  ;;  %1612 = vmin.xlane.f32.xlu1 %v1611_v27  ;;  %v1193_v38 = vpop.xlane.xlu1 %1192  ;;  %v737_v47 = vpop.xlane.xlu2 %736 }
 0x302   :  { %v1194_v20 = vcvt.f32.s32 %v1193_v38  ;;  %vm806_vm2 = vcmp.eq.f32.partialorder %v4564_v9, %v737_v47  ;;  %v5089_v29 = vpop.xlane.xlu0 %1314  ;;  %v1209_v9 = vcvt.f32.s32 %v4554_v44  ;;  %v888_v44 = vshll.u32 %v887_v2, 16  ;;  %v6771_v2 = vld [vmem:[#allocation16_spill] sm:$0xff] }
 0x303   :  { %v5092_v43 = vsel %vm806_vm2, %v3681_v14, 128  ;;  %vm6596_vm2 = vcmp.eq.s32.totalorder %v3681_v14, %v5006_v46  ;;  %v1632_v47 = vand.u32 65535, %v4511_v26  ;;  %v5135_v11 = vcvt.s32.f32 %v1381_v17 }
 0x304   :  { %v5097_v34 = vadd.s32 %v1196_v58, %v1194_v20  ;;  %v1689_v55 = vshra.s32 %v5092_v43, 16  ;;  %v1210_v36 = vshll.u32 %v1209_v9, 16  ;;  %vm1638_vm11 = vcmp.eq.f32.partialorder %v6771_v2, %v5039_v40  ;;  %v6772_v9 = vld [vmem:[#allocation45_spill] sm:$0xff] }
 0x305   :  { %744 = vmin.xlane.f32.xlu0 %v5085_v60  ;;  %v5112_v27 = vpop.f32.mrf.mxu1  ;;  %v1634_v26 = vcvt.s32.f32 %v1632_v47 }
 0x306   :  { %2196 = vst.msk [vmem:[%s6484_s4 + $0xb0] sm:$0xff] %vm2173_vm15, %v5097_v34  ;;  %v5110_v49 = vcvt.s32.f32 %v1689_v55 }
 0x307   :  { %6769 = vst [vmem:[#allocation24_spill] sm:$0xff] %v5112_v27  ;;  %2869 = vmatmul.msk.f32.gmra.mxu3 %vm6595_vm10, %v6683_v24  ;;  %v1639_v18 = vsel %vm1638_vm11, %v1634_v26, inf  ;;  %v6776_v26 = vld [vmem:[#allocation21_spill] sm:$0xff] }
 0x308   :  { %2246 = vst.msk [vmem:[%s6483_s3 + $0x40] sm:$0xff] %vm101_vm0, %v5112_v27  ;;  %2842 = vmatmul.msk.f32.gmra.mxu1 %vm6596_vm2, %v6683_v24  ;;  %1692 = vmin.xlane.f32.xlu2 %v5110_v49  ;;  %vm6599_vm2 = vcmp.eq.s32.totalorder %v3681_v14, %v5004_v30  ;;  %v6779_v30 = vld [vmem:[#allocation28_spill] sm:$0xff] }
 0x309   :  { %1626 = vmin.xlane.f32.xlu1 %v1625_v63  ;;  %v1207_v37 = vpop.xlane.xlu1 %1206  ;;  %v885_v38 = vpop.xlane.xlu2 %884  ;;  %v1223_v63 = vcvt.f32.s32 %v6772_v9  ;;  %v1324_v9 = vand.u32 65535, %v6776_v26 }
 0x30a   :  { %v1208_v58 = vcvt.f32.s32 %v1207_v37  ;;  %v886_v20 = vcvt.f32.s32 %v885_v38  ;;  %v1179_v55 = vpop.xlane.xlu0 %1178  ;;  %v6774_v37 = vld [vmem:[#allocation9_spill] sm:$0xff]  ;;  %v1312_v38 = vcvt.s32.f32 %v1310_v4  ;;  %v6777_v4 = vld [vmem:[#allocation36_spill] sm:$0xff] }
 0x30b   :  { %v1180_v27 = vcvt.f32.s32 %v1179_v55  ;;  %v1224_v17 = vshll.u32 %v1223_v63, 16  ;;  %v901_v63 = vcvt.f32.s32 %v6777_v4 }
 0x30c   :  { %v5137_v1 = vadd.s32 %v1210_v36, %v1208_v58  ;;  %v889_v16 = vadd.s32 %v888_v44, %v886_v20 }
 0x30d   :  { %v5142_v13 = vadd.s32 %v1182_v33, %v1180_v27  ;;  %1384 = vmin.xlane.f32.xlu0 %v5135_v11  ;;  %v6773_v33 = vld [vmem:[#allocation42_spill] sm:$0xff] }
 0x30e   :  { %2197 = vst.msk [vmem:[%s6484_s4 + $0xb8] sm:$0xff] %vm2173_vm15, %v5137_v1  ;;  %vm1772_vm10 = vcmp.eq.s32.totalorder %v3681_v14, %v889_v16  ;;  %vm1316_vm14 = vcmp.eq.f32.partialorder %v6773_v33, %v5089_v29 }
 0x30f   :  { %2174 = vst.msk [vmem:[%s6484_s4] sm:$0xff] %vm2173_vm15, %v889_v16  ;;  %2822 = vmatmul.msk.f32.vlgmr.msrb.gmra.mxu0 %vm1772_vm10, %v6683_v24  ;;  %vm1793_vm12 = vcmp.eq.s32.totalorder %v3681_v14, %v5142_v13  ;;  %2870 = vmatmul.msk.f32.gmra.mxu3 %vm6599_vm2, %v6683_v24  ;;  %v1317_v2 = vsel %vm1316_vm14, %v1312_v38, inf  ;;  %vm1794_vm14 = vcmp.eq.s32.totalorder %v3681_v14, %v5097_v34  ;;  %v1293_v34 = vcvt.f32.s32 %v4891_v57 }
 0x310   :  { %2195 = vst.msk [vmem:[%s6484_s4 + $0xa8] sm:$0xff] %vm2173_vm15, %v5142_v13  ;;  %2843 = vmatmul.msk.f32.gmra.mxu1 %vm1793_vm12, %v6683_v24 }
 0x311   :  { %1640 = vmin.xlane.f32.xlu1 %v1639_v18  ;;  %v1221_v27 = vpop.xlane.xlu1 %1220  ;;  %v739_v23 = vpop.xlane.xlu2 %738  ;;  %v1237_v18 = vcvt.f32.s32 %v4600_v56  ;;  %v6778_v56 = vld [vmem:[#allocation47_spill] sm:$0xff] }
 0x312   :  { %v1222_v44 = vcvt.f32.s32 %v1221_v27  ;;  %vm807_vm2 = vcmp.eq.f32.partialorder %v6774_v37, %v739_v23  ;;  %v5185_v20 = vpop.xlane.xlu0 %1328 }
 0x313   :  { %v5180_v47 = vsel %vm807_vm2, %v3681_v14, 128  ;;  %vm1330_vm2 = vcmp.eq.f32.partialorder %v6778_v56, %v5185_v20  ;;  %v1238_v37 = vshll.u32 %v1237_v18, 16 }
 0x314   :  { %v5182_v36 = vadd.s32 %v1224_v17, %v1222_v44  ;;  %v1703_v58 = vshra.s32 %v5180_v47, 16  ;;  %v5187_v55 = vpop.f32.mrf.mxu1  ;;  %v1326_v17 = vcvt.s32.f32 %v1324_v9  ;;  %v902_v44 = vshll.u32 %v901_v63, 16 }
 0x315   :  { %6775 = vst [vmem:[#allocation12_spill] sm:$0xff] %v5187_v55  ;;  %1318 = vmin.xlane.f32.xlu0 %v1317_v2  ;;  %v6603_v63 = vmov 0.0  }
 0x316   :  { %2247 = vst.msk [vmem:[%s6483_s3 + $0x48] sm:$0xff] %vm101_vm0, %v5187_v55  ;;  %v5202_v33 = vcvt.s32.f32 %v1703_v58  ;;  %v1331_v4 = vsel %vm1330_vm2, %v1326_v17, inf  ;;  %v1338_v55 = vand.u32 65535, %v6779_v30  ;;  %v2758_v18 = vsel %vm1772_vm10, 1.0, %v6603_v63 }
 0x317   :  { %2198 = vst.msk [vmem:[%s6484_s4 + $0xc0] sm:$0xff] %vm2173_vm15, %v5182_v36  ;;  %vm1795_vm2 = vcmp.eq.s32.totalorder %v3681_v14, %v5137_v1  ;;  %v2760_v56 = vsel %vm1774_vm1, 1.0, %v6603_v63 }
 0x318   :  { %2844 = vmatmul.msk.f32.gmra.mxu1 %vm1794_vm14, %v6683_v24  ;;  %1706 = vmin.xlane.f32.xlu2 %v5202_v33  ;;  %v1340_v17 = vcvt.s32.f32 %v1338_v55 }
 0x319   :  { %v1235_v27 = vpop.xlane.xlu1 %1234  ;;  %v899_v23 = vpop.xlane.xlu2 %898 }
 0x31a   :  { %v1236_v38 = vcvt.f32.s32 %v1235_v27  ;;  %v900_v58 = vcvt.f32.s32 %v899_v23  ;;  %v5222_v9 = vpop.xlane.xlu0 %1342 }
 0x31b   :  { %vm1344_vm10 = vcmp.eq.f32.partialorder %v4654_v32, %v5222_v9 }
 0x31c   :  { %v5213_v2 = vadd.s32 %v1238_v37, %v1236_v38  ;;  %v903_v26 = vadd.s32 %v902_v44, %v900_v58  ;;  %v1574_v44 = vshll.u32 %v1573_v48, 16  ;;  %v1345_v16 = vsel %vm1344_vm10, %v1340_v17, inf }
 0x31d   :  { %1332 = vmin.xlane.f32.xlu0 %v1331_v4  ;;  %v1352_v48 = vand.u32 65535, %v4686_v35  ;;  %v2766_v35 = vsel %vm1780_vm7, 1.0, %v6603_v63  ;;  %vm6794_vm10 = vcmp.eq.s32.totalorder %v3681_v14, %v4743_v28 }
 0x31e   :  { %2199 = vst.msk [vmem:[%s6484_s4 + $0xc8] sm:$0xff] %vm2173_vm15, %v5213_v2  ;;  %vm1773_vm11 = vcmp.eq.s32.totalorder %v3681_v14, %v903_v26 }
 0x31f   :  { %2175 = vst.msk [vmem:[%s6484_s4 + $0x8] sm:$0xff] %vm2173_vm15, %v903_v26  ;;  %v2759_v42 = vsel %vm1773_vm11, 1.0, %v6603_v63  ;;  %2823 = vmatmul.msk.f32.gmra.mxu0 %vm1773_vm11, %v6683_v24  ;;  %v2761_v26 = vsel %vm1775_vm8, 1.0, %v6603_v63  ;;  %vm1796_vm8 = vcmp.eq.s32.totalorder %v3681_v14, %v5182_v36  ;;  %v1354_v58 = vcvt.s32.f32 %v1352_v48 }
 0x320   :  { %v2566_v30 = vadd.f32 %v2759_v42, %v2758_v18  ;;  %2845 = vmatmul.msk.f32.gmra.mxu1 %vm1795_vm2, %v6683_v24  ;;  %v2782_v1 = vsel %vm1796_vm8, 1.0, %v6603_v63 }
 0x321   :  { %v1571_v27 = vpop.xlane.xlu1 %1570  ;;  %v741_v23 = vpop.xlane.xlu2 %740 }
 0x322   :  { %v2567_v37 = vadd.f32 %v2760_v56, %v2566_v30  ;;  %v1572_v38 = vcvt.f32.s32 %v1571_v27  ;;  %vm808_vm11 = vcmp.eq.f32.partialorder %v4676_v7, %v741_v23  ;;  %v2762_v7 = vsel %vm1776_vm13, 1.0, %v6603_v63 }
 0x323   :  { %v5252_v4 = vsel %vm808_vm11, %v3681_v14, 128  ;;  %v2763_v27 = vsel %vm1777_vm6, 1.0, %v6603_v63  ;;  %vm6795_vm11 = vcmp.eq.s32.totalorder %v3681_v14, %v4812_v62 }
 0x324   :  { %v2568_v18 = vadd.f32 %v2761_v26, %v2567_v37  ;;  %v5254_v42 = vadd.s32 %v1574_v44, %v1572_v38  ;;  %v1717_v32 = vshra.s32 %v5252_v4, 16  ;;  %v2764_v44 = vsel %vm1778_vm9, 1.0, %v6603_v63 }
 0x325   :  { %1346 = vmin.xlane.f32.xlu0 %v1345_v16  ;;  %v2765_v16 = vsel %vm1779_vm3, 1.0, %v6603_v63  ;;  %vm1797_vm9 = vcmp.eq.s32.totalorder %v3681_v14, %v5213_v2 }
 0x326   :  { %v2569_v30 = vadd.f32 %v2762_v7, %v2568_v18  ;;  %2223 = vst.msk [vmem:[%s6484_s4 + $0x188] sm:$0xff] %vm2173_vm15, %v5254_v42  ;;  %v5267_v56 = vcvt.s32.f32 %v1717_v32  ;;  %vm1821_vm1 = vcmp.eq.s32.totalorder %v3681_v14, %v5254_v42  ;;  %v2783_v57 = vsel %vm1797_vm9, 1.0, %v6603_v63 }
 0x327   :  { %2871 = vmatmul.msk.f32.gmra.mxu3 %vm1821_vm1, %v6683_v24 }
 0x328   :  { %v2570_v23 = vadd.f32 %v2763_v27, %v2569_v30  ;;  %2846 = vmatmul.msk.f32.gmra.mxu1 %vm1796_vm8, %v6683_v24  ;;  %1720 = vmin.xlane.f32.xlu2 %v5267_v56  ;;  %v1366_v27 = vand.u32 65535, %v4715_v22 }
 0x329   :  { %v743_v37 = vpop.xlane.xlu1 %742  ;;  %v5290_v38 = vpop.xlane.xlu2 %1356 }
 0x32a   :  { %v2571_v26 = vadd.f32 %v2764_v44, %v2570_v23  ;;  %vm809_vm13 = vcmp.eq.f32.partialorder %v4708_v25, %v743_v37  ;;  %vm1358_vm6 = vcmp.eq.f32.partialorder %v4712_v41, %v5290_v38  ;;  %v5295_v18 = vpop.f32.mrf.mxu3  ;;  %v2767_v37 = vsel %vm1781_vm5, 1.0, %v6603_v63 }
 0x32b   :  { %v5302_v55 = vsel %vm809_vm13, %v3681_v14, 128  ;;  %2276 = vst.msk [vmem:[%s6483_s3 + $0x130] sm:$0xff] %vm101_vm0, %v5295_v18  ;;  %v1359_v25 = vsel %vm1358_vm6, %v1354_v58, inf  ;;  %v1368_v22 = vcvt.s32.f32 %v1366_v27  ;;  %v6791_v27 = vld [vmem:[#allocation22_spill] sm:$0xff]  ;;  %vm6796_vm13 = vcmp.eq.s32.totalorder %v3681_v14, %v4848_v61 }
 0x32c   :  { %v2572_v48 = vadd.f32 %v2765_v16, %v2571_v26  ;;  %v1731_v41 = vshra.s32 %v5302_v55, 16  ;;  %v5310_v7 = vpop.f32.mrf.mxu1  ;;  %v2768_v26 = vsel %vm1782_vm4, 1.0, %v6603_v63  ;;  %vm6792_vm5 = vcmp.eq.s32.totalorder %v3681_v14, %v6791_v27 }
 0x32d   :  { %2248 = vst.msk [vmem:[%s6483_s3 + $0x50] sm:$0xff] %vm101_vm0, %v5310_v7  ;;  %1360 = vmin.xlane.f32.xlu0 %v1359_v25  ;;  %v6788_v25 = vld [vmem:[#allocation17_spill] sm:$0xff]  ;;  %v2770_v52 = vsel %vm6792_vm5, 1.0, %v6603_v63  ;;  %vm6793_vm4 = vcmp.eq.s32.totalorder %v3681_v14, %v4814_v53  ;;  %v2774_v28 = vsel %vm6796_vm13, 1.0, %v6603_v63  ;;  %vm6797_vm6 = vcmp.eq.s32.totalorder %v3681_v14, %v4895_v39 }
 0x32e   :  { %v2573_v23 = vadd.f32 %v2766_v35, %v2572_v48  ;;  %v5322_v17 = vcvt.s32.f32 %v1731_v41  ;;  %v6789_v48 = vld [vmem:[#allocation48_spill] sm:$0xff]  ;;  %vm6800_vm5 = vcmp.eq.s32.totalorder %v3681_v14, %v5006_v46  ;;  %v2781_v46 = vsel %vm1795_vm2, 1.0, %v6603_v63 }
 0x32f   :  { %vm6790_vm7 = vcmp.eq.s32.totalorder %v3681_v14, %v6789_v48 }
 0x330   :  { %v2574_v58 = vadd.f32 %v2767_v37, %v2573_v23  ;;  %2847 = vmatmul.msk.f32.gmra.mxu1 %vm1797_vm9, %v6683_v24  ;;  %1734 = vmin.xlane.f32.xlu2 %v5322_v17  ;;  %v2769_v41 = vsel %vm6790_vm7, 1.0, %v6603_v63  ;;  %v2771_v37 = vsel %vm6793_vm4, 1.0, %v6603_v63  ;;  %vm6799_vm7 = vcmp.eq.s32.totalorder %v3681_v14, %v4978_v54 }
 0x331   :  { %v5339_v32 = vpop.xlane.xlu1 %1370  ;;  %v1646_v54 = vand.u32 65535, %v4851_v59 }
 0x332   :  { %v2575_v16 = vadd.f32 %v2768_v26, %v2574_v58  ;;  %vm1372_vm3 = vcmp.eq.f32.partialorder %v6788_v25, %v5339_v32  ;;  %v2773_v25 = vsel %vm6795_vm11, 1.0, %v6603_v63 }
 0x333   :  { %v1373_v30 = vsel %vm1372_vm3, %v1368_v22, inf  ;;  %v2772_v22 = vsel %vm6794_vm10, 1.0, %v6603_v63  ;;  %vm6798_vm3 = vcmp.eq.s32.totalorder %v3681_v14, %v4928_v31  ;;  %v2778_v31 = vsel %vm6800_vm5, 1.0, %v6603_v63 }
 0x334   :  { %v2576_v35 = vadd.f32 %v2769_v41, %v2575_v16  ;;  %v5347_v23 = vpop.f32.mrf.mxu1  ;;  %v2775_v41 = vsel %vm6797_vm6, 1.0, %v6603_v63 }
 0x335   :  { %2249 = vst.msk [vmem:[%s6483_s3 + $0x58] sm:$0xff] %vm101_vm0, %v5347_v23  ;;  %1374 = vmin.xlane.f32.xlu0 %v1373_v30 }
 0x336   :  { %v2577_v44 = vadd.f32 %v2770_v52, %v2576_v35  ;;  %v2776_v35 = vsel %vm6798_vm3, 1.0, %v6603_v63  ;;  %v2777_v52 = vsel %vm6799_vm7, 1.0, %v6603_v63 }
 0x338   :  { %v2578_v58 = vadd.f32 %v2771_v37, %v2577_v44  ;;  %v2779_v37 = vsel %vm1793_vm12, 1.0, %v6603_v63 }
 0x33a   :  { %v2579_v26 = vadd.f32 %v2772_v22, %v2578_v58  ;;  %v5366_v16 = vpop.f32.mrf.mxu3  ;;  %v2780_v22 = vsel %vm1794_vm14, 1.0, %v6603_v63 }
 0x33b   :  { %2277 = vst.msk [vmem:[%s6483_s3 + $0x138] sm:$0xff] %vm101_vm0, %v5366_v16 }
 0x33c   :  { %v2580_v53 = vadd.f32 %v2773_v25, %v2579_v26  ;;  %v5377_v48 = vpop.f32.mrf.mxu1 }
 0x33d   :  { %2250 = vst.msk [vmem:[%s6483_s3 + $0x60] sm:$0xff] %vm101_vm0, %v5377_v48 }
 0x33e   :  { %v2581_v62 = vadd.f32 %v2774_v28, %v2580_v53  ;;  %v1648_v53 = vcvt.s32.f32 %v1646_v54  ;;  %v1660_v54 = vand.u32 65535, %v4931_v12 }
 0x340   :  { %v2582_v30 = vadd.f32 %v2775_v41, %v2581_v62 }
 0x342   :  { %v2583_v61 = vadd.f32 %v2776_v35, %v2582_v30  ;;  %v5396_v27 = vpop.f32.mrf.mxu3  ;;  %v1294_v35 = vshll.u32 %v1293_v34, 16  ;;  %v1307_v34 = vcvt.f32.s32 %v4967_v51  ;;  %v1601_v51 = vcvt.f32.s32 %v4739_v0 }
 0x343   :  { %2278 = vst.msk [vmem:[%s6483_s3 + $0x140] sm:$0xff] %vm101_vm0, %v5396_v27 }
 0x344   :  { %v2584_v39 = vadd.f32 %v2777_v52, %v2583_v61 }
 0x346   :  { %v2585_v44 = vadd.f32 %v2778_v31, %v2584_v39 }
 0x348   :  { %v2586_v58 = vadd.f32 %v2779_v37, %v2585_v44 }
 0x34a   :  { %v2587_v26 = vadd.f32 %v2780_v22, %v2586_v58  ;;  %v6802_v58 = vld [vmem:[#allocation32_spill] sm:$0xff] }
 0x34b   :  { %v5424_v25 = vpop.f32.mrf.mxu3  ;;  %v1251_v22 = vcvt.f32.s32 %v6802_v58 }
 0x34c   :  { %v2588_v28 = vadd.f32 %v2781_v46, %v2587_v26  ;;  %2279 = vst.msk [vmem:[%s6483_s3 + $0x148] sm:$0xff] %vm101_vm0, %v5424_v25  ;;  %v5431_v59 = vpop.xlane.xlu0 %1650  ;;  %v1662_v46 = vcvt.s32.f32 %v1660_v54 }
 0x34d   :  { %vm1652_vm12 = vcmp.eq.f32.partialorder %v4868_v15, %v5431_v59  ;;  %v5440_v13 = vpop.f32.mrf.mxu1  ;;  %v1587_v15 = vcvt.f32.s32 %v4697_v8 }
 0x34e   :  { %v2589_v62 = vadd.f32 %v2782_v1, %v2588_v28  ;;  %2251 = vst.msk [vmem:[%s6483_s3 + $0x68] sm:$0xff] %vm101_vm0, %v5440_v13  ;;  %v1653_v41 = vsel %vm1652_vm12, %v1648_v53, inf  ;;  %v1252_v28 = vshll.u32 %v1251_v22, 16 }
 0x34f   :  { %1654 = vmin.xlane.f32.xlu1 %v1653_v41  ;;  %v1588_v2 = vshll.u32 %v1587_v15, 16 }
 0x350   :  { %v2590_v36 = vadd.f32 %v2783_v57, %v2589_v62  ;;  %v1291_v30 = vpop.xlane.xlu2 %1290 }
 0x351   :  { %v1292_v61 = vcvt.f32.s32 %v1291_v30  ;;  %v6804_v30 = vld [vmem:[#allocation44_spill] sm:$0xff] }
 0x352   :  { %v1265_v15 = vcvt.f32.s32 %v6804_v30 }
 0x353   :  { %v5452_v52 = vadd.s32 %v1294_v35, %v1292_v61  ;;  %v5454_v39 = vpop.f32.mrf.mxu3  ;;  %v1308_v61 = vshll.u32 %v1307_v34, 16 }
 0x354   :  { %6801 = vst [vmem:[#allocation50_spill] sm:$0xff] %v5454_v39  ;;  %v1585_v31 = vpop.xlane.xlu0 %1584  ;;  %v1266_v22 = vshll.u32 %v1265_v15, 16 }
 0x355   :  { %2280 = vst.msk [vmem:[%s6483_s3 + $0x150] sm:$0xff] %vm101_vm0, %v5454_v39  ;;  %v1586_v8 = vcvt.f32.s32 %v1585_v31  ;;  %v5466_v44 = vpop.f32.mrf.mxu1  ;;  %vm1801_vm13 = vcmp.eq.s32.totalorder %v3681_v14, %v5452_v52 }
 0x356   :  { %2203 = vst.msk [vmem:[%s6484_s4 + $0xe8] sm:$0xff] %vm2173_vm15, %v5452_v52 }
 0x357   :  { %2252 = vst.msk [vmem:[%s6483_s3 + $0x70] sm:$0xff] %vm101_vm0, %v5466_v44  ;;  %v5473_v37 = vadd.s32 %v1588_v2, %v1586_v8 }
 0x359   :  { %2224 = vst.msk [vmem:[%s6484_s4 + $0x190] sm:$0xff] %vm2173_vm15, %v5473_v37  ;;  %vm1822_vm14 = vcmp.eq.s32.totalorder %v3681_v14, %v5473_v37 }
 0x35a   :  { %2872 = vmatmul.msk.f32.gmra.mxu3 %vm1822_vm14, %v6683_v24 }
 0x35b   :  { %v5488_v26 = vpop.f32.mrf.mxu3 }
 0x35c   :  { %6803 = vst [vmem:[#allocation54_spill] sm:$0xff] %v5488_v26  ;;  %v5495_v12 = vpop.xlane.xlu2 %1664  ;;  %v1249_v53 = vpop.xlane.xlu0 %1248 }
 0x35d   :  { %2281 = vst.msk [vmem:[%s6483_s3 + $0x158] sm:$0xff] %vm101_vm0, %v5488_v26  ;;  %vm1666_vm2 = vcmp.eq.f32.partialorder %v4948_v10, %v5495_v12  ;;  %v1250_v1 = vcvt.f32.s32 %v1249_v53  ;;  %v5500_v62 = vpop.f32.mrf.mxu1 }
 0x35e   :  { %2253 = vst.msk [vmem:[%s6483_s3 + $0x78] sm:$0xff] %vm101_vm0, %v5500_v62  ;;  %v1667_v41 = vsel %vm1666_vm2, %v1662_v46, inf  ;;  %v1602_v46 = vshll.u32 %v1601_v51, 16  ;;  %v1279_v51 = vcvt.f32.s32 %v5042_v5 }
 0x35f   :  { %v1253_v57 = vadd.s32 %v1252_v28, %v1250_v1  ;;  %1668 = vmin.xlane.f32.xlu1 %v1667_v41  ;;  %v1674_v41 = vand.u32 65535, %v5009_v6 }
 0x360   :  { %v1305_v35 = vpop.xlane.xlu1 %1304 }
 0x361   :  { %2200 = vst.msk [vmem:[%s6484_s4 + $0xd0] sm:$0xff] %vm2173_vm15, %v1253_v57  ;;  %v1306_v10 = vcvt.f32.s32 %v1305_v35  ;;  %vm1798_vm8 = vcmp.eq.s32.totalorder %v3681_v14, %v1253_v57  ;;  %v1676_v15 = vcvt.s32.f32 %v1674_v41 }
 0x362   :  { %v2784_v31 = vsel %vm1798_vm8, 1.0, %v6603_v63  ;;  %2848 = vmatmul.msk.f32.gmra.mxu1 %vm1798_vm8, %v6683_v24 }
 0x363   :  { %v5516_v2 = vadd.s32 %v1308_v61, %v1306_v10  ;;  %v2591_v8 = vadd.f32 %v2784_v31, %v2590_v36  ;;  %v5518_v54 = vpop.f32.mrf.mxu3 }
 0x364   :  { %6805 = vst [vmem:[#allocation13_spill] sm:$0xff] %v5518_v54  ;;  %v1599_v0 = vpop.xlane.xlu2 %1598  ;;  %v1263_v58 = vpop.xlane.xlu0 %1262 }
 0x365   :  { %2282 = vst.msk [vmem:[%s6483_s3 + $0x160] sm:$0xff] %vm101_vm0, %v5518_v54  ;;  %v1600_v53 = vcvt.f32.s32 %v1599_v0  ;;  %v1264_v36 = vcvt.f32.s32 %v1263_v58  ;;  %v5530_v28 = vpop.f32.mrf.mxu1  ;;  %v1280_v0 = vshll.u32 %v1279_v51, 16  ;;  %vm1802_vm6 = vcmp.eq.s32.totalorder %v3681_v14, %v5516_v2 }
 0x366   :  { %2204 = vst.msk [vmem:[%s6484_s4 + $0xf0] sm:$0xff] %vm2173_vm15, %v5516_v2  ;;  %v1629_v51 = vcvt.f32.s32 %v4964_v21  ;;  %v2788_v21 = vsel %vm1802_vm6, 1.0, %v6603_v63 }
 0x367   :  { %2254 = vst.msk [vmem:[%s6483_s3 + $0x80] sm:$0xff] %vm101_vm0, %v5530_v28  ;;  %v5537_v34 = vadd.s32 %v1602_v46, %v1600_v53  ;;  %v1267_v1 = vadd.s32 %v1266_v22, %v1264_v36 }
 0x369   :  { %2225 = vst.msk [vmem:[%s6484_s4 + $0x198] sm:$0xff] %vm2173_vm15, %v5537_v34  ;;  %vm1799_vm9 = vcmp.eq.s32.totalorder %v3681_v14, %v1267_v1  ;;  %vm1823_vm4 = vcmp.eq.s32.totalorder %v3681_v14, %v5537_v34  ;;  %v2992_v34 = vld [vmem:[%s6480_s0 + $0x108] sm:$0xff] }
 0x36a   :  { %2201 = vst.msk [vmem:[%s6484_s4 + $0xd8] sm:$0xff] %vm2173_vm15, %v1267_v1  ;;  %v2785_v57 = vsel %vm1799_vm9, 1.0, %v6603_v63  ;;  %2849 = vmatmul.msk.f32.gmra.mxu1 %vm1799_vm9, %v6683_v24  ;;  %2873 = vmatmul.msk.f32.gmra.mxu3 %vm1823_vm4, %v6683_v24 }
 0x36b   :  { %v2592_v6 = vadd.f32 %v2785_v57, %v2591_v8  ;;  %v5558_v30 = vpop.f32.mrf.mxu3  ;;  %v1615_v8 = vcvt.f32.s32 %v4888_v50 }
 0x36c   :  { %6806 = vst [vmem:[#allocation58_spill] sm:$0xff] %v5558_v30  ;;  %v5565_v35 = vpop.xlane.xlu1 %1678  ;;  %v747_v41 = vpop.xlane.xlu2 %746 }
 0x36d   :  { %2283 = vst.msk [vmem:[%s6483_s3 + $0x168] sm:$0xff] %vm101_vm0, %v5558_v30  ;;  %vm1680_vm10 = vcmp.eq.f32.partialorder %v5029_v45, %v5565_v35  ;;  %v5570_v61 = vpop.f32.mrf.mxu1  ;;  %v1616_v46 = vshll.u32 %v1615_v8, 16  ;;  %vm811_vm5 = vcmp.eq.f32.partialorder %v5015_v3, %v747_v41  ;;  %v1380_v8 = vand.u32 65535, %v5095_v19 }
 0x36e   :  { %2255 = vst.msk [vmem:[%s6483_s3 + $0x88] sm:$0xff] %vm101_vm0, %v5570_v61  ;;  %v1681_v10 = vsel %vm1680_vm10, %v1676_v15, inf  ;;  %v2787_v15 = vsel %vm1801_vm13, 1.0, %v6603_v63 }
 0x36f   :  { %1682 = vmin.xlane.f32.xlu1 %v1681_v10  ;;  %v1382_v19 = vcvt.s32.f32 %v1380_v8 }
 0x370   :  { %v1277_v31 = vpop.xlane.xlu0 %1276 }
 0x371   :  { %v1278_v58 = vcvt.f32.s32 %v1277_v31 }
 0x373   :  { %v1281_v22 = vadd.s32 %v1280_v0, %v1278_v58  ;;  %v1630_v58 = vshll.u32 %v1629_v51, 16 }
 0x374   :  { %v1613_v5 = vpop.xlane.xlu1 %1612 }
 0x375   :  { %2202 = vst.msk [vmem:[%s6484_s4 + $0xe0] sm:$0xff] %vm2173_vm15, %v1281_v22  ;;  %v1614_v45 = vcvt.f32.s32 %v1613_v5  ;;  %v5582_v53 = vpop.f32.mrf.mxu1  ;;  %vm1800_vm11 = vcmp.eq.s32.totalorder %v3681_v14, %v1281_v22 }
 0x376   :  { %2256 = vst.msk [vmem:[%s6483_s3 + $0x90] sm:$0xff] %vm101_vm0, %v5582_v53  ;;  %v2786_v50 = vsel %vm1800_vm11, 1.0, %v6603_v63  ;;  %2850 = vmatmul.msk.f32.gmra.mxu1 %vm1800_vm11, %v6683_v24 }
 0x377   :  { %v5594_v36 = vadd.s32 %v1616_v46, %v1614_v45  ;;  %v2593_v1 = vadd.f32 %v2786_v50, %v2592_v6  ;;  %v5632_v45 = vsel %vm811_vm5, %v3681_v14, 128 }
 0x378   :  { %v745_v57 = vpop.xlane.xlu0 %744  ;;  %v1759_v41 = vshra.s32 %v5632_v45, 16 }
 0x379   :  { %2226 = vst.msk [vmem:[%s6484_s4 + $0x1a0] sm:$0xff] %vm2173_vm15, %v5594_v36  ;;  %vm810_vm3 = vcmp.eq.f32.partialorder %v5085_v60, %v745_v57  ;;  %vm1824_vm7 = vcmp.eq.s32.totalorder %v3681_v14, %v5594_v36  ;;  %v2594_v6 = vadd.f32 %v2787_v15, %v2593_v1  ;;  %v1643_v1 = vcvt.f32.s32 %v5039_v40 }
 0x37a   :  { %v5612_v10 = vsel %vm810_vm3, %v3681_v14, 128  ;;  %2874 = vmatmul.msk.f32.gmra.mxu3 %vm1824_vm7, %v6683_v24 }
 0x37b   :  { %v1745_v60 = vshra.s32 %v5612_v10, 16  ;;  %v5624_v31 = vadd.f32 %v2788_v21, %v2594_v6  ;;  %v5665_v57 = vpop.xlane.xlu2 %1692  ;;  %v1644_v51 = vshll.u32 %v1643_v1, 16  ;;  %v1321_v6 = vcvt.f32.s32 %v5089_v29 }
 0x37c   :  { %v1627_v0 = vpop.xlane.xlu1 %1626  ;;  %v5674_v21 = vcvt.s32.f32 %v1759_v41  ;;  %vm1694_vm8 = vcmp.eq.f32.partialorder %v5110_v49, %v5665_v57 }
 0x37d   :  { %v5627_v22 = vcvt.s32.f32 %v1745_v60  ;;  %v1628_v5 = vcvt.f32.s32 %v1627_v0  ;;  %v5629_v46 = vpop.f32.mrf.mxu1 }
 0x37e   :  { %2257 = vst.msk [vmem:[%s6483_s3 + $0x98] sm:$0xff] %vm101_vm0, %v5629_v46  ;;  %2851 = vmatmul.msk.f32.gmra.mxu1 %vm1801_vm13, %v6683_v24 }
 0x37f   :  { %v5643_v3 = vadd.s32 %v1630_v58, %v1628_v5  ;;  %1748 = vmin.xlane.f32.xlu2 %v5627_v22  ;;  %v1322_v5 = vshll.u32 %v1321_v6, 16 }
 0x380   :  { %v5646_v50 = vpop.xlane.xlu0 %1384 }
 0x381   :  { %2227 = vst.msk [vmem:[%s6484_s4 + $0x1a8] sm:$0xff] %vm2173_vm15, %v5643_v3  ;;  %vm1386_vm12 = vcmp.eq.f32.partialorder %v5135_v11, %v5646_v50  ;;  %vm1825_vm2 = vcmp.eq.s32.totalorder %v3681_v14, %v5643_v3  ;;  %v1688_v11 = vand.u32 65535, %v5092_v43  ;;  %v1702_v43 = vand.u32 65535, %v5180_v47 }
 0x382   :  { %2875 = vmatmul.msk.f32.gmra.mxu3 %vm1825_vm2, %v6683_v24  ;;  %v5663_v40 = vpop.f32.mrf.mxu3  ;;  %v1387_v52 = vsel %vm1386_vm12, %v1382_v19, inf }
 0x383   :  { %6807 = vst [vmem:[#allocation27_spill] sm:$0xff] %v5663_v40  ;;  %1388 = vmin.xlane.f32.xlu0 %v1387_v52  ;;  %v1690_v0 = vcvt.s32.f32 %v1688_v11  ;;  %v1704_v19 = vcvt.s32.f32 %v1702_v43  ;;  %v1335_v11 = vcvt.f32.s32 %v5185_v20 }
 0x384   :  { %2284 = vst.msk [vmem:[%s6483_s3 + $0x170] sm:$0xff] %vm101_vm0, %v5663_v40  ;;  %v1641_v15 = vpop.xlane.xlu1 %1640 }
 0x385   :  { %v1642_v60 = vcvt.f32.s32 %v1641_v15  ;;  %v5676_v8 = vpop.f32.mrf.mxu1  ;;  %v1695_v47 = vsel %vm1694_vm8, %v1690_v0, inf }
 0x386   :  { %2258 = vst.msk [vmem:[%s6483_s3 + $0xa0] sm:$0xff] %vm101_vm0, %v5676_v8  ;;  %2852 = vmatmul.msk.f32.gmra.mxu1 %vm1802_vm6, %v6683_v24 }
 0x387   :  { %v5690_v29 = vadd.s32 %v1644_v51, %v1642_v60  ;;  %1762 = vmin.xlane.f32.xlu2 %v5674_v21  ;;  %v1336_v60 = vshll.u32 %v1335_v11, 16  ;;  %v2959_v11 = vld [vmem:[%s6480_s0] sm:$0xff] }
 0x388   :  { %v1319_v58 = vpop.xlane.xlu0 %1318 }
 0x389   :  { %2228 = vst.msk [vmem:[%s6484_s4 + $0x1b0] sm:$0xff] %vm2173_vm15, %v5690_v29  ;;  %v1320_v2 = vcvt.f32.s32 %v1319_v58  ;;  %vm1826_vm9 = vcmp.eq.s32.totalorder %v3681_v14, %v5690_v29  ;;  %v2993_v29 = vld [vmem:[%s6480_s0 + $0x110] sm:$0xff] }
 0x38a   :  { %2876 = vmatmul.msk.f32.gmra.mxu3 %vm1826_vm9, %v6683_v24  ;;  %v5704_v49 = vpop.f32.mrf.mxu3 }
 0x38b   :  { %6808 = vst [vmem:[#allocation26_spill] sm:$0xff] %v5704_v49  ;;  %v1323_v1 = vadd.s32 %v1322_v5, %v1320_v2  ;;  %1696 = vmin.xlane.f32.xlu0 %v1695_v47  ;;  %v5711_v41 = vpop.xlane.xlu2 %1706  ;;  %v1349_v5 = vcvt.f32.s32 %v5222_v9  ;;  %v1716_v9 = vand.u32 65535, %v5252_v4  ;;  %v2961_v4 = vld [vmem:[%s6480_s0 + $0x18] sm:$0xff] }
 0x38c   :  { %2285 = vst.msk [vmem:[%s6483_s3 + $0x178] sm:$0xff] %vm101_vm0, %v5704_v49  ;;  %vm1708_vm10 = vcmp.eq.f32.partialorder %v5202_v33, %v5711_v41  ;;  %v1981_v52 = vpop.f32.mrf.mxu0 }
 0x38d   :  { %2205 = vst.msk [vmem:[%s6484_s4 + $0xf8] sm:$0xff] %vm2173_vm15, %v1323_v1  ;;  %v5720_v15 = vpop.f32.mrf.mxu1  ;;  %vm1803_vm11 = vcmp.eq.s32.totalorder %v3681_v14, %v1323_v1  ;;  %v1709_v51 = vsel %vm1708_vm10, %v1704_v19, inf  ;;  %v1350_v1 = vshll.u32 %v1349_v5, 16 }
 0x38e   :  { %2238 = vst.msk [vmem:[%s6483_s3] sm:$0xff] %vm101_vm0, %v1981_v52  ;;  %v2789_v33 = vsel %vm1803_vm11, 1.0, %v6603_v63  ;;  %2853 = vmatmul.msk.f32.gmra.mxu1 %vm1803_vm11, %v6683_v24  ;;  %1710 = vmin.xlane.f32.xlu1 %v1709_v51  ;;  %v2302_v51 = vsub.f32 %v1981_v52, %v2959_v11 }
 0x38f   :  { %2259 = vst.msk [vmem:[%s6483_s3 + $0xa8] sm:$0xff] %vm101_vm0, %v5720_v15  ;;  %v2596_v20 = vadd.f32 %v2789_v33, %v5624_v31 }
 0x390   :  { %v1333_v6 = vpop.xlane.xlu0 %1332 }
 0x391   :  { %v1334_v43 = vcvt.f32.s32 %v1333_v6  ;;  %v2960_v6 = vld [vmem:[%s6480_s0 + $0x10] sm:$0xff] }
 0x392   :  { %v5735_v0 = vpop.f32.mrf.mxu3 }
 0x393   :  { %6809 = vst [vmem:[#allocation15_spill] sm:$0xff] %v5735_v0  ;;  %v1337_v58 = vadd.s32 %v1336_v60, %v1334_v43  ;;  %v6810_v60 = vld [vmem:[#allocation51_spill] sm:$0xff] }
 0x394   :  { %2286 = vst.msk [vmem:[%s6483_s3 + $0x180] sm:$0xff] %vm101_vm0, %v5735_v0  ;;  %v2304_v43 = vsub.f32 %v6810_v60, %v2960_v6  ;;  %v2963_v6 = vld [vmem:[%s6480_s0 + $0x20] sm:$0xff]  ;;  %v6813_v60 = vld [vmem:[#allocation18_spill] sm:$0xff] }
 0x395   :  { %2206 = vst.msk [vmem:[%s6484_s4 + $0x100] sm:$0xff] %vm2173_vm15, %v1337_v58  ;;  %v5747_v31 = vpop.f32.mrf.mxu1  ;;  %vm1804_vm13 = vcmp.eq.s32.totalorder %v3681_v14, %v1337_v58  ;;  %v1718_v58 = vcvt.s32.f32 %v1716_v9  ;;  %v2962_v9 = vld [vmem:[%s6480_s0 + $0x8] sm:$0xff] }
 0x396   :  { %2260 = vst.msk [vmem:[%s6483_s3 + $0xb0] sm:$0xff] %vm101_vm0, %v5747_v31  ;;  %v2790_v2 = vsel %vm1804_vm13, 1.0, %v6603_v63  ;;  %2854 = vmatmul.msk.f32.gmra.mxu1 %vm1804_vm13, %v6683_v24 }
 0x397   :  { %v2597_v47 = vadd.f32 %v2790_v2, %v2596_v20  ;;  %v6811_v20 = vld [vmem:[#allocation11_spill] sm:$0xff]  ;;  %v1363_v2 = vcvt.f32.s32 %v5290_v38 }
 0x398   :  { %v1347_v19 = vpop.xlane.xlu0 %1346  ;;  %v2305_v5 = vsub.f32 %v6811_v20, %v2961_v4  ;;  %v2306_v4 = vsub.f32 %v6813_v60, %v2963_v6 }
 0x399   :  { %v1348_v33 = vcvt.f32.s32 %v1347_v19  ;;  %v2366_v19 = vmul.f32 %v2302_v51, %v2302_v51  ;;  %v1364_v40 = vshll.u32 %v1363_v2, 16 }
 0x39a   :  { %v2369_v20 = vmul.f32 %v2305_v5, %v2305_v5  ;;  %v2370_v54 = vmul.f32 %v2306_v4, %v2306_v4  ;;  %v6815_v5 = vld [vmem:[#allocation55_spill] sm:$0xff] }
 0x39b   :  { %v1351_v63 = vadd.s32 %v1350_v1, %v1348_v33  ;;  %v5765_v0 = vpop.xlane.xlu2 %1720  ;;  %v2368_v33 = vmul.f32 %v2304_v43, %v2304_v43  ;;  %v2430_v6 = vsel %vm101_vm0, %v2366_v19, 0.0 }
 0x39c   :  { %vm1722_vm6 = vcmp.eq.f32.partialorder %v5267_v56, %v5765_v0  ;;  %v1984_v52 = vpop.f32.mrf.mxu0  ;;  %v6812_v56 = vmov 0.0   ;;  %v2435_v2 = vsel %vm101_vm0, %v2369_v20, 0.0 }
 0x39d   :  { %2207 = vst.msk [vmem:[%s6484_s4 + $0x108] sm:$0xff] %vm2173_vm15, %v1351_v63  ;;  %v2303_v1 = vsub.f32 %v1984_v52, %v2962_v9  ;;  %v5781_v11 = vpop.f32.mrf.mxu1  ;;  %vm1805_vm3 = vcmp.eq.s32.totalorder %v3681_v14, %v1351_v63  ;;  %v1723_v38 = vsel %vm1722_vm6, %v1718_v58, inf  ;;  %v1730_v63 = vand.u32 65535, %v5302_v55  ;;  %v6814_v9 = vld [vmem:[#allocation19_spill] sm:$0xff] }
 0x39e   :  { %2239 = vst.msk [vmem:[%s6483_s3 + $0x8] sm:$0xff] %vm101_vm0, %v1984_v52  ;;  %v2791_v51 = vsel %vm1805_vm3, 1.0, %v6812_v56  ;;  %2855 = vmatmul.msk.f32.gmra.mxu1 %vm1805_vm3, %v6683_v24  ;;  %1724 = vmin.xlane.f32.xlu2 %v1723_v38  ;;  %v2964_v52 = vld [vmem:[%s6480_s0 + $0x28] sm:$0xff]  ;;  %v2433_v60 = vsel %vm101_vm0, %v2368_v33, 0.0  ;;  %v2808_v42 = vsel %vm1822_vm14, 1.0, %v6812_v56  ;;  %v2810_v37 = vsel %vm1824_vm7, 1.0, %v6812_v56 }
 0x39f   :  { %v2367_v58 = vmul.f32 %v2303_v1, %v2303_v1  ;;  %2261 = vst.msk [vmem:[%s6483_s3 + $0xb8] sm:$0xff] %vm101_vm0, %v5781_v11  ;;  %v2598_v43 = vadd.f32 %v2791_v51, %v2597_v47  ;;  %v2307_v38 = vsub.f32 %v6814_v9, %v2964_v52  ;;  %v2965_v47 = vld [vmem:[%s6480_s0 + $0x30] sm:$0xff]  ;;  %v1732_v26 = vcvt.s32.f32 %v1730_v63 }
 0x3a0   :  { %v1361_v49 = vpop.xlane.xlu0 %1360  ;;  %v2308_v51 = vsub.f32 %v6815_v5, %v2965_v47  ;;  %v6816_v33 = vld [vmem:[#allocation49_spill] sm:$0xff] }
 0x3a1   :  { %v2431_v55 = vsel %vm101_vm0, %v2367_v58, 0.0  ;;  %v1362_v1 = vcvt.f32.s32 %v1361_v49  ;;  %v2371_v19 = vmul.f32 %v2307_v38, %v2307_v38  ;;  %v2966_v49 = vld [vmem:[%s6480_s0 + $0x38] sm:$0xff]  ;;  %v1377_v58 = vcvt.f32.s32 %v5339_v32  ;;  %v2968_v5 = vld [vmem:[%s6480_s0 + $0x48] sm:$0xff] }
 0x3a2   :  { %v2432_v30 = vadd.f32 %v2431_v55, %v2430_v6  ;;  %v2309_v4 = vsub.f32 %v6816_v33, %v2966_v49  ;;  %v2437_v32 = vsel %vm101_vm0, %v2370_v54, 0.0  ;;  %v2372_v20 = vmul.f32 %v2308_v51, %v2308_v51 }
 0x3a3   :  { %v1365_v39 = vadd.s32 %v1364_v40, %v1362_v1  ;;  %v5811_v52 = vpop.xlane.xlu2 %1734  ;;  %v2439_v55 = vsel %vm101_vm0, %v2371_v19, 0.0  ;;  %v1378_v54 = vshll.u32 %v1377_v58, 16 }
 0x3a4   :  { %v2434_v9 = vadd.f32 %v2433_v60, %v2432_v30  ;;  %vm1736_vm5 = vcmp.eq.f32.partialorder %v5322_v17, %v5811_v52  ;;  %v2373_v47 = vmul.f32 %v2309_v4, %v2309_v4 }
 0x3a5   :  { %2208 = vst.msk [vmem:[%s6484_s4 + $0x110] sm:$0xff] %vm2173_vm15, %v1365_v39  ;;  %v5825_v40 = vpop.f32.mrf.mxu1  ;;  %vm1806_vm12 = vcmp.eq.s32.totalorder %v3681_v14, %v1365_v39  ;;  %v1737_v30 = vsel %vm1736_vm5, %v1732_v26, inf  ;;  %v2967_v39 = vld [vmem:[%s6480_s0 + $0x40] sm:$0xff] }
 0x3a6   :  { %v2436_v63 = vadd.f32 %v2435_v2, %v2434_v9  ;;  %2262 = vst.msk [vmem:[%s6483_s3 + $0xc0] sm:$0xff] %vm101_vm0, %v5825_v40  ;;  %v2792_v17 = vsel %vm1806_vm12, 1.0, %v6812_v56  ;;  %2856 = vmatmul.msk.f32.gmra.mxu1 %vm1806_vm12, %v6683_v24  ;;  %1738 = vmin.xlane.f32.xlu0 %v1737_v30  ;;  %v6817_v26 = vld [vmem:[#allocation24_spill] sm:$0xff]  ;;  %v2441_v30 = vsel %vm101_vm0, %v2372_v20, 0.0 }
 0x3a7   :  { %v2310_v38 = vsub.f32 %v6817_v26, %v2967_v39  ;;  %v2599_v6 = vadd.f32 %v2792_v17, %v2598_v43  ;;  %v6818_v2 = vld [vmem:[#allocation12_spill] sm:$0xff]  ;;  %v2969_v43 = vld [vmem:[%s6480_s0 + $0x50] sm:$0xff] }
 0x3a8   :  { %v2438_v1 = vadd.f32 %v2437_v32, %v2436_v63  ;;  %v1375_v60 = vpop.xlane.xlu0 %1374  ;;  %v2311_v9 = vsub.f32 %v6818_v2, %v2968_v5  ;;  %v2312_v19 = vsub.f32 %v5310_v7, %v2969_v43  ;;  %v2443_v63 = vsel %vm101_vm0, %v2373_v47, 0.0  ;;  %v2970_v32 = vld [vmem:[%s6480_s0 + $0x58] sm:$0xff] }
 0x3a9   :  { %v1376_v51 = vcvt.f32.s32 %v1375_v60  ;;  %v2374_v39 = vmul.f32 %v2310_v38, %v2310_v38  ;;  %v2313_v20 = vsub.f32 %v5347_v23, %v2970_v32 }
 0x3aa   :  { %v2440_v49 = vadd.f32 %v2439_v55, %v2438_v1  ;;  %v5845_v33 = vpop.f32.mrf.mxu3  ;;  %v2375_v17 = vmul.f32 %v2311_v9, %v2311_v9  ;;  %v2376_v55 = vmul.f32 %v2312_v19, %v2312_v19  ;;  %v2971_v1 = vld [vmem:[%s6480_s0 + $0x60] sm:$0xff] }
 0x3ab   :  { %v1379_v4 = vadd.s32 %v1378_v54, %v1376_v51  ;;  %2287 = vst.msk [vmem:[%s6483_s3 + $0x188] sm:$0xff] %vm101_vm0, %v5845_v33  ;;  %v2445_v23 = vsel %vm101_vm0, %v2374_v39, 0.0  ;;  %v2314_v60 = vsub.f32 %v5377_v48, %v2971_v1  ;;  %v2377_v9 = vmul.f32 %v2313_v20, %v2313_v20  ;;  %v2972_v54 = vld [vmem:[%s6480_s0 + $0x68] sm:$0xff]  ;;  %v2973_v48 = vld [vmem:[%s6480_s0 + $0x70] sm:$0xff]  ;;  %v2975_v20 = vld [vmem:[%s6480_s0 + $0x80] sm:$0xff] }
 0x3ac   :  { %v2442_v58 = vadd.f32 %v2441_v30, %v2440_v49  ;;  %v2447_v2 = vsel %vm101_vm0, %v2375_v17, 0.0  ;;  %v2315_v51 = vsub.f32 %v5440_v13, %v2972_v54  ;;  %v2449_v30 = vsel %vm101_vm0, %v2376_v55, 0.0  ;;  %v2976_v55 = vld [vmem:[%s6480_s0 + $0x88] sm:$0xff] }
 0x3ad   :  { %2209 = vst.msk [vmem:[%s6484_s4 + $0x118] sm:$0xff] %vm2173_vm15, %v1379_v4  ;;  %v5866_v7 = vpop.f32.mrf.mxu1  ;;  %vm1807_vm8 = vcmp.eq.s32.totalorder %v3681_v14, %v1379_v4  ;;  %v2378_v39 = vmul.f32 %v2314_v60, %v2314_v60  ;;  %v2451_v19 = vsel %vm101_vm0, %v2377_v9, 0.0 }
 0x3ae   :  { %v2444_v26 = vadd.f32 %v2443_v63, %v2442_v58  ;;  %2263 = vst.msk [vmem:[%s6483_s3 + $0xc8] sm:$0xff] %vm101_vm0, %v5866_v7  ;;  %v2793_v38 = vsel %vm1807_vm8, 1.0, %v6812_v56  ;;  %2857 = vmatmul.msk.f32.gmra.mxu1 %vm1807_vm8, %v6683_v24  ;;  %v2379_v4 = vmul.f32 %v2315_v51, %v2315_v51  ;;  %v2974_v58 = vld [vmem:[%s6480_s0 + $0x78] sm:$0xff] }
 0x3af   :  { %v5881_v47 = vadd.f32 %v2793_v38, %v2599_v6  ;;  %v2316_v6 = vsub.f32 %v5466_v44, %v2973_v48  ;;  %v2317_v13 = vsub.f32 %v5500_v62, %v2974_v58  ;;  %v2453_v17 = vsel %vm101_vm0, %v2378_v39, 0.0 }
 0x3b0   :  { %v2446_v5 = vadd.f32 %v2445_v23, %v2444_v26  ;;  %v2318_v44 = vsub.f32 %v5530_v28, %v2975_v20  ;;  %v2455_v38 = vsel %vm101_vm0, %v2379_v4, 0.0  ;;  %v2319_v62 = vsub.f32 %v5570_v61, %v2976_v55 }
 0x3b1   :  { %v2380_v32 = vmul.f32 %v2316_v6, %v2316_v6  ;;  %v2381_v23 = vmul.f32 %v2317_v13, %v2317_v13 }
 0x3b2   :  { %v2448_v49 = vadd.f32 %v2447_v2, %v2446_v5  ;;  %v2382_v5 = vmul.f32 %v2318_v44, %v2318_v44  ;;  %v2977_v2 = vld [vmem:[%s6480_s0 + $0x90] sm:$0xff]  ;;  %v2383_v51 = vmul.f32 %v2319_v62, %v2319_v62 }
 0x3b3   :  { %v2457_v60 = vsel %vm101_vm0, %v2380_v32, 0.0  ;;  %v2320_v28 = vsub.f32 %v5582_v53, %v2977_v2  ;;  %v2459_v54 = vsel %vm101_vm0, %v2381_v23, 0.0  ;;  %v2979_v53 = vld [vmem:[%s6480_s0 + $0xa0] sm:$0xff] }
 0x3b4   :  { %v2450_v43 = vadd.f32 %v2449_v30, %v2448_v49  ;;  %v2978_v49 = vld [vmem:[%s6480_s0 + $0x98] sm:$0xff]  ;;  %v1657_v30 = vcvt.f32.s32 %v5431_v59  ;;  %v2461_v48 = vsel %vm101_vm0, %v2382_v5, 0.0  ;;  %v2463_v4 = vsel %vm101_vm0, %v2383_v51, 0.0 }
 0x3b5   :  { %v2321_v61 = vsub.f32 %v5629_v46, %v2978_v49  ;;  %v2384_v6 = vmul.f32 %v2320_v28, %v2320_v28  ;;  %v2980_v46 = vld [vmem:[%s6480_s0 + $0xa8] sm:$0xff] }
 0x3b6   :  { %v2452_v63 = vadd.f32 %v2451_v19, %v2450_v43  ;;  %v2322_v43 = vsub.f32 %v5676_v8, %v2979_v53  ;;  %v2323_v59 = vsub.f32 %v5720_v15, %v2980_v46  ;;  %v1658_v13 = vshll.u32 %v1657_v30, 16  ;;  %v2981_v8 = vld [vmem:[%s6480_s0 + $0xb0] sm:$0xff]  ;;  %v2982_v15 = vld [vmem:[%s6480_s0 + $0xb8] sm:$0xff] }
 0x3b7   :  { %v2385_v58 = vmul.f32 %v2321_v61, %v2321_v61  ;;  %v2465_v32 = vsel %vm101_vm0, %v2384_v6, 0.0  ;;  %v2324_v44 = vsub.f32 %v5747_v31, %v2981_v8  ;;  %v2325_v62 = vsub.f32 %v5781_v11, %v2982_v15  ;;  %v2983_v31 = vld [vmem:[%s6480_s0 + $0xc0] sm:$0xff] }
 0x3b8   :  { %v2454_v26 = vadd.f32 %v2453_v17, %v2452_v63  ;;  %v2386_v20 = vmul.f32 %v2322_v43, %v2322_v43  ;;  %v2387_v55 = vmul.f32 %v2323_v59, %v2323_v59  ;;  %v2326_v28 = vsub.f32 %v5825_v40, %v2983_v31  ;;  %v2984_v40 = vld [vmem:[%s6480_s0 + $0xc8] sm:$0xff] }
 0x3b9   :  { %v2467_v23 = vsel %vm101_vm0, %v2385_v58, 0.0  ;;  %v2388_v2 = vmul.f32 %v2324_v44, %v2324_v44  ;;  %v2327_v51 = vsub.f32 %v5866_v7, %v2984_v40  ;;  %v1671_v43 = vcvt.f32.s32 %v5495_v12 }
 0x3ba   :  { %v2456_v1 = vadd.f32 %v2455_v38, %v2454_v26  ;;  %v2469_v5 = vsel %vm101_vm0, %v2386_v20, 0.0  ;;  %v2390_v30 = vmul.f32 %v2326_v28, %v2326_v28  ;;  %v2985_v20 = vld [vmem:[%s6480_s0 + $0xd0] sm:$0xff] }
 0x3bb   :  { %v2473_v61 = vsel %vm101_vm0, %v2388_v2, 0.0  ;;  %v2391_v6 = vmul.f32 %v2327_v51, %v2327_v51  ;;  %v1391_v51 = vcvt.f32.s32 %v5646_v50 }
 0x3bc   :  { %v2458_v9 = vadd.f32 %v2457_v60, %v2456_v1 }
 0x3bd   :  { %v2479_v58 = vsel %vm101_vm0, %v2391_v6, 0.0  ;;  %v1392_v6 = vshll.u32 %v1391_v51, 16 }
 0x3be   :  { %v2460_v39 = vadd.f32 %v2459_v54, %v2458_v9  ;;  %v2471_v9 = vsel %vm101_vm0, %v2387_v55, 0.0  ;;  %v2389_v54 = vmul.f32 %v2325_v62, %v2325_v62 }
 0x3c0   :  { %v2462_v19 = vadd.f32 %v2461_v48, %v2460_v39  ;;  %v2475_v48 = vsel %vm101_vm0, %v2389_v54, 0.0 }
 0x3c2   :  { %v2464_v63 = vadd.f32 %v2463_v4, %v2462_v19  ;;  %v1655_v17 = vpop.xlane.xlu1 %1654  ;;  %v2477_v19 = vsel %vm101_vm0, %v2390_v30, 0.0 }
 0x3c3   :  { %v1656_v26 = vcvt.f32.s32 %v1655_v17  ;;  %v1685_v17 = vcvt.f32.s32 %v5565_v35 }
 0x3c4   :  { %v2466_v38 = vadd.f32 %v2465_v32, %v2464_v63 }
 0x3c5   :  { %v5939_v1 = vadd.s32 %v1658_v13, %v1656_v26  ;;  %v1672_v13 = vshll.u32 %v1671_v43, 16 }
 0x3c6   :  { %v2468_v60 = vadd.f32 %v2467_v23, %v2466_v38  ;;  %v1686_v38 = vshll.u32 %v1685_v17, 16 }
 0x3c7   :  { %2229 = vst.msk [vmem:[%s6484_s4 + $0x1b8] sm:$0xff] %vm2173_vm15, %v5939_v1  ;;  %vm1827_vm10 = vcmp.eq.s32.totalorder %v3681_v14, %v5939_v1 }
 0x3c8   :  { %v2470_v11 = vadd.f32 %v2469_v5, %v2468_v60  ;;  %2877 = vmatmul.msk.f32.gmra.mxu3 %vm1827_vm10, %v6683_v24  ;;  %v2986_v60 = vld [vmem:[%s6480_s0 + $0xd8] sm:$0xff] }
 0x3ca   :  { %v2472_v49 = vadd.f32 %v2471_v9, %v2470_v11  ;;  %v1744_v9 = vand.u32 65535, %v5612_v10  ;;  %v2987_v10 = vld [vmem:[%s6480_s0 + $0xe0] sm:$0xff] }
 0x3cc   :  { %v2474_v39 = vadd.f32 %v2473_v61, %v2472_v49  ;;  %v1746_v54 = vcvt.s32.f32 %v1744_v9 }
 0x3ce   :  { %v2476_v53 = vadd.f32 %v2475_v48, %v2474_v39  ;;  %v1758_v39 = vand.u32 65535, %v5632_v45 }
 0x3d0   :  { %v2478_v4 = vadd.f32 %v2477_v19, %v2476_v53 }
 0x3d2   :  { %v2480_v46 = vadd.f32 %v2479_v58, %v2478_v4  ;;  %v1669_v59 = vpop.xlane.xlu1 %1668  ;;  %v1760_v4 = vcvt.s32.f32 %v1758_v39  ;;  %v2989_v39 = vld [vmem:[%s6480_s0 + $0xf0] sm:$0xff] }
 0x3d3   :  { %v1670_v7 = vcvt.f32.s32 %v1669_v59 }
 0x3d5   :  { %v5967_v63 = vadd.s32 %v1672_v13, %v1670_v7 }
 0x3d7   :  { %2230 = vst.msk [vmem:[%s6484_s4 + $0x1c0] sm:$0xff] %vm2173_vm15, %v5967_v63  ;;  %vm1828_vm11 = vcmp.eq.s32.totalorder %v3681_v14, %v5967_v63 }
 0x3d8   :  { %2878 = vmatmul.msk.f32.gmra.mxu3 %vm1828_vm11, %v6683_v24 }
 0x3dd   :  { %v5980_v12 = vpop.f32.mrf.mxu3 }
 0x3de   :  { %2288 = vst.msk [vmem:[%s6483_s3 + $0x190] sm:$0xff] %vm101_vm0, %v5980_v12 }
 0x3df   :  { %v2059_v32 = vpop.f32.mrf.mxu1 }
 0x3e0   :  { %2264 = vst.msk [vmem:[%s6483_s3 + $0xd0] sm:$0xff] %vm101_vm0, %v2059_v32  ;;  %v2328_v8 = vsub.f32 %v2059_v32, %v2985_v20  ;;  %v6819_v32 = vld [vmem:[#allocation35_spill] sm:$0xff] }
 0x3e1   :  { %vm6820_vm12 = vcmp.eq.s32.totalorder %v3681_v14, %v6819_v32 }
 0x3e2   :  { %v2392_v44 = vmul.f32 %v2328_v8, %v2328_v8  ;;  %v1683_v26 = vpop.xlane.xlu1 %1682  ;;  %v2795_v20 = vsel %vm6820_vm12, 1.0, %v6812_v56  ;;  %v1713_v8 = vcvt.f32.s32 %v5711_v41 }
 0x3e3   :  { %v1684_v23 = vcvt.f32.s32 %v1683_v26 }
 0x3e4   :  { %v2481_v55 = vsel %vm101_vm0, %v2392_v44, 0.0  ;;  %v1714_v9 = vshll.u32 %v1713_v8, 16 }
 0x3e5   :  { %v2482_v15 = vadd.f32 %v2481_v55, %v2480_v46  ;;  %v5996_v62 = vadd.s32 %v1686_v38, %v1684_v23  ;;  %v1699_v46 = vcvt.f32.s32 %v5665_v57  ;;  %v2988_v57 = vld [vmem:[%s6480_s0 + $0xe8] sm:$0xff]  ;;  %v6821_v55 = vld [vmem:[#allocation46_spill] sm:$0xff] }
 0x3e6   :  { %vm6822_vm8 = vcmp.eq.s32.totalorder %v3681_v14, %v6821_v55 }
 0x3e7   :  { %2231 = vst.msk [vmem:[%s6484_s4 + $0x1c8] sm:$0xff] %vm2173_vm15, %v5996_v62  ;;  %v2062_v35 = vpop.f32.mrf.mxu1  ;;  %vm1829_vm13 = vcmp.eq.s32.totalorder %v3681_v14, %v5996_v62  ;;  %v1700_v38 = vshll.u32 %v1699_v46, 16 }
 0x3e8   :  { %2265 = vst.msk [vmem:[%s6483_s3 + $0xd8] sm:$0xff] %vm101_vm0, %v2062_v35  ;;  %v2329_v5 = vsub.f32 %v2062_v35, %v2986_v60  ;;  %2879 = vmatmul.msk.f32.gmra.mxu3 %vm1829_vm13, %v6683_v24  ;;  %v2815_v1 = vsel %vm1829_vm13, 1.0, %v6812_v56 }
 0x3ea   :  { %v2393_v2 = vmul.f32 %v2329_v5, %v2329_v5 }
 0x3ec   :  { %v2483_v31 = vsel %vm101_vm0, %v2393_v2, 0.0 }
 0x3ed   :  { %v2484_v28 = vadd.f32 %v2483_v31, %v2482_v15  ;;  %v6017_v11 = vpop.f32.mrf.mxu3  ;;  %v2796_v15 = vsel %vm6822_vm8, 1.0, %v6812_v56  ;;  %v6823_v31 = vld [vmem:[#allocation10_spill] sm:$0xff] }
 0x3ee   :  { %2289 = vst.msk [vmem:[%s6483_s3 + $0x198] sm:$0xff] %vm101_vm0, %v6017_v11 }
 0x3f2   :  { %v6025_v40 = vpop.xlane.xlu2 %1748 }
 0x3f3   :  { %vm1750_vm6 = vcmp.eq.f32.partialorder %v5627_v22, %v6025_v40  ;;  %v2065_v49 = vpop.f32.mrf.mxu1 }
 0x3f4   :  { %2266 = vst.msk [vmem:[%s6483_s3 + $0xe0] sm:$0xff] %vm101_vm0, %v2065_v49  ;;  %v2330_v61 = vsub.f32 %v2065_v49, %v2987_v10  ;;  %v1751_v30 = vsel %vm1750_vm6, %v1746_v54, inf  ;;  %vm6824_vm6 = vcmp.eq.s32.totalorder %v3681_v14, %v6823_v31  ;;  %v6825_v10 = vld [vmem:[#allocation37_spill] sm:$0xff] }
 0x3f5   :  { %1752 = vmin.xlane.f32.xlu1 %v1751_v30 }
 0x3f6   :  { %v2394_v48 = vmul.f32 %v2330_v61, %v2330_v61  ;;  %v1389_v50 = vpop.xlane.xlu0 %1388 }
 0x3f7   :  { %v1390_v53 = vcvt.f32.s32 %v1389_v50 }
 0x3f8   :  { %v2485_v22 = vsel %vm101_vm0, %v2394_v48, 0.0 }
 0x3f9   :  { %v2486_v43 = vadd.f32 %v2485_v22, %v2484_v28  ;;  %v1393_v19 = vadd.s32 %v1392_v6, %v1390_v53  ;;  %v2797_v28 = vsel %vm6824_vm6, 1.0, %v6812_v56  ;;  %v6827_v53 = vld [vmem:[#allocation14_spill] sm:$0xff] }
 0x3fa   :  { %v6039_v58 = vpop.xlane.xlu2 %1762  ;;  %vm6828_vm12 = vcmp.eq.s32.totalorder %v3681_v14, %v6827_v53 }
 0x3fb   :  { %2210 = vst.msk [vmem:[%s6484_s4 + $0x120] sm:$0xff] %vm2173_vm15, %v1393_v19  ;;  %vm1764_vm3 = vcmp.eq.f32.partialorder %v5674_v21, %v6039_v58  ;;  %v2068_v45 = vpop.f32.mrf.mxu1  ;;  %vm1808_vm5 = vcmp.eq.s32.totalorder %v3681_v14, %v1393_v19  ;;  %v2799_v22 = vsel %vm6828_vm12, 1.0, %v6812_v56 }
 0x3fc   :  { %2267 = vst.msk [vmem:[%s6483_s3 + $0xe8] sm:$0xff] %vm101_vm0, %v2068_v45  ;;  %v2331_v59 = vsub.f32 %v2068_v45, %v2988_v57  ;;  %v2794_v13 = vsel %vm1808_vm5, 1.0, %v6812_v56  ;;  %2858 = vmatmul.msk.f32.gmra.mxu1 %vm1808_vm5, %v6683_v24  ;;  %v1765_v7 = vsel %vm1764_vm3, %v1760_v4, inf  ;;  %vm6826_vm5 = vcmp.eq.s32.totalorder %v3681_v14, %v6825_v10  ;;  %v6829_v4 = vld [vmem:[#allocation20_spill] sm:$0xff] }
 0x3fd   :  { %v2601_v21 = vadd.f32 %v2794_v13, %v5881_v47  ;;  %v6059_v17 = vpop.f32.mrf.mxu3  ;;  %1766 = vmin.xlane.f32.xlu2 %v1765_v7  ;;  %v2798_v61 = vsel %vm6826_vm5, 1.0, %v6812_v56  ;;  %vm6830_vm8 = vcmp.eq.s32.totalorder %v3681_v14, %v6829_v4  ;;  %v6831_v13 = vld [vmem:[#allocation25_spill] sm:$0xff]  ;;  %v2807_v4 = vsel %vm1821_vm1, 1.0, %v6812_v56 }
 0x3fe   :  { %v2395_v44 = vmul.f32 %v2331_v59, %v2331_v59  ;;  %2290 = vst.msk [vmem:[%s6483_s3 + $0x1a0] sm:$0xff] %vm101_vm0, %v6059_v17  ;;  %v1697_v26 = vpop.xlane.xlu0 %1696  ;;  %v2800_v46 = vsel %vm6830_vm8, 1.0, %v6812_v56  ;;  %vm6832_vm6 = vcmp.eq.s32.totalorder %v3681_v14, %v6831_v13 }
 0x3ff   :  { %v2602_v47 = vadd.f32 %v2795_v20, %v2601_v21  ;;  %v1698_v23 = vcvt.f32.s32 %v1697_v26  ;;  %v2801_v7 = vsel %vm6832_vm6, 1.0, %v6812_v56  ;;  %v6833_v20 = vld [vmem:[#allocation52_spill] sm:$0xff] }
 0x400   :  { %v2487_v35 = vsel %vm101_vm0, %v2395_v44, 0.0  ;;  %vm6834_vm12 = vcmp.eq.s32.totalorder %v3681_v14, %v6833_v20  ;;  %v2990_v44 = vld [vmem:[%s6480_s0 + $0xf8] sm:$0xff] }
 0x401   :  { %v2488_v60 = vadd.f32 %v2487_v35, %v2486_v43  ;;  %v2603_v41 = vadd.f32 %v2796_v15, %v2602_v47  ;;  %v6076_v5 = vadd.s32 %v1700_v38, %v1698_v23  ;;  %v1711_v2 = vpop.xlane.xlu1 %1710  ;;  %v2802_v8 = vsel %vm6834_vm12, 1.0, %v6812_v56  ;;  %v6835_v23 = vld [vmem:[#allocation23_spill] sm:$0xff] }
 0x402   :  { %v1712_v54 = vcvt.f32.s32 %v1711_v2  ;;  %vm6836_vm8 = vcmp.eq.s32.totalorder %v3681_v14, %v6835_v23  ;;  %v1727_v15 = vcvt.f32.s32 %v5765_v0  ;;  %v6839_v0 = vld [vmem:[#allocation53_spill] sm:$0xff] }
 0x403   :  { %v2604_v51 = vadd.f32 %v2797_v28, %v2603_v41  ;;  %2232 = vst.msk [vmem:[%s6484_s4 + $0x1d0] sm:$0xff] %vm2173_vm15, %v6076_v5  ;;  %v2071_v49 = vpop.f32.mrf.mxu1  ;;  %vm1830_vm3 = vcmp.eq.s32.totalorder %v3681_v14, %v6076_v5  ;;  %v2803_v55 = vsel %vm6836_vm8, 1.0, %v6812_v56  ;;  %v6837_v41 = vld [vmem:[#allocation56_spill] sm:$0xff]  ;;  %vm6840_vm12 = vcmp.eq.s32.totalorder %v3681_v14, %v6839_v0 }
 0x404   :  { %v6093_v30 = vadd.s32 %v1714_v9, %v1712_v54  ;;  %2268 = vst.msk [vmem:[%s6483_s3 + $0xf0] sm:$0xff] %vm101_vm0, %v2071_v49  ;;  %v2332_v48 = vsub.f32 %v2071_v49, %v2989_v39  ;;  %2880 = vmatmul.msk.f32.gmra.mxu3 %vm1830_vm3, %v6683_v24  ;;  %vm6838_vm6 = vcmp.eq.s32.totalorder %v3681_v14, %v6837_v41  ;;  %v1728_v49 = vshll.u32 %v1727_v15, 16 }
 0x405   :  { %v2605_v50 = vadd.f32 %v2798_v61, %v2604_v51  ;;  %v6106_v6 = vpop.f32.mrf.mxu3  ;;  %v2804_v2 = vsel %vm6838_vm6, 1.0, %v6812_v56  ;;  %v2805_v51 = vsel %vm6840_vm12, 1.0, %v6812_v56  ;;  %v2816_v63 = vsel %vm1830_vm3, 1.0, %v6812_v56 }
 0x406   :  { %2233 = vst.msk [vmem:[%s6484_s4 + $0x1d8] sm:$0xff] %vm2173_vm15, %v6093_v30  ;;  %v2396_v43 = vmul.f32 %v2332_v48, %v2332_v48  ;;  %vm1831_vm5 = vcmp.eq.s32.totalorder %v3681_v14, %v6093_v30  ;;  %v6841_v48 = vld [vmem:[#allocation57_spill] sm:$0xff] }
 0x407   :  { %v2606_v19 = vadd.f32 %v2799_v22, %v2605_v50  ;;  %2291 = vst.msk [vmem:[%s6483_s3 + $0x1a8] sm:$0xff] %vm101_vm0, %v6106_v6  ;;  %vm6842_vm8 = vcmp.eq.s32.totalorder %v3681_v14, %v6841_v48  ;;  %v2991_v22 = vld [vmem:[%s6480_s0 + $0x100] sm:$0xff]  ;;  %v2817_v48 = vsel %vm1831_vm5, 1.0, %v6812_v56 }
 0x408   :  { %v2489_v45 = vsel %vm101_vm0, %v2396_v43, 0.0  ;;  %v2806_v50 = vsel %vm6842_vm8, 1.0, %v6812_v56 }
 0x409   :  { %v2607_v57 = vadd.f32 %v2800_v46, %v2606_v19  ;;  %v2490_v59 = vadd.f32 %v2489_v45, %v2488_v60  ;;  %v1741_v46 = vcvt.f32.s32 %v5811_v52 }
 0x40b   :  { %v2608_v21 = vadd.f32 %v2801_v7, %v2607_v57  ;;  %v2074_v32 = vpop.f32.mrf.mxu1 }
 0x40c   :  { %2269 = vst.msk [vmem:[%s6483_s3 + $0xf8] sm:$0xff] %vm101_vm0, %v2074_v32  ;;  %v2333_v26 = vsub.f32 %v2074_v32, %v2990_v44  ;;  %2881 = vmatmul.msk.f32.gmra.mxu3 %vm1831_vm5, %v6683_v24  ;;  %v1742_v32 = vshll.u32 %v1741_v46, 16 }
 0x40d   :  { %v2609_v38 = vadd.f32 %v2802_v8, %v2608_v21  ;;  %v6148_v47 = vpop.f32.mrf.mxu3  ;;  %v2809_v21 = vsel %vm1823_vm4, 1.0, %v6812_v56 }
 0x40e   :  { %v2397_v35 = vmul.f32 %v2333_v26, %v2333_v26  ;;  %2292 = vst.msk [vmem:[%s6483_s3 + $0x1b0] sm:$0xff] %vm101_vm0, %v6148_v47 }
 0x40f   :  { %v2610_v60 = vadd.f32 %v2803_v55, %v2609_v38  ;;  %v2811_v55 = vsel %vm1825_vm2, 1.0, %v6812_v56 }
 0x410   :  { %v2491_v31 = vsel %vm101_vm0, %v2397_v35, 0.0  ;;  %v2812_v35 = vsel %vm1826_vm9, 1.0, %v6812_v56 }
 0x411   :  { %v2611_v28 = vadd.f32 %v2804_v2, %v2610_v60  ;;  %v2492_v9 = vadd.f32 %v2491_v31, %v2490_v59  ;;  %v1725_v54 = vpop.xlane.xlu2 %1724  ;;  %v2813_v2 = vsel %vm1827_vm10, 1.0, %v6812_v56 }
 0x412   :  { %v1726_v10 = vcvt.f32.s32 %v1725_v54 }
 0x413   :  { %v2612_v61 = vadd.f32 %v2805_v51, %v2611_v28  ;;  %v2077_v39 = vpop.f32.mrf.mxu1 }
 0x414   :  { %v1729_v53 = vadd.s32 %v1728_v49, %v1726_v10  ;;  %2270 = vst.msk [vmem:[%s6483_s3 + $0x100] sm:$0xff] %vm101_vm0, %v2077_v39  ;;  %v2334_v43 = vsub.f32 %v2077_v39, %v2991_v22 }
 0x415   :  { %v2613_v19 = vadd.f32 %v2806_v50, %v2612_v61 }
 0x416   :  { %2234 = vst.msk [vmem:[%s6484_s4 + $0x1e0] sm:$0xff] %vm2173_vm15, %v1729_v53  ;;  %v2398_v45 = vmul.f32 %v2334_v43, %v2334_v43  ;;  %vm1832_vm6 = vcmp.eq.s32.totalorder %v3681_v14, %v1729_v53  ;;  %v1755_v53 = vcvt.f32.s32 %v6025_v40 }
 0x417   :  { %v2614_v57 = vadd.f32 %v2807_v4, %v2613_v19  ;;  %2882 = vmatmul.msk.f32.gmra.mxu3 %vm1832_vm6, %v6683_v24  ;;  %v2818_v62 = vsel %vm1832_vm6, 1.0, %v6812_v56 }
 0x418   :  { %v2493_v52 = vsel %vm101_vm0, %v2398_v45, 0.0  ;;  %v1756_v45 = vshll.u32 %v1755_v53, 16 }
 0x419   :  { %v2615_v59 = vadd.f32 %v2808_v42, %v2614_v57  ;;  %v2494_v13 = vadd.f32 %v2493_v52, %v2492_v9  ;;  %v1739_v7 = vpop.xlane.xlu0 %1738  ;;  %v2814_v9 = vsel %vm1828_vm11, 1.0, %v6812_v56 }
 0x41a   :  { %v1740_v20 = vcvt.f32.s32 %v1739_v7 }
 0x41b   :  { %v2616_v8 = vadd.f32 %v2809_v21, %v2615_v59  ;;  %v2080_v44 = vpop.f32.mrf.mxu1  ;;  %v1769_v59 = vcvt.f32.s32 %v6039_v58 }
 0x41c   :  { %v1743_v26 = vadd.s32 %v1742_v32, %v1740_v20  ;;  %2271 = vst.msk [vmem:[%s6483_s3 + $0x108] sm:$0xff] %vm101_vm0, %v2080_v44  ;;  %v2335_v38 = vsub.f32 %v2080_v44, %v2992_v34  ;;  %v2994_v20 = vld [vmem:[%s6480_s0 + $0x118] sm:$0xff]  ;;  %v2995_v34 = vld [vmem:[%s6480_s0 + $0x128] sm:$0xff] }
 0x41d   :  { %v2617_v23 = vadd.f32 %v2810_v37, %v2616_v8  ;;  %v1770_v21 = vshll.u32 %v1769_v59, 16 }
 0x41e   :  { %2235 = vst.msk [vmem:[%s6484_s4 + $0x1e8] sm:$0xff] %vm2173_vm15, %v1743_v26  ;;  %v2399_v36 = vmul.f32 %v2335_v38, %v2335_v38  ;;  %vm1833_vm1 = vcmp.eq.s32.totalorder %v3681_v14, %v1743_v26  ;;  %v6843_v38 = vld [vmem:[#allocation59_spill] sm:$0xff] }
 0x41f   :  { %v2618_v15 = vadd.f32 %v2811_v55, %v2617_v23  ;;  %2883 = vmatmul.msk.f32.gmra.mxu3 %vm1833_vm1, %v6683_v24  ;;  %v2819_v43 = vsel %vm1833_vm1, 1.0, %v6812_v56  ;;  %v2339_v23 = vsub.f32 %v6843_v38, %v2995_v34 }
 0x420   :  { %v2495_v3 = vsel %vm101_vm0, %v2399_v36, 0.0 }
 0x421   :  { %v2619_v60 = vadd.f32 %v2812_v35, %v2618_v15  ;;  %v2496_v41 = vadd.f32 %v2495_v3, %v2494_v13  ;;  %v2996_v15 = vld [vmem:[%s6480_s0 + $0x130] sm:$0xff] }
 0x423   :  { %v2620_v31 = vadd.f32 %v2813_v2, %v2619_v60  ;;  %v2083_v28 = vpop.f32.mrf.mxu1  ;;  %v2403_v60 = vmul.f32 %v2339_v23, %v2339_v23  ;;  %v3005_v23 = vld [vmem:[%s6480_s0 + $0x170] sm:$0xff] }
 0x424   :  { %2272 = vst.msk [vmem:[%s6483_s3 + $0x110] sm:$0xff] %vm101_vm0, %v2083_v28  ;;  %v2336_v54 = vsub.f32 %v2083_v28, %v2993_v29  ;;  %v2999_v29 = vld [vmem:[%s6480_s0 + $0x140] sm:$0xff] }
 0x425   :  { %v2621_v0 = vadd.f32 %v2814_v9, %v2620_v31 }
 0x426   :  { %v2400_v51 = vmul.f32 %v2336_v54, %v2336_v54  ;;  %v2342_v54 = vsub.f32 %v5396_v27, %v2999_v29  ;;  %v3001_v27 = vld [vmem:[%s6480_s0 + $0x150] sm:$0xff] }
 0x427   :  { %v2622_v49 = vadd.f32 %v2815_v1, %v2621_v0 }
 0x428   :  { %v2497_v10 = vsel %vm101_vm0, %v2400_v51, 0.0 }
 0x429   :  { %v2623_v61 = vadd.f32 %v2816_v63, %v2622_v49  ;;  %v2498_v39 = vadd.f32 %v2497_v10, %v2496_v41  ;;  %v2998_v41 = vld [vmem:[%s6480_s0 + $0x138] sm:$0xff]  ;;  %v2503_v49 = vsel %vm101_vm0, %v2403_v60, 0.0 }
 0x42b   :  { %v2624_v50 = vadd.f32 %v2817_v48, %v2623_v61  ;;  %v2086_v22 = vpop.f32.mrf.mxu1 }
 0x42c   :  { %2273 = vst.msk [vmem:[%s6483_s3 + $0x118] sm:$0xff] %vm101_vm0, %v2086_v22  ;;  %v2337_v58 = vsub.f32 %v2086_v22, %v2994_v20  ;;  %v6844_v22 = vld [vmem:[#allocation50_spill] sm:$0xff] }
 0x42d   :  { %v2625_v5 = vadd.f32 %v2818_v62, %v2624_v50  ;;  %v2406_v50 = vmul.f32 %v2342_v54, %v2342_v54  ;;  %v2344_v62 = vsub.f32 %v6844_v22, %v3001_v27 }
 0x42e   :  { %v2401_v44 = vmul.f32 %v2337_v58, %v2337_v58 }
 0x42f   :  { %v2626_v19 = vadd.f32 %v2819_v43, %v2625_v5  ;;  %v2408_v59 = vmul.f32 %v2344_v62, %v2344_v62 }
 0x430   :  { %v2499_v35 = vsel %vm101_vm0, %v2401_v44, 0.0  ;;  %v6847_v44 = vld [vmem:[#allocation58_spill] sm:$0xff] }
 0x431   :  { %v2500_v31 = vadd.f32 %v2499_v35, %v2498_v39  ;;  %v2513_v34 = vsel %vm101_vm0, %v2408_v59, 0.0  ;;  %v3013_v59 = vld [vmem:[%s6480_s0 + $0x1b0] sm:$0xff] }
 0x44b   :  { %v6268_v4 = vpop.f32.mrf.mxu3 }
 0x44c   :  { %2293 = vst.msk [vmem:[%s6483_s3 + $0x1b8] sm:$0xff] %vm101_vm0, %v6268_v4 }
 0x45b   :  { %v6275_v30 = vpop.f32.mrf.mxu3 }
 0x45c   :  { %2294 = vst.msk [vmem:[%s6483_s3 + $0x1c0] sm:$0xff] %vm101_vm0, %v6275_v30 }
 0x468   :  { %v1753_v46 = vpop.xlane.xlu1 %1752 }
 0x469   :  { %v1754_v57 = vcvt.f32.s32 %v1753_v46  ;;  %v6845_v46 = vld [vmem:[#allocation54_spill] sm:$0xff] }
 0x46b   :  { %v1757_v42 = vadd.s32 %v1756_v45, %v1754_v57  ;;  %v6283_v52 = vpop.f32.mrf.mxu3 }
 0x46c   :  { %2295 = vst.msk [vmem:[%s6483_s3 + $0x1c8] sm:$0xff] %vm101_vm0, %v6283_v52 }
 0x46d   :  { %2236 = vst.msk [vmem:[%s6484_s4 + $0x1f0] sm:$0xff] %vm2173_vm15, %v1757_v42  ;;  %vm1834_vm14 = vcmp.eq.s32.totalorder %v3681_v14, %v1757_v42  ;;  %v2509_v42 = vsel %vm101_vm0, %v2406_v50, 0.0 }
 0x46e   :  { %v2820_v40 = vsel %vm1834_vm14, 1.0, %v6812_v56  ;;  %2884 = vmatmul.msk.f32.gmra.mxu3 %vm1834_vm14, %v6683_v24 }
 0x46f   :  { %v2627_v13 = vadd.f32 %v2820_v40, %v2626_v19  ;;  %v3003_v40 = vld [vmem:[%s6480_s0 + $0x160] sm:$0xff] }
 0x470   :  { %v1767_v7 = vpop.xlane.xlu2 %1766 }
 0x471   :  { %v1768_v32 = vcvt.f32.s32 %v1767_v7 }
 0x473   :  { %v1771_v8 = vadd.s32 %v1770_v21, %v1768_v32 }
 0x475   :  { %2237 = vst.msk [vmem:[%s6484_s4 + $0x1f8] sm:$0xff] %vm2173_vm15, %v1771_v8  ;;  %vm1835_vm4 = vcmp.eq.s32.totalorder %v3681_v14, %v1771_v8  ;;  %v2340_v14 = vsub.f32 %v5295_v18, %v2996_v15  ;;  %v2341_v18 = vsub.f32 %v5366_v16, %v2998_v41  ;;  %v3000_v16 = vld [vmem:[%s6480_s0 + $0x148] sm:$0xff] }
 0x476   :  { %v2821_v37 = vsel %vm1835_vm4, 1.0, %v6812_v56  ;;  %2885 = vmatmul.msk.f32.gmra.mxu3 %vm1835_vm4, %v6683_v24  ;;  %v2997_v24 = vld [vmem:[%s6480_s0 + $0x120] sm:$0xff]  ;;  %v2343_v10 = vsub.f32 %v5424_v25, %v3000_v16  ;;  %v3002_v25 = vld [vmem:[%s6480_s0 + $0x158] sm:$0xff]  ;;  %v3004_v8 = vld [vmem:[%s6480_s0 + $0x168] sm:$0xff] }
 0x477   :  { %v2628_v26 = vadd.f32 %v2821_v37, %v2627_v13  ;;  %v2404_v9 = vmul.f32 %v2340_v14, %v2340_v14  ;;  %v2405_v63 = vmul.f32 %v2341_v18, %v2341_v18  ;;  %v2345_v45 = vsub.f32 %v6845_v46, %v3002_v25  ;;  %v6846_v13 = vld [vmem:[#allocation13_spill] sm:$0xff] }
 0x478   :  { %v2407_v53 = vmul.f32 %v2343_v10, %v2343_v10  ;;  %v2346_v7 = vsub.f32 %v6846_v13, %v3003_v40  ;;  %v2347_v37 = vsub.f32 %v6847_v44, %v3004_v8  ;;  %v3009_v10 = vld [vmem:[%s6480_s0 + $0x190] sm:$0xff]  ;;  %v3012_v46 = vld [vmem:[%s6480_s0 + $0x1a8] sm:$0xff]  ;;  %v3015_v44 = vld [vmem:[%s6480_s0 + $0x1c0] sm:$0xff] }
 0x479   :  { %v2629_v55 = vrot.slane %v2628_v26, 4  ;;  %v2089_v36 = vpop.f32.mrf.mxu1  ;;  %v2505_v48 = vsel %vm101_vm0, %v2404_v9, 0.0  ;;  %v2507_v19 = vsel %vm101_vm0, %v2405_v63, 0.0  ;;  %v2409_v58 = vmul.f32 %v2345_v45, %v2345_v45 }
 0x47a   :  { %2274 = vst.msk [vmem:[%s6483_s3 + $0x120] sm:$0xff] %vm101_vm0, %v2089_v36  ;;  %v2338_v56 = vsub.f32 %v2089_v36, %v2997_v24  ;;  %v2511_v20 = vsel %vm101_vm0, %v2407_v53, 0.0  ;;  %v2410_v38 = vmul.f32 %v2346_v7, %v2346_v7  ;;  %v2411_v35 = vmul.f32 %v2347_v37, %v2347_v37  ;;  %v3006_v24 = vld [vmem:[%s6480_s0 + $0x178] sm:$0xff] }
 0x47b   :  { %v2630_v3 = vadd.f32 %v2629_v55, %v2628_v26  ;;  %v6848_v55 = vld [vmem:[#allocation27_spill] sm:$0xff]  ;;  %v2515_v14 = vsel %vm101_vm0, %v2409_v58, 0.0  ;;  %v2358_v37 = vsub.f32 %v6275_v30, %v3015_v44 }
 0x47c   :  { %v2402_v2 = vmul.f32 %v2338_v56, %v2338_v56  ;;  %v2348_v36 = vsub.f32 %v6848_v55, %v3005_v23  ;;  %v6849_v56 = vld [vmem:[#allocation26_spill] sm:$0xff]  ;;  %v2517_v41 = vsel %vm101_vm0, %v2410_v38, 0.0  ;;  %v2519_v54 = vsel %vm101_vm0, %v2411_v35, 0.0  ;;  %v3016_v23 = vld [vmem:[%s6480_s0 + $0x1c8] sm:$0xff] }
 0x47d   :  { %v2631_v28 = vrot.slane %v2630_v3, 2 }
 0x47e   :  { %v2501_v0 = vsel %vm101_vm0, %v2402_v2, 0.0  ;;  %v2412_v18 = vmul.f32 %v2348_v36, %v2348_v36  ;;  %v3007_v2 = vld [vmem:[%s6480_s0 + $0x180] sm:$0xff] }
 0x47f   :  { %v2502_v1 = vadd.f32 %v2501_v0, %v2500_v31  ;;  %v2632_v51 = vadd.f32 %v2631_v28, %v2630_v3  ;;  %v2349_v3 = vsub.f32 %v6849_v56, %v3006_v24  ;;  %v6850_v31 = vld [vmem:[#allocation15_spill] sm:$0xff] }
 0x480   :  { %v2350_v28 = vsub.f32 %v6850_v31, %v3007_v2  ;;  %v2521_v63 = vsel %vm101_vm0, %v2412_v18, 0.0 }
 0x481   :  { %v2504_v61 = vadd.f32 %v2503_v49, %v2502_v1  ;;  %v2633_v39 = vrot.slane %v2632_v51, 1  ;;  %v2413_v0 = vmul.f32 %v2349_v3, %v2349_v3  ;;  %v3008_v1 = vld [vmem:[%s6480_s0 + $0x188] sm:$0xff]  ;;  %v3018_v3 = vld [vmem:[%s6480_s0 + $0x1d8] sm:$0xff] }
 0x482   :  { %v2414_v16 = vmul.f32 %v2350_v28, %v2350_v28 }
 0x483   :  { %v2506_v5 = vadd.f32 %v2505_v48, %v2504_v61  ;;  %v2634_v43 = vadd.f32 %v2633_v39, %v2632_v51  ;;  %v2351_v51 = vsub.f32 %v5845_v33, %v3008_v1  ;;  %v2352_v61 = vsub.f32 %v5980_v12, %v3009_v10  ;;  %v3010_v33 = vld [vmem:[%s6480_s0 + $0x198] sm:$0xff] }
 0x484   :  { %v2523_v48 = vsel %vm101_vm0, %v2413_v0, 0.0  ;;  %v2353_v27 = vsub.f32 %v6017_v11, %v3010_v33  ;;  %v2525_v62 = vsel %vm101_vm0, %v2414_v16, 0.0  ;;  %v2355_v11 = vsub.f32 %v6106_v6, %v3012_v46 }
 0x485   :  { %v2508_v57 = vadd.f32 %v2507_v19, %v2506_v5  ;;  %2635 = vst [vmem:[#allocation2] sm:$0x1] %v2634_v43  ;;  %v2415_v50 = vmul.f32 %v2351_v51, %v2351_v51  ;;  %v2416_v5 = vmul.f32 %v2352_v61, %v2352_v61  ;;  %v3011_v43 = vld [vmem:[%s6480_s0 + $0x1a0] sm:$0xff] }
 0x486   :  { %v2354_v12 = vsub.f32 %v6059_v17, %v3011_v43  ;;  %v2417_v25 = vmul.f32 %v2353_v27, %v2353_v27  ;;  %v2356_v17 = vsub.f32 %v6148_v47, %v3013_v59  ;;  %v2419_v6 = vmul.f32 %v2355_v11, %v2355_v11  ;;  %2652 = dma.vmem_to_hbm [thread:$0]  %s2648_s2, 16, %s2650_s10, [#allocation3]  }
 0x487   :  { %v2510_v21 = vadd.f32 %v2509_v42, %v2508_v57  ;;  %v6353_v32 = vpop.f32.mrf.mxu3  ;;  %v2527_v53 = vsel %vm101_vm0, %v2415_v50, 0.0  ;;  %v2529_v57 = vsel %vm101_vm0, %v2416_v5, 0.0  ;;  %v3021_v50 = vld [vmem:[%s6480_s0 + $0x1f0] sm:$0xff] }
 0x488   :  { %2296 = vst.msk [vmem:[%s6483_s3 + $0x1d0] sm:$0xff] %vm101_vm0, %v6353_v32  ;;  %v2418_v42 = vmul.f32 %v2354_v12, %v2354_v12  ;;  %v2531_v7 = vsel %vm101_vm0, %v2417_v25, 0.0  ;;  %v2420_v47 = vmul.f32 %v2356_v17, %v2356_v17  ;;  %v3022_v12 = vld [vmem:[%s6480_s0 + $0x1f8] sm:$0xff] }
 0x489   :  { %v2512_v26 = vadd.f32 %v2511_v20, %v2510_v21  ;;  %v3014_v21 = vld [vmem:[%s6480_s0 + $0x1b8] sm:$0xff] }
 0x48a   :  { %v2357_v20 = vsub.f32 %v6268_v4, %v3014_v21  ;;  %v2533_v8 = vsel %vm101_vm0, %v2418_v42, 0.0  ;;  %v2359_v4 = vsub.f32 %v6283_v52, %v3016_v23  ;;  %v2537_v36 = vsel %vm101_vm0, %v2420_v47, 0.0 }
 0x48b   :  { %v2514_v15 = vadd.f32 %v2513_v34, %v2512_v26  ;;  %v2535_v34 = vsel %vm101_vm0, %v2419_v6, 0.0 }
 0x48c   :  { %v2421_v38 = vmul.f32 %v2357_v20, %v2357_v20  ;;  %v2423_v52 = vmul.f32 %v2359_v4, %v2359_v4 }
 0x48d   :  { %v2516_v60 = vadd.f32 %v2515_v14, %v2514_v15  ;;  %v2422_v15 = vmul.f32 %v2358_v37, %v2358_v37  ;;  %v3017_v14 = vld [vmem:[%s6480_s0 + $0x1d0] sm:$0xff] }
 0x48e   :  { %v2360_v30 = vsub.f32 %v6353_v32, %v3017_v14  ;;  %v2539_v56 = vsel %vm101_vm0, %v2421_v38, 0.0  ;;  %v3019_v32 = vld [vmem:[%s6480_s0 + $0x1e0] sm:$0xff] }
 0x48f   :  { %v2518_v9 = vadd.f32 %v2517_v41, %v2516_v60  ;;  %v2158_v29 = vpop.f32.mrf.mxu3  ;;  %v2541_v18 = vsel %vm101_vm0, %v2422_v15, 0.0 }
 0x490   :  { %2297 = vst.msk [vmem:[%s6483_s3 + $0x1d8] sm:$0xff] %vm101_vm0, %v2158_v29  ;;  %v2361_v60 = vsub.f32 %v2158_v29, %v3018_v3  ;;  %v2424_v2 = vmul.f32 %v2360_v30, %v2360_v30 }
 0x491   :  { %v2520_v49 = vadd.f32 %v2519_v54, %v2518_v9  ;;  %v2543_v9 = vsel %vm101_vm0, %v2423_v52, 0.0 }
 0x492   :  { %v2425_v54 = vmul.f32 %v2361_v60, %v2361_v60  ;;  %v2545_v1 = vsel %vm101_vm0, %v2424_v2, 0.0 }
 0x493   :  { %v2522_v39 = vadd.f32 %v2521_v63, %v2520_v49 }
 0x494   :  { %v2547_v29 = vsel %vm101_vm0, %v2425_v54, 0.0 }
 0x495   :  { %v2524_v22 = vadd.f32 %v2523_v48, %v2522_v39  ;;  %v3020_v39 = vld [vmem:[%s6480_s0 + $0x1e8] sm:$0xff]  ;;  %s3078_s0 = smov [#allocation4]  }
 0x497   :  { %v2526_v19 = vadd.f32 %v2525_v62, %v2524_v22 }
 0x499   :  { %v2528_v45 = vadd.f32 %v2527_v53, %v2526_v19 }
 0x49a   :  { %v2161_v40 = vpop.f32.mrf.mxu3 }
 0x49b   :  { %v2530_v13 = vadd.f32 %v2529_v57, %v2528_v45  ;;  %2298 = vst.msk [vmem:[%s6483_s3 + $0x1e0] sm:$0xff] %vm101_vm0, %v2161_v40  ;;  %v2362_v31 = vsub.f32 %v2161_v40, %v3019_v32 }
 0x49d   :  { %v2532_v58 = vadd.f32 %v2531_v7, %v2530_v13  ;;  %v2426_v51 = vmul.f32 %v2362_v31, %v2362_v31 }
 0x49f   :  { %v2534_v26 = vadd.f32 %v2533_v8, %v2532_v58  ;;  %v2549_v16 = vsel %vm101_vm0, %v2426_v51, 0.0 }
 0x4a1   :  { %v2536_v55 = vadd.f32 %v2535_v34, %v2534_v26 }
 0x4a2   :  { %v2164_v35 = vpop.f32.mrf.mxu3 }
 0x4a3   :  { %v2538_v24 = vadd.f32 %v2537_v36, %v2536_v55  ;;  %2299 = vst.msk [vmem:[%s6483_s3 + $0x1e8] sm:$0xff] %vm101_vm0, %v2164_v35  ;;  %v2363_v48 = vsub.f32 %v2164_v35, %v3020_v39 }
 0x4a5   :  { %v2540_v41 = vadd.f32 %v2539_v56, %v2538_v24  ;;  %v2427_v27 = vmul.f32 %v2363_v48, %v2363_v48 }
 0x4a7   :  { %v2542_v28 = vadd.f32 %v2541_v18, %v2540_v41  ;;  %v2551_v5 = vsel %vm101_vm0, %v2427_v27, 0.0 }
 0x4a9   :  { %v2544_v0 = vadd.f32 %v2543_v9, %v2542_v28 }
 0x4ab   :  { %v2546_v49 = vadd.f32 %v2545_v1, %v2544_v0 }
 0x4ad   :  { %v2548_v63 = vadd.f32 %v2547_v29, %v2546_v49 }
 0x4af   :  { %v2550_v10 = vadd.f32 %v2549_v16, %v2548_v63 }
 0x4b1   :  { %v2552_v53 = vadd.f32 %v2551_v5, %v2550_v10 }
 0x4f1   :  { %v2167_v61 = vpop.f32.mrf.mxu3 }
 0x4f2   :  { %2300 = vst.msk [vmem:[%s6483_s3 + $0x1f0] sm:$0xff] %vm101_vm0, %v2167_v61  ;;  %v2364_v33 = vsub.f32 %v2167_v61, %v3021_v50 }
 0x4f4   :  { %v2428_v22 = vmul.f32 %v2364_v33, %v2364_v33 }
 0x4f6   :  { %v2553_v43 = vsel %vm101_vm0, %v2428_v22, 0.0 }
 0x4f7   :  { %v2554_v46 = vadd.f32 %v2553_v43, %v2552_v53 }
 0x4f9   :  { %v2170_v62 = vpop.f32.mrf.mxu3 }
 0x4fa   :  { %2301 = vst.msk [vmem:[%s6483_s3 + $0x1f8] sm:$0xff] %vm101_vm0, %v2170_v62  ;;  %v2365_v19 = vsub.f32 %v2170_v62, %v3022_v12  ;;  %s2658_s3 = sshll.u32 %s3078_s0, 4  ;;  %s2659_s3 = int_to_ptr.vmem [resolvable:$true] %s2658_s3 }
 0x4fc   :  { %v2429_v25 = vmul.f32 %v2365_v19, %v2365_v19 }
 0x4fe   :  { %v2555_v11 = vsel %vm101_vm0, %v2429_v25, 0.0 }
 0x4ff   :  { %v2556_v45 = vadd.f32 %v2555_v11, %v2554_v46 }
 0x501   :  { %2557 = vadd.xlane.f32.xlu0 %v2556_v45 }
 0x574   :  { %v2558_v57 = vpop.xlane.xlu0 %2557 }
 0x575   :  { %v2559_v42 = vrot.slane %v2558_v57, 4 }
 0x577   :  { %v2560_v59 = vadd.f32 %v2559_v42, %v2558_v57 }
 0x579   :  { %v2561_v17 = vrot.slane %v2560_v59, 2 }
 0x57b   :  { %v2562_v40 = vadd.f32 %v2561_v17, %v2560_v59 }
 0x57d   :  { %v2563_v13 = vrot.slane %v2562_v40, 1 }
 0x57f   :  { %v2564_v7 = vadd.f32 %v2563_v13, %v2562_v40 }
 0x581   :  { %2950 = vpush %v2564_v7 }
 0x5b2   :  { %s2951_s14 = spop %2950 }
 0x5b3   :  { %v2636_v6 = vstv %s2951_s14 }
 0x5b4   :  { %2637 = vst [vmem:[#allocation4] sm:$0x1] %v2636_v6 }
 0x5b5   :  { %2663 = dma.vmem_to_hbm [thread:$0]  %s2659_s3, 16, %s2661_s13, [#allocation5]  }
 0x5b6   :  { %3071 = dma.done.wait [#allocation3], 16  }
 0x5b7   :  { %3072 = vsyncadd [#allocation3], 4294967280 }
 0x5b8   :  { %3073 = dma.done.wait [#allocation5], 16  }
 0x5b9   :  { %3074 = vsyncadd [#allocation5], 4294967280 }
 0x5ba   :  { %2676 = vsyncpa [#allocation3], 1 }
 0x5bb   :  { %2677 = vsyncpa [#allocation5], 1 }

</bundles_post_ra>
